<compile_context>
chip_gen: v6e
topology: v6e:2x2x1
jax: 0.10.0
libtpu: 0.0.40
codegen_flags: <defaults>
</compile_context>

<pallas_src>
import functools

import jax
import jax.numpy as jnp
from jax import lax
from jax.experimental import pallas as pl
from jax.experimental.pallas import tpu as pltpu


# ----------------------------- Pallas kernel ------------------------------- #

def _rpsa_kernel(x_ref, w_ref, bias_ref, relh_ref, relw_ref, o_ref, *,
                 heads, dim, H, W, Bt, HD_pad):
    HW = H * W
    HD = heads * dim
    NB = heads * Bt
    f32 = jnp.float32
    bf16 = jnp.bfloat16

    # Fused q/k/v projection: [Bt*HW, C] @ [C, 3*HD]  (bf16 inputs, f32 acc).
    x2 = x_ref[...].reshape(Bt * HW, -1)
    qkv = lax.dot_general(
        x2, w_ref[...],
        dimension_numbers=(((1,), (0,)), ((), ())),
        preferred_element_type=f32)                              # [Bt*HW, 3*HD]

    def split_heads(cols):
        # [Bt*HW, HD] f32 -> head-batched [heads*Bt, HW, dim] bf16 (single cast)
        m = cols.reshape(Bt, HW, heads, dim)
        m = jnp.transpose(m, (2, 0, 1, 3))                       # [heads, Bt, HW, dim]
        return m.reshape(NB, HW, dim).astype(bf16)

    q = split_heads(qkv[:, :HD])            # dim**-0.5 already folded into w_q
    k = split_heads(qkv[:, HD:2 * HD])
    v = split_heads(qkv[:, 2 * HD:])

    # Content logits, batched over heads*images: [NB, HWq, HWk] (MXU, f32 acc).
    logits = lax.dot_general(
        q, k,
        dimension_numbers=(((2,), (2,)), ((0,), (0,))),
        preferred_element_type=f32)

    # Separable relative-position logits against key-expanded bf16 tables:
    #   relh_ref[hq, k, d] = rel_emb_h[(k // W) - hq + H - 1, d]
    #   relw_ref[wq, k, d] = rel_emb_w[(k %  W) - wq + W - 1, d]
    # Batched over the query row/col; the [wq, ..., hq] -> [..., hq, wq] fixup is a
    # small XLU transpose (no dense permutation / expansion matmuls).
    q4 = q.reshape(NB, H, W, dim)
    rh = lax.dot_general(
        q4, relh_ref[...],
        dimension_numbers=(((3,), (2,)), ((1,), (0,))),
        preferred_element_type=f32)                              # [hq, NB, wq, HWk]
    rw = lax.dot_general(
        q4, relw_ref[...],
        dimension_numbers=(((3,), (2,)), ((2,), (0,))),
        preferred_element_type=f32)                              # [wq, NB, hq, HWk]
    rel = (jnp.transpose(rh, (1, 0, 2, 3)) +
           jnp.transpose(rw, (1, 2, 0, 3))).reshape(NB, HW, HW)

    # Additive key-mask bias (0 attend / -1e30 masked), broadcast over heads/queries.
    bias = jnp.broadcast_to(bias_ref[...][None],
                            (heads, Bt, 1, HW)).reshape(NB, 1, HW)
    logits = logits + rel + bias

    # Softmax over keys (EUP exp + approximate reciprocal).
    m = jnp.max(logits, axis=-1, keepdims=True)
    e = jnp.exp(logits - m)
    s = jnp.sum(e, axis=-1, keepdims=True)
    p = (e * pl.reciprocal(s, approx=True)).astype(bf16)

    # Attention output p @ v, batched: [NB, HW, dim]  ->  fold_heads [Bt, HW, HD].
    out = lax.dot_general(
        p, v,
        dimension_numbers=(((2,), (1,)), ((0,), (0,))),
        preferred_element_type=f32)
    outf = jnp.transpose(out.reshape(heads, Bt, HW, dim),
                         (1, 2, 0, 3)).reshape(Bt, HW, HD)

    # Lane-dense store: pad the channel axis to a multiple of 128 lanes.
    if HD_pad != HD:
        outf = jnp.concatenate(
            [outf, jnp.zeros((Bt, HW, HD_pad - HD), f32)], axis=-1)
    o_ref[...] = outf


# ------------------------------ Pallas wrapper ------------------------------ #

def _pick_block_batch(B, HW):
    """Images per grid step: fill MXU rows (target <=256) but keep >=2 grid
    steps when the batch allows it (v7x has 2 TensorCores)."""
    best = 1
    for bt in range(2, B + 1):
        if B % bt == 0 and bt * HW <= 256 and B // bt >= 2:
            best = bt
    return best


def rpsa_forward(x, input_mask, w_q, w_k, w_v, rel_emb_w, rel_emb_h):
    B, C, H, W = x.shape
    heads, dim = w_q.shape[1], w_q.shape[2]
    HW = H * W
    HD = heads * dim
    HD_pad = ((HD + 127) // 128) * 128
    Bt = _pick_block_batch(B, HW)

    # NHWC bf16 activations + fused bf16 [C, 3*HD] weight (q | k | v), with the
    # dim**-0.5 query scale folded into w_q (linear => exactly equivalent).
    x_flat = jnp.transpose(x, (0, 2, 3, 1)).reshape(B, HW, C).astype(jnp.bfloat16)
    w_all = jnp.concatenate(
        [(w_q * dim ** (-0.5)).reshape(C, HD),
         w_k.reshape(C, HD),
         w_v.reshape(C, HD)], axis=1).astype(jnp.bfloat16)

    # Additive mask bias precomputed once (0 attend / -1e30 masked).
    bias = jnp.where(input_mask.reshape(B, 1, HW), 0.0, -1e30).astype(jnp.float32)

    # Relative embeddings gathered to absolute tables (rel_to_abs equivalent) and
    # pre-expanded over the full flattened key axis; bf16 MXU operands.
    ih = jnp.arange(H)
    iw = jnp.arange(W)
    relh_abs = rel_emb_h[ih[None, :] - ih[:, None] + H - 1]      # [hq, hk, dim]
    relw_abs = rel_emb_w[iw[None, :] - iw[:, None] + W - 1]      # [wq, wk, dim]
    kidx = jnp.arange(HW)
    relh_exp = relh_abs[:, kidx // W, :].astype(jnp.bfloat16)    # [H, HW, dim]
    relw_exp = relw_abs[:, kidx % W, :].astype(jnp.bfloat16)     # [W, HW, dim]

    kernel = functools.partial(_rpsa_kernel, heads=heads, dim=dim, H=H, W=W,
                               Bt=Bt, HD_pad=HD_pad)

    flops = (2 * B * HW * C * 3 * HD                    # fused projection
             + 4 * 2 * B * heads * HW * HW * dim)       # logits + rel_h + rel_w + p@v
    bytes_accessed = (x_flat.size * 2 + w_all.size * 2 + bias.size * 4
                      + relh_exp.size * 2 + relw_exp.size * 2
                      + B * HW * HD_pad * 4)
    cost = pl.CostEstimate(flops=flops,
                           transcendentals=B * heads * HW * HW,
                           bytes_accessed=bytes_accessed)

    out = pl.pallas_call(
        kernel,
        out_shape=jax.ShapeDtypeStruct((B, HW, HD_pad), jnp.float32),
        grid=(B // Bt,),
        in_specs=[
            pl.BlockSpec((Bt, HW, C), lambda b: (b, 0, 0)),      # x (Bt images/step)
            pl.BlockSpec((C, 3 * HD), lambda b: (0, 0)),         # fused weights (resident)
            pl.BlockSpec((Bt, 1, HW), lambda b: (b, 0, 0)),      # mask bias
            pl.BlockSpec((H, HW, dim), lambda b: (0, 0, 0)),     # rel_h table (key-expanded)
            pl.BlockSpec((W, HW, dim), lambda b: (0, 0, 0)),     # rel_w table (key-expanded)
        ],
        out_specs=pl.BlockSpec((Bt, HW, HD_pad), lambda b: (b, 0, 0)),
        compiler_params=pltpu.CompilerParams(
            dimension_semantics=("parallel",)),
        cost_estimate=cost,
    )(x_flat, w_all, bias, relh_exp, relw_exp)

    # fold_heads layout [B, H, W, heads*dim] (drop lane padding) -> NCHW
    out = out[..., :HD].reshape(B, H, W, HD)
    return jnp.transpose(out, (0, 3, 1, 2))


# --------------------- pure-JAX reference (torch semantics) ----------------- #

def _rel_to_abs(x):
    bs, heads, L, _ = x.shape
    x = jnp.concatenate([x, jnp.zeros((bs, heads, L, 1), x.dtype)], axis=3)
    flat = x.reshape(bs, heads, -1)
    flat = jnp.concatenate([flat, jnp.zeros((bs, heads, L - 1), x.dtype)], axis=2)
    final = flat.reshape(bs, heads, L + 1, 2 * L - 1)
    return final[:, :, :L, L - 1:]


def _rel_logits_1d(q, rel_k, perm):
    bs, n, hh, ww, _ = q.shape
    rl = jnp.einsum('bhxyd,md->bhxym', q, rel_k)
    rl = rl.reshape(bs, n * hh, ww, 2 * ww - 1)
    rl = _rel_to_abs(rl)
    rl = rl.reshape(bs, n, hh, ww, ww)
    rl = jnp.tile(rl[:, :, :, None, :, :], (1, 1, 1, hh, 1, 1))
    return jnp.transpose(rl, perm)


def _rpsa_reference(x, input_mask, w_q, w_k, w_v, rel_emb_w, rel_emb_h):
    B, C, H, W = x.shape
    heads, dim = w_q.shape[1], w_q.shape[2]
    xp = jnp.transpose(x, (0, 2, 3, 1))
    q = jnp.einsum('bhwc,cnp->bnhwp', xp, w_q)
    k = jnp.einsum('bhwc,cnp->bnhwp', xp, w_k)
    v = jnp.einsum('bhwc,cnp->bnhwp', xp, w_v)
    q = q * dim ** (-0.5)
    logits = jnp.einsum('bnhwd,bnpqd->bnhwpq', q, k)
    rw = _rel_logits_1d(q, rel_emb_w, (0, 1, 2, 4, 3, 5))
    rh = _rel_logits_1d(jnp.transpose(q, (0, 1, 3, 2, 4)), rel_emb_h,
                        (0, 1, 4, 2, 5, 3))
    logits = logits + rw + rh
    weights = logits.reshape(B, heads, H, W, H * W)
    bias = jnp.where(input_mask.reshape(B, 1, 1, 1, H * W), 0.0, -jnp.inf)
    weights = jax.nn.softmax(weights + bias, axis=-1)
    weights = weights.reshape(B, heads, H, W, H, W)
    out = jnp.einsum('bnhwpq,bnpqd->bhwnd', weights, v)
    out = out.reshape(B, H, W, heads * dim)
    return jnp.transpose(out, (0, 3, 1, 2))


# ----------------------------------- main ----------------------------------- #

if __name__ == "__main__":
    B, C, H, W, heads = 2, 32, 8, 8, 4
    dim = C // heads

    key = jax.random.PRNGKey(0)
    kx, kq, kk, kv, krw, krh = jax.random.split(key, 6)
    x = jax.random.normal(kx, (B, C, H, W), jnp.float32)
    input_mask = jnp.ones((B, H, W), dtype=bool).at[:, -1, -2:].set(False)

    # deterministic parameter init (matches __init__ shapes / stds)
    w_q = 0.01 * jax.random.normal(kq, (C, heads, dim), jnp.float32)
    w_k = 0.01 * jax.random.normal(kk, (C, heads, dim), jnp.float32)
    w_v = 0.01 * jax.random.normal(kv, (C, heads, dim), jnp.float32)
    rel_emb_w = dim ** (-0.5) * jax.random.normal(krw, (2 * W - 1, dim), jnp.float32)
    rel_emb_h = dim ** (-0.5) * jax.random.normal(krh, (2 * H - 1, dim), jnp.float32)

    out = jax.jit(rpsa_forward)(x, input_mask, w_q, w_k, w_v, rel_emb_w, rel_emb_h)
    out = jax.block_until_ready(out)

    with jax.default_matmul_precision("highest"):
        ref = _rpsa_reference(x, input_mask, w_q, w_k, w_v, rel_emb_w, rel_emb_h)
    ref = jax.block_until_ready(ref)

    assert out.shape == (B, C, H, W)
    # kernel runs the MXU in bf16 with f32 accumulation -> compare at bf16 tolerance
    assert bool(jnp.allclose(out, ref, rtol=2e-2, atol=2e-3)), \
        float(jnp.max(jnp.abs(out - ref)))

    print("KERNEL_OK")
</pallas_src>

<mosaic_0001>
module attributes {stable_mosaic.version = 11 : i64} {
  func.func @_rpsa_kernel(%arg0: i32, %arg1: memref<1x64x32xbf16, #tpu.memory_space<vmem>>, %arg2: memref<32x96xbf16, #tpu.memory_space<vmem>>, %arg3: memref<1x1x64xf32, #tpu.memory_space<vmem>>, %arg4: memref<8x64x8xbf16, #tpu.memory_space<vmem>>, %arg5: memref<8x64x8xbf16, #tpu.memory_space<vmem>>, %arg6: memref<1x64x128xf32, #tpu.memory_space<vmem>>) attributes {dimension_semantics = [#tpu.dimension_semantics<parallel>], iteration_bounds = array<i64: 2>, scalar_prefetch = 0 : i64, scratch_operands = 0 : i64, tpu.core_type = #tpu.core_type<tc>, window_params = [{transform_indices = @transform_0, window_bounds = array<i64: 1, 64, 32>}, {pipeline_mode = #tpu.pipeline_mode<synchronous>, transform_indices = @transform_1, window_bounds = array<i64: 32, 96>}, {transform_indices = @transform_2, window_bounds = array<i64: 1, 1, 64>}, {pipeline_mode = #tpu.pipeline_mode<synchronous>, transform_indices = @transform_3, window_bounds = array<i64: 8, 64, 8>}, {pipeline_mode = #tpu.pipeline_mode<synchronous>, transform_indices = @transform_4, window_bounds = array<i64: 8, 64, 8>}, {transform_indices = @transform_5, window_bounds = array<i64: 1, 64, 128>}]} {
    %c0 = arith.constant 0 : index
    %c0_0 = arith.constant 0 : index
    %c0_1 = arith.constant 0 : index
    %0 = vector.load %arg1[%c0, %c0_0, %c0_1] : memref<1x64x32xbf16, #tpu.memory_space<vmem>>, vector<1x64x32xbf16>
    %1 = vector.shape_cast %0 : vector<1x64x32xbf16> to vector<64x32xbf16>
    %c0_2 = arith.constant 0 : index
    %c0_3 = arith.constant 0 : index
    %2 = vector.load %arg2[%c0_2, %c0_3] : memref<32x96xbf16, #tpu.memory_space<vmem>>, vector<32x96xbf16>
    %cst = arith.constant dense<0.000000e+00> : vector<64x96xf32>
    %3 = tpu.matmul %1, %2, %cst {dimension_numbers = #tpu.dot_dimension_numbers<[1], [0], [0], [1], [0, 0, 1, 1], [], []>} : vector<64x32xbf16>, vector<32x96xbf16>, vector<64x96xf32> -> vector<64x96xf32>
    %4 = vector.extract_strided_slice %3 {offsets = [0, 0], sizes = [64, 32], strides = [1, 1]} : vector<64x96xf32> to vector<64x32xf32>
    %5 = vector.shape_cast %4 : vector<64x32xf32> to vector<1x64x4x8xf32>
    %6 = tpu.transpose %5, [2, 0, 1, 3] : vector<1x64x4x8xf32> -> vector<4x1x64x8xf32>
    %7 = vector.shape_cast %6 : vector<4x1x64x8xf32> to vector<4x64x8xf32>
    %8 = arith.truncf %7 : vector<4x64x8xf32> to vector<4x64x8xbf16>
    %9 = vector.extract_strided_slice %3 {offsets = [0, 32], sizes = [64, 32], strides = [1, 1]} : vector<64x96xf32> to vector<64x32xf32>
    %10 = vector.shape_cast %9 : vector<64x32xf32> to vector<1x64x4x8xf32>
    %11 = tpu.transpose %10, [2, 0, 1, 3] : vector<1x64x4x8xf32> -> vector<4x1x64x8xf32>
    %12 = vector.shape_cast %11 : vector<4x1x64x8xf32> to vector<4x64x8xf32>
    %13 = arith.truncf %12 : vector<4x64x8xf32> to vector<4x64x8xbf16>
    %14 = vector.extract_strided_slice %3 {offsets = [0, 64], sizes = [64, 32], strides = [1, 1]} : vector<64x96xf32> to vector<64x32xf32>
    %15 = vector.shape_cast %14 : vector<64x32xf32> to vector<1x64x4x8xf32>
    %16 = tpu.transpose %15, [2, 0, 1, 3] : vector<1x64x4x8xf32> -> vector<4x1x64x8xf32>
    %17 = vector.shape_cast %16 : vector<4x1x64x8xf32> to vector<4x64x8xf32>
    %18 = arith.truncf %17 : vector<4x64x8xf32> to vector<4x64x8xbf16>
    %cst_4 = arith.constant dense<0.000000e+00> : vector<4x64x64xf32>
    %19 = tpu.matmul %8, %13, %cst_4 {dimension_numbers = #tpu.dot_dimension_numbers<[2], [2], [1], [1], [0, 0, 0, 1, 1, 1], [0], [0]>} : vector<4x64x8xbf16>, vector<4x64x8xbf16>, vector<4x64x64xf32> -> vector<4x64x64xf32>
    %20 = vector.shape_cast %8 : vector<4x64x8xbf16> to vector<4x8x8x8xbf16>
    %c0_5 = arith.constant 0 : index
    %c0_6 = arith.constant 0 : index
    %c0_7 = arith.constant 0 : index
    %21 = vector.load %arg4[%c0_5, %c0_6, %c0_7] : memref<8x64x8xbf16, #tpu.memory_space<vmem>>, vector<8x64x8xbf16>
    %cst_8 = arith.constant dense<0.000000e+00> : vector<8x4x8x64xf32>
    %22 = tpu.matmul %20, %21, %cst_8 {dimension_numbers = #tpu.dot_dimension_numbers<[3], [2], [0, 2], [1], [0, 1, 0, 0, 0, 2, 1, 1], [1], [0]>} : vector<4x8x8x8xbf16>, vector<8x64x8xbf16>, vector<8x4x8x64xf32> -> vector<8x4x8x64xf32>
    %c0_9 = arith.constant 0 : index
    %c0_10 = arith.constant 0 : index
    %c0_11 = arith.constant 0 : index
    %23 = vector.load %arg5[%c0_9, %c0_10, %c0_11] : memref<8x64x8xbf16, #tpu.memory_space<vmem>>, vector<8x64x8xbf16>
    %cst_12 = arith.constant dense<0.000000e+00> : vector<8x4x8x64xf32>
    %24 = tpu.matmul %20, %23, %cst_12 {dimension_numbers = #tpu.dot_dimension_numbers<[3], [2], [0, 1], [1], [0, 2, 0, 0, 0, 1, 1, 1], [2], [0]>} : vector<4x8x8x8xbf16>, vector<8x64x8xbf16>, vector<8x4x8x64xf32> -> vector<8x4x8x64xf32>
    %25 = tpu.transpose %22, [1, 0, 2, 3] : vector<8x4x8x64xf32> -> vector<4x8x8x64xf32>
    %26 = tpu.transpose %24, [1, 2, 0, 3] : vector<8x4x8x64xf32> -> vector<4x8x8x64xf32>
    %27 = arith.addf %25, %26 : vector<4x8x8x64xf32>
    %28 = vector.shape_cast %27 : vector<4x8x8x64xf32> to vector<4x64x64xf32>
    %c0_13 = arith.constant 0 : index
    %c0_14 = arith.constant 0 : index
    %c0_15 = arith.constant 0 : index
    %29 = vector.load %arg3[%c0_13, %c0_14, %c0_15] : memref<1x1x64xf32, #tpu.memory_space<vmem>>, vector<1x1x64xf32>
    %30 = vector.shape_cast %29 : vector<1x1x64xf32> to vector<1x1x1x64xf32>
    %31 = vector.shape_cast %30 : vector<1x1x1x64xf32> to vector<1x1x1x64xf32>
    %32 = vector.broadcast %31 : vector<1x1x1x64xf32> to vector<4x1x1x64xf32>
    %33 = vector.shape_cast %32 : vector<4x1x1x64xf32> to vector<4x1x64xf32>
    %34 = arith.addf %19, %28 : vector<4x64x64xf32>
    %35 = vector.broadcast %33 : vector<4x1x64xf32> to vector<4x64x64xf32>
    %36 = arith.addf %34, %35 : vector<4x64x64xf32>
    %cst_16 = arith.constant dense<0xFF800000> : vector<4x64xf32>
    %37 = vector.multi_reduction <maximumf>, %36, %cst_16 [2] : vector<4x64x64xf32> to vector<4x64xf32>
    %38 = vector.shape_cast %37 : vector<4x64xf32> to vector<4x64x1xf32>
    %39 = vector.broadcast %38 : vector<4x64x1xf32> to vector<4x64x64xf32>
    %40 = arith.subf %36, %39 : vector<4x64x64xf32>
    %41 = math.exp %40 : vector<4x64x64xf32>
    %cst_17 = arith.constant dense<0.000000e+00> : vector<4x64xf32>
    %42 = vector.multi_reduction <add>, %41, %cst_17 [2] : vector<4x64x64xf32> to vector<4x64xf32>
    %43 = vector.shape_cast %42 : vector<4x64xf32> to vector<4x64x1xf32>
    %44 = tpu.reciprocal %43 {approx = true} : vector<4x64x1xf32> -> vector<4x64x1xf32>
    %45 = vector.broadcast %44 : vector<4x64x1xf32> to vector<4x64x64xf32>
    %46 = arith.mulf %41, %45 : vector<4x64x64xf32>
    %47 = arith.truncf %46 : vector<4x64x64xf32> to vector<4x64x64xbf16>
    %cst_18 = arith.constant dense<0.000000e+00> : vector<4x64x8xf32>
    %48 = tpu.matmul %47, %18, %cst_18 {dimension_numbers = #tpu.dot_dimension_numbers<[2], [1], [1], [2], [0, 0, 0, 1, 1, 2], [0], [0]>} : vector<4x64x64xbf16>, vector<4x64x8xbf16>, vector<4x64x8xf32> -> vector<4x64x8xf32>
    %49 = vector.shape_cast %48 : vector<4x64x8xf32> to vector<4x1x64x8xf32>
    %50 = tpu.transpose %49, [1, 2, 0, 3] : vector<4x1x64x8xf32> -> vector<1x64x4x8xf32>
    %51 = vector.shape_cast %50 : vector<1x64x4x8xf32> to vector<1x64x32xf32>
    %cst_19 = arith.constant 0.000000e+00 : f32
    %52 = vector.broadcast %cst_19 : f32 to vector<1x64x96xf32>
    %53 = tpu.concatenate %51, %52 in 2 : vector<1x64x32xf32>, vector<1x64x96xf32> -> vector<1x64x128xf32>
    %c0_20 = arith.constant 0 : index
    %c0_21 = arith.constant 0 : index
    %c0_22 = arith.constant 0 : index
    %54 = vector.load %arg6[%c0_20, %c0_21, %c0_22] : memref<1x64x128xf32, #tpu.memory_space<vmem>>, vector<1x64x128xf32>
    tpu.vector_store %arg6[%c0_20, %c0_21, %c0_22], %53 {strides = array<i32>} : memref<1x64x128xf32, #tpu.memory_space<vmem>>, vector<1x64x128xf32>,
    return
  }
  func.func @transform_0(%arg0: i32) -> (i32, i32, i32) {
    %c0_i32 = arith.constant 0 : i32
    %c0_i32_0 = arith.constant 0 : i32
    %c0_i32_1 = arith.constant 0 : i32
    return %arg0, %c0_i32, %c0_i32_0 : i32, i32, i32
  }
  func.func @transform_1(%arg0: i32) -> (i32, i32) {
    %c0_i32 = arith.constant 0 : i32
    %c0_i32_0 = arith.constant 0 : i32
    %c0_i32_1 = arith.constant 0 : i32
    return %c0_i32, %c0_i32_0 : i32, i32
  }
  func.func @transform_2(%arg0: i32) -> (i32, i32, i32) {
    %c0_i32 = arith.constant 0 : i32
    %c0_i32_0 = arith.constant 0 : i32
    %c0_i32_1 = arith.constant 0 : i32
    return %arg0, %c0_i32, %c0_i32_0 : i32, i32, i32
  }
  func.func @transform_3(%arg0: i32) -> (i32, i32, i32) {
    %c0_i32 = arith.constant 0 : i32
    %c0_i32_0 = arith.constant 0 : i32
    %c0_i32_1 = arith.constant 0 : i32
    %c0_i32_2 = arith.constant 0 : i32
    return %c0_i32, %c0_i32_0, %c0_i32_1 : i32, i32, i32
  }
  func.func @transform_4(%arg0: i32) -> (i32, i32, i32) {
    %c0_i32 = arith.constant 0 : i32
    %c0_i32_0 = arith.constant 0 : i32
    %c0_i32_1 = arith.constant 0 : i32
    %c0_i32_2 = arith.constant 0 : i32
    return %c0_i32, %c0_i32_0, %c0_i32_1 : i32, i32, i32
  }
  func.func @transform_5(%arg0: i32) -> (i32, i32, i32) {
    %c0_i32 = arith.constant 0 : i32
    %c0_i32_0 = arith.constant 0 : i32
    %c0_i32_1 = arith.constant 0 : i32
    return %arg0, %c0_i32, %c0_i32_0 : i32, i32, i32
  }
}

</mosaic_0001>

<bundles_post_ra>
// kernel: rpsa_forward.1
= control target key start
LH: loop header
LB: loop body
LE: loop exit
PB: predicated region body
PF: predicated region fallthrough
CT: control target
= control target key end

     0   :  { %s10137_s18 = smov 0   ;;  %s13877_s0 = inlined_call_operand.vmem [shape: bf16[2,64,32], index: 0, kind: input, shape index: {}]   ;;  %s13878_s1 = inlined_call_operand.vmem [shape: bf16[32,96], index: 1, kind: input, shape index: {}]   ;;  %s13879_s2 = inlined_call_operand.vmem [shape: f32[2,1,64], index: 2, kind: input, shape index: {}]   ;;  %s13880_s3 = inlined_call_operand.vmem [shape: bf16[8,64,8], index: 3, kind: input, shape index: {}]   ;;  %s13881_s4 = inlined_call_operand.vmem [shape: bf16[8,64,8], index: 4, kind: input, shape index: {}]   ;;  %s13882_s5 = inlined_call_operand.vmem [shape: f32[2,64,128], index: 5, kind: output, shape index: {}]  }
   0x1 LB: > { %s8949_s19 = sadd.s32 4294967295, %s10094_s18   ;;  %p8953_p0 = scmp.ge.s32.totalorder %s10094_s18, 1  ;;  %s10094_s18 = sphi %s10137_s18, %s15_s18  }
   0x2   : > { %p195_p1 = scmp.lt.s32.totalorder %s10094_s18, 3 }
   0x4   : > { %p196_p2 = pnand %p8953_p0, %p195_p1 }
   0x6   : > { %199 = sbr.rel (%p196_p2) target bundleno = 1595 (0x63b), region = 40 }
   0xb   : > { %v9890_v0 = vld [vmem:[%s13878_s1 + $0x8] sm:$0xff]   ;;  %p226_p3 = scmp.lt.s32.totalorder %s8949_s19, 1  ;;  %v9891_v1 = vld [vmem:[%s13878_s1] sm:$0xff]   ;;  %vm284_vm0 = vcmask 261120   ;;  %v9896_v6 = vld [vmem:[%s13880_s3 + $0x18] sm:$0xff]   ;;  %vm4144_vm1 = vcmask 64512   ;;  %v447_v34 = vlaneseq }
   0xc   : > { %9459 = vmatprep.subr.bf16.mxu0 %v9890_v0  ;;  %v9897_v7 = vld [vmem:[%s13880_s3 + $0x38] sm:$0xff]   ;;  %9791 = vmatprep.subr.msk.bf16.mxu1 %vm4144_vm1, %v9896_v6  ;;  %v4161_v8 = vsel %vm4144_vm1, %v9896_v6, 0  ;;  %v9898_v10 = vld [vmem:[%s13880_s3 + $0x10] sm:$0xff]   ;;  %v9900_v15 = vld [vmem:[%s13880_s3 + $0x8] sm:$0xff]   ;;  %s10096_s15 = smov 112   ;;  %s10097_s16 = smov 120  }
   0xd   : > { %s14295_s19 = smov (!%p226_p3, %s8949_s19), 1  ;;  %9460 = vmatpush3.bf16.msra.mxu0 %v9890_v0  ;;  %v4250_v9 = vsel %vm4144_vm1, %v9897_v7, 0  ;;  %9472 = vmatpush3.bf16.xpose.msra.mxu1 %v4161_v8  ;;  %v9899_v11 = vld [vmem:[%s13880_s3 + $0x30] sm:$0xff]   ;;  %v4158_v12 = vsel %vm4144_vm1, %v9898_v10, 0  ;;  %v9901_v16 = vld [vmem:[%s13880_s3 + $0x28] sm:$0xff]   ;;  %v4155_v18 = vsel %vm4144_vm1, %v9900_v15, 0 }
   0xe   : > { %9461 = vmatprep.subr.bf16.mxu0 %v9891_v1  ;;  %s9243_s24 = sshll.u32 %s14295_s19, 5  ;;  %9792 = vmatprep.subr.msk.bf16.mxu1 %vm4144_vm1, %v9898_v10  ;;  %v4247_v13 = vsel %vm4144_vm1, %v9899_v11, 0  ;;  %v4244_v19 = vsel %vm4144_vm1, %v9901_v16, 0  ;;  %v9902_v22 = vld [vmem:[%s13880_s3] sm:$0xff]   ;;  %s10098_s23 = smov 104   ;;  %v10252_v30 = vld [vmem:[%s13880_s3 + $0x58] sm:$0xff]  }
   0xf   : > { %s230_s27 = scalar_lea.vmem %s13877_s0, %s9243_s24  ;;  %v9903_v23 = vld [vmem:[%s13880_s3 + $0x20] sm:$0xff]   ;;  %v4152_v24 = vsel %vm4144_vm1, %v9902_v22, 0  ;;  %v10257_v31 = vld [vmem:[%s13880_s3 + $0x78] sm:$0xff]   ;;  %s10099_s28 = smov 96   ;;  %v10100_v32 = vmov 1983009808  }
  0x10   : > { %v9892_v2 = vld [vmem:[%s230_s27] sm:$0xff]   ;;  %v9893_v3 = vld [vmem:[%s230_s27 + $0x8] sm:$0xff]   ;;  %v9894_v4 = vld [vmem:[%s230_s27 + $0x10] sm:$0xff]   ;;  %v4241_v25 = vsel %vm4144_vm1, %v9903_v23, 0  ;;  %v445_v33 = vunpack.c.l.s4 %v10100_v32  ;;  %v448_v38 = vshrl.u32 %v447_v34, 7  ;;  %s10102_s6 = smov 64   ;;  %s233_s29 = scalar_lea.vmem %s13879_s2, %s14295_s19 }
  0x11   : > { %9462 = vmatpush3.bf16.msra.mxu0 %v9891_v1  ;;  %9463 = vmatprep.mubr.msk.bf16.mxu0 %vm284_vm0, %v9892_v2  ;;  %v9895_v5 = vld [vmem:[%s230_s27 + $0x18] sm:$0xff]   ;;  %v10101_v41 = vmov 1934713408   ;;  %vm6982_vm2 = vcmask 523264   ;;  %s10105_s30 = smov 8   ;;  %vm8851_vm3 = vcmask 130048  }
  0x12   : > { %9795 = vmatprep.subr.msk.bf16.mxu0 %vm4144_vm1, %v9897_v7  ;;  %v446_v37 = vunpack.c.0.s8 %v445_v33  ;;  %v477_v42 = vunpack.c.l.s4 %v10101_v41  ;;  %v10362_v33 = vsel %vm4144_vm1, %v10252_v30, 0  ;;  %s9244_s7 = sshll.u32 %s14295_s19, 6  ;;  %vm8860_vm4 = vcmask 195584  }
  0x13   : > { %s13816_s10 = scalar_lea.vmem %s13882_s5, %s9244_s7 }
  0x14   : > { %9464 = vmatmul.mubr.msk.bf16.vlgmr.msra.gmra.mxu0 %vm284_vm0, %v9893_v3  ;;  %v10299_v43 = vsub.s32 %v446_v37, %v448_v38  ;;  %v478_v46 = vunpack.c.0.s8 %v477_v42  ;;  %v10372_v42 = vld [vmem:[%s13880_s3 + $0x50] sm:$0xff]  }
  0x15   : > { %9467 = vmatprep.mubr.msk.bf16.mxu0 %vm284_vm0, %v9894_v4  ;;  %9484 = vmatpush3.bf16.xpose.msra.mxu0 %v4250_v9 }
  0x16   : > { %9796 = vmatprep.subr.msk.bf16.mxu0 %vm4144_vm1, %v9899_v11  ;;  %9474 = vmatpush3.bf16.xpose.msra.mxu1 %v4158_v12  ;;  %v10323_v58 = vsub.s32 %v478_v46, %v448_v38 }
  0x17   : > { %9793 = vmatprep.subr.msk.bf16.mxu1 %vm4144_vm1, %v9900_v15 }
  0x1c   : > { %9468 = vmatmul.mubr.msk.bf16.gmra.mxu0 %vm284_vm0, %v9895_v5 }
  0x1d   : > { %9486 = vmatpush3.bf16.xpose.msra.mxu0 %v4247_v13 }
  0x1e   : > { %9797 = vmatprep.subr.msk.bf16.mxu0 %vm4144_vm1, %v9901_v16  ;;  %9476 = vmatpush3.bf16.xpose.msra.mxu1 %v4155_v18 }
  0x1f   : > { %9794 = vmatprep.subr.msk.bf16.mxu1 %vm4144_vm1, %v9902_v22 }
  0x25   : > { %9488 = vmatpush3.bf16.xpose.msra.mxu0 %v4244_v19 }
  0x26   : > { %9798 = vmatprep.subr.msk.bf16.mxu0 %vm4144_vm1, %v9903_v23  ;;  %9478 = vmatpush3.bf16.xpose.msra.mxu1 %v4152_v24 }
  0x27   : > { %9799 = vmatprep.subr.msk.bf16.mxu1 %vm4144_vm1, %v10252_v30 }
  0x2d   : > { %9490 = vmatpush3.bf16.xpose.msra.mxu0 %v4241_v25 }
  0x2e   : > { %9803 = vmatprep.subr.msk.bf16.mxu0 %vm4144_vm1, %v10257_v31 }
  0xd4   : > { %v10181_v14 = vpop.f32.mrf.mxu0 }
  0xd5   : > { %13994 = vst [vmem:[#allocation2_spill] sm:$0xff] %v10181_v14 }
  0xd6   : > { %v10189_v17 = vpop.f32.mrf.mxu0 }
  0xd7   : > { %13995 = vst [vmem:[#allocation3_spill] sm:$0xff] %v10189_v17  ;;  %394 = vrot.lane.b32.xlu1 %v10189_v17, %s10096_s15  ;;  %370 = vrot.lane.b32.xlu0 %v10189_v17, %s10097_s16 }
  0xd8   : > { %v10197_v20 = vpop.f32.mrf.mxu0 }
  0xd9   : > { %13996 = vst [vmem:[#allocation4_spill] sm:$0xff] %v10197_v20 }
  0xda   : > { %v10201_v21 = vpop.f32.mrf.mxu0 }
  0xdb   : > { %13997 = vst [vmem:[#allocation5_spill] sm:$0xff] %v10201_v21  ;;  %396 = vrot.lane.b32.xlu1 %v10201_v21, %s10096_s15  ;;  %372 = vrot.lane.b32.xlu0 %v10201_v21, %s10097_s16 }
  0xdc   : > { %v10219_v26 = vpop.f32.mrf.mxu0 }
  0xde   : > { %v10227_v27 = vpop.f32.mrf.mxu0 }
  0xdf   : > { %420 = vrot.lane.b32.xlu1 %v10201_v21, %s10098_s23  ;;  %418 = vrot.lane.b32.xlu0 %v10189_v17, %s10098_s23 }
  0xe0   : > { %v10233_v28 = vpop.f32.mrf.mxu0 }
  0xe2   : > { %v10239_v29 = vpop.f32.mrf.mxu0 }
  0xe3   : > { %376 = vrot.lane.b32.xlu1 %v10197_v20, %s10097_s16  ;;  %374 = vrot.lane.b32.xlu0 %v10181_v14, %s10097_s16  ;;  %13998 = vst [vmem:[#allocation6_spill] sm:$0xff] %v10239_v29 }
  0xe7   : > { %400 = vrot.lane.b32.xlu1 %v10197_v20, %s10096_s15  ;;  %398 = vrot.lane.b32.xlu0 %v10181_v14, %s10096_s15 }
  0xeb   : > { %424 = vrot.lane.b32.xlu1 %v10197_v20, %s10098_s23  ;;  %422 = vrot.lane.b32.xlu0 %v10181_v14, %s10098_s23 }
  0xef   : > { %378 = vrot.lane.b32.xlu0 %v10227_v27, %s10097_s16  ;;  %380 = vrot.lane.b32.xlu1 %v10239_v29, %s10097_s16 }
  0xf3   : > { %402 = vrot.lane.b32.xlu0 %v10227_v27, %s10096_s15  ;;  %404 = vrot.lane.b32.xlu1 %v10239_v29, %s10096_s15 }
  0xf7   : > { %426 = vrot.lane.b32.xlu0 %v10227_v27, %s10098_s23  ;;  %428 = vrot.lane.b32.xlu1 %v10239_v29, %s10098_s23 }
  0xfb   : > { %382 = vrot.lane.b32.xlu0 %v10219_v26, %s10097_s16  ;;  %384 = vrot.lane.b32.xlu1 %v10233_v28, %s10097_s16 }
  0xff   : > { %406 = vrot.lane.b32.xlu0 %v10219_v26, %s10096_s15  ;;  %408 = vrot.lane.b32.xlu1 %v10233_v28, %s10096_s15 }
 0x103   : > { %430 = vrot.lane.b32.xlu0 %v10219_v26, %s10098_s23  ;;  %432 = vrot.lane.b32.xlu1 %v10233_v28, %s10098_s23 }
 0x107   : > { %1558 = vrot.lane.b32.xlu0 %v10219_v26, %s10099_s28  ;;  %1560 = vrot.lane.b32.xlu1 %v10233_v28, %s10099_s28 }
 0x10b   : > { %1554 = vrot.lane.b32.xlu0 %v10227_v27, %s10099_s28  ;;  %1552 = vrot.lane.b32.xlu1 %v10197_v20, %s10099_s28 }
 0x10f   : > { %1550 = vrot.lane.b32.xlu0 %v10181_v14, %s10099_s28  ;;  %1556 = vrot.lane.b32.xlu1 %v10239_v29, %s10099_s28 }
 0x149   : > { %v10291_v35 = vpop.permute.xlu1 %394  ;;  %v10293_v36 = vpop.permute.xlu0 %370 }
 0x14a   : > { %v442_v44 = vcombine.low %v10189_v17, %v10291_v35  ;;  %v443_v45 = vcombine.high %v10189_v17, %v10291_v35 }
 0x14c   : > { %v450_v56 = vrot.slane %v442_v44, %v10299_v43  ;;  %v457_v57 = vrot.slane %v443_v45, %v10299_v43  ;;  %v10377_v44 = vld [vmem:[%s13880_s3 + $0x70] sm:$0xff]  }
 0x14d   : > { %v10295_v39 = vpop.permute.xlu1 %396  ;;  %v10297_v40 = vpop.permute.xlu0 %372 }
 0x14e   : > { %13999 = vst [vmem:[#allocation7_spill] sm:$0xff] %v10297_v40  ;;  %v510_v52 = vcombine.low %v10201_v21, %v10295_v39  ;;  %v511_v61 = vcombine.high %v10201_v21, %v10295_v39 }
 0x150   : > { %v518_v3 = vrot.slane %v510_v52, %v10299_v43  ;;  %v525_v11 = vrot.slane %v511_v61, %v10299_v43 }
 0x151   : > { %v10305_v47 = vpop.permute.xlu1 %420  ;;  %v10307_v48 = vpop.permute.xlu0 %418 }
 0x152   : > { %14000 = vst [vmem:[#allocation8_spill] sm:$0xff] %v10305_v47  ;;  %14001 = vst [vmem:[#allocation9_spill] sm:$0xff] %v10307_v48  ;;  %v526_v49 = vcombine.low %v10297_v40, %v10305_v47  ;;  %v458_v50 = vcombine.low %v10293_v36, %v10307_v48  ;;  %v459_v51 = vcombine.high %v10293_v36, %v10307_v48 }
 0x153   : > { %v527_v53 = vcombine.high %v10297_v40, %v10305_v47 }
 0x154   : > { %v466_v54 = vrot.slane %v458_v50, %v10299_v43  ;;  %v473_v55 = vrot.slane %v459_v51, %v10299_v43  ;;  %v534_v62 = vrot.slane %v526_v49, %v10299_v43 }
 0x155   : > { %v10325_v59 = vpop.permute.xlu1 %376  ;;  %v10327_v60 = vpop.permute.xlu0 %374  ;;  %v541_v4 = vrot.slane %v527_v53, %v10299_v43 }
 0x156   : > { %14002 = vst [vmem:[#allocation10_spill] sm:$0xff] %v10325_v59  ;;  %14003 = vst [vmem:[#allocation11_spill] sm:$0xff] %v10327_v60  ;;  %1566 = vrot.lane.b32.xlu0 %v10327_v60, %s10099_s28  ;;  %v474_v63 = vcombine.low %v450_v56, %v466_v54  ;;  %v475_v0 = vcombine.high %v450_v56, %v466_v54  ;;  %v490_v1 = vcombine.low %v457_v57, %v473_v55 }
 0x157   : > { %v491_v2 = vcombine.high %v457_v57, %v473_v55  ;;  %1568 = vrot.lane.b32.xlu1 %v10325_v59, %s10099_s28  ;;  %v542_v12 = vcombine.low %v518_v3, %v534_v62  ;;  %v543_v13 = vcombine.high %v518_v3, %v534_v62  ;;  %v558_v15 = vcombine.low %v525_v11, %v541_v4 }
 0x158   : > { %v482_v5 = vrot.slane %v474_v63, %v10323_v58  ;;  %v489_v6 = vrot.slane %v475_v0, %v10323_v58  ;;  %v498_v7 = vrot.slane %v490_v1, %v10323_v58  ;;  %v559_v16 = vcombine.high %v525_v11, %v541_v4 }
 0x159   : > { %v505_v8 = vrot.slane %v491_v2, %v10323_v58  ;;  %v10342_v9 = vpop.permute.xlu1 %400  ;;  %v10344_v10 = vpop.permute.xlu0 %398  ;;  %v550_v32 = vrot.slane %v542_v12, %v10323_v58  ;;  %v557_v34 = vrot.slane %v543_v13, %v10323_v58  ;;  %v566_v37 = vrot.slane %v558_v15, %v10323_v58 }
 0x15a   : > { %14004 = vst [vmem:[#allocation12_spill] sm:$0xff] %v10342_v9  ;;  %14005 = vst [vmem:[#allocation13_spill] sm:$0xff] %v10344_v10  ;;  %1582 = vrot.lane.b32.xlu0 %v10344_v10, %s10099_s28  ;;  %v986_v22 = vcombine.low %v482_v5, %v489_v6  ;;  %v8968_v23 = vcombine.high %v482_v5, %v489_v6  ;;  %v573_v38 = vrot.slane %v559_v16, %v10323_v58 }
 0x15b   : > { %1584 = vrot.lane.b32.xlu1 %v10342_v9, %s10099_s28  ;;  %v1002_v24 = vcombine.low %v498_v7, %v505_v8  ;;  %v8969_v25 = vcombine.high %v498_v7, %v505_v8  ;;  %v646_v52 = vcombine.low %v10197_v20, %v10342_v9  ;;  %v10395_v55 = vsel %vm4144_vm1, %v10257_v31, 0 }
 0x15c   : > { %v993_v46 = vrot.slane %v986_v22, %v10299_v43  ;;  %v1001_v49 = vrot.slane %v8968_v23, %v10299_v43  ;;  %v647_v56 = vcombine.high %v10197_v20, %v10342_v9  ;;  %v578_v57 = vcombine.low %v10181_v14, %v10344_v10 }
 0x15d   : > { %v10351_v18 = vpop.permute.xlu1 %424  ;;  %v10353_v19 = vpop.permute.xlu0 %422  ;;  %v1009_v50 = vrot.slane %v1002_v24, %v10299_v43  ;;  %v1017_v51 = vrot.slane %v8969_v25, %v10299_v43  ;;  %v579_v61 = vcombine.high %v10181_v14, %v10344_v10  ;;  %v1054_v63 = vcombine.low %v550_v32, %v557_v34 }
 0x15e   : > { %14006 = vst [vmem:[#allocation14_spill] sm:$0xff] %v10351_v18  ;;  %14007 = vst [vmem:[#allocation15_spill] sm:$0xff] %v10353_v19  ;;  %1598 = vrot.lane.b32.xlu0 %v10353_v19, %s10099_s28  ;;  %v662_v41 = vcombine.low %v10325_v59, %v10351_v18  ;;  %v663_v53 = vcombine.high %v10325_v59, %v10351_v18  ;;  %v594_v54 = vcombine.low %v10327_v60, %v10353_v19 }
 0x15f   : > { %1600 = vrot.lane.b32.xlu1 %v10351_v18, %s10099_s28  ;;  %v595_v62 = vcombine.high %v10327_v60, %v10353_v19  ;;  %v10410_v31 = vsel %vm4144_vm1, %v10372_v42, 0  ;;  %v10414_v1 = vsel %vm4144_vm1, %v10377_v44, 0  ;;  %v8970_v2 = vcombine.high %v550_v32, %v557_v34 }
 0x160   : > { %v10406_v0 = vrot.slane %v662_v41, %v10299_v43  ;;  %v1070_v3 = vcombine.low %v566_v37, %v573_v38  ;;  %v1018_v6 = vcombine.low %v993_v46, %v1001_v49  ;;  %v1034_v7 = vcombine.low %v1009_v50, %v1017_v51 }
 0x161   : > { %v10379_v30 = vpop.permute.xlu0 %378  ;;  %v10381_v45 = vpop.permute.xlu1 %380  ;;  %v8971_v8 = vcombine.high %v566_v37, %v573_v38  ;;  %v654_v11 = vrot.slane %v646_v52, %v10299_v43  ;;  %v10422_v12 = vrot.slane %v663_v53, %v10299_v43  ;;  %v602_v13 = vrot.slane %v594_v54, %v10299_v43 }
 0x162   : > { %14008 = vst [vmem:[#allocation16_spill] sm:$0xff] %v10381_v45  ;;  %v10426_v15 = vrot.slane %v647_v56, %v10299_v43  ;;  %v586_v16 = vrot.slane %v578_v57, %v10299_v43  ;;  %v593_v22 = vrot.slane %v579_v61, %v10299_v43  ;;  %v609_v23 = vrot.slane %v595_v62, %v10299_v43 }
 0x163   : > { %v678_v24 = vcombine.low %v654_v11, %v10406_v0  ;;  %v679_v25 = vcombine.high %v654_v11, %v10406_v0  ;;  %v1019_v32 = vcombine.high %v993_v46, %v1001_v49  ;;  %v1035_v34 = vcombine.high %v1009_v50, %v1017_v51 }
 0x164   : > { %v1026_v37 = vrot.slane %v1018_v6, %v10323_v58  ;;  %v1042_v38 = vrot.slane %v1034_v7, %v10323_v58  ;;  %v1061_v41 = vrot.slane %v1054_v63, %v10299_v43  ;;  %v1069_v52 = vrot.slane %v8970_v2, %v10299_v43 }
 0x165   : > { %v10416_v4 = vpop.permute.xlu0 %402  ;;  %v10418_v5 = vpop.permute.xlu1 %404  ;;  %v694_v56 = vcombine.low %v10426_v15, %v10422_v12  ;;  %v695_v57 = vcombine.high %v10426_v15, %v10422_v12  ;;  %v610_v46 = vcombine.low %v586_v16, %v602_v13  ;;  %v611_v49 = vcombine.high %v586_v16, %v602_v13 }
 0x166   : > { %14009 = vst [vmem:[#allocation17_spill] sm:$0xff] %v10418_v5  ;;  %v10445_v50 = vcombine.low %v1026_v37, %v1042_v38  ;;  %v10447_v51 = vcombine.high %v1026_v37, %v1042_v38  ;;  %v1077_v61 = vrot.slane %v1070_v3, %v10299_v43  ;;  %v1085_v62 = vrot.slane %v8971_v8, %v10299_v43 }
 0x167   : > { %v1086_v63 = vcombine.low %v1061_v41, %v1069_v52  ;;  %v1087_v0 = vcombine.high %v1061_v41, %v1069_v52  ;;  %v1033_v2 = vrot.slane %v1019_v32, %v10323_v58  ;;  %v1049_v6 = vrot.slane %v1035_v34, %v10323_v58 }
 0x168   : > { %14012 = vst [vmem:[#allocation20_spill] sm:$0xff] %v10445_v50  ;;  %14013 = vst [vmem:[#allocation21_spill] sm:$0xff] %v10447_v51  ;;  %v9277_v7 = vpack.c.bf16 %v10447_v51, %v10445_v50  ;;  %v1102_v11 = vcombine.low %v1077_v61, %v1085_v62  ;;  %v1103_v12 = vcombine.high %v1077_v61, %v1085_v62 }
 0x169   : > { %v10437_v53 = vpop.permute.xlu0 %426  ;;  %v10439_v54 = vpop.permute.xlu1 %428  ;;  %v1094_v3 = vrot.slane %v1086_v63, %v10323_v58  ;;  %v1101_v8 = vrot.slane %v1087_v0, %v10323_v58  ;;  %v10463_v37 = vcombine.low %v1033_v2, %v1049_v6  ;;  %v10465_v32 = vcombine.high %v1033_v2, %v1049_v6 }
 0x16a   : > { %14010 = vst [vmem:[#allocation18_spill] sm:$0xff] %v10437_v53  ;;  %14011 = vst [vmem:[#allocation19_spill] sm:$0xff] %v10439_v54  ;;  %v730_v13 = vcombine.low %v10379_v30, %v10437_v53  ;;  %v626_v34 = vcombine.low %v593_v22, %v609_v23  ;;  %v627_v38 = vcombine.high %v593_v22, %v609_v23  ;;  %9479 = vmatprep.mubr.msk.bf16.mxu1 %vm4144_vm1, %v9277_v7 }
 0x16b   : > { %14014 = vst [vmem:[#allocation22_spill] sm:$0xff] %v10463_v37  ;;  %14015 = vst [vmem:[#allocation23_spill] sm:$0xff] %v10465_v32  ;;  %v1110_v41 = vrot.slane %v1102_v11, %v10323_v58  ;;  %v1117_v52 = vrot.slane %v1103_v12, %v10323_v58  ;;  %v618_v61 = vrot.slane %v610_v46, %v10323_v58  ;;  %v9908_v46 = vld [vmem:[%s13880_s3 + $0x48] sm:$0xff]  }
 0x16c   : > { %v625_v62 = vrot.slane %v611_v49, %v10323_v58  ;;  %v714_v63 = vcombine.low %v10227_v27, %v10416_v4  ;;  %v9278_v0 = vpack.c.bf16 %v10465_v32, %v10463_v37  ;;  %v686_v49 = vrot.slane %v678_v24, %v10323_v58 }
 0x16d   : > { %v10457_v15 = vpop.permute.xlu0 %382  ;;  %v10459_v16 = vpop.permute.xlu1 %384  ;;  %v10480_v22 = vcombine.low %v1094_v3, %v1110_v41  ;;  %v10482_v23 = vcombine.high %v1094_v3, %v1110_v41  ;;  %v10484_v2 = vcombine.low %v1101_v8, %v1117_v52  ;;  %v10486_v6 = vcombine.high %v1101_v8, %v1117_v52 }
 0x16e   : > { %1574 = vrot.lane.b32.xlu0 %v10457_v15, %s10099_s28  ;;  %1576 = vrot.lane.b32.xlu1 %v10459_v16, %s10099_s28  ;;  %v693_v7 = vrot.slane %v679_v25, %v10323_v58  ;;  %v702_v11 = vrot.slane %v694_v56, %v10323_v58  ;;  %v738_v12 = vrot.slane %v730_v13, %v10299_v43 }
 0x16f   : > { %14016 = vst [vmem:[#allocation24_spill] sm:$0xff] %v10480_v22  ;;  %14017 = vst [vmem:[#allocation25_spill] sm:$0xff] %v10482_v23  ;;  %9480 = vmatmul.mubr.msk.bf16.vlgmr.msra.gmra.mxu1 %vm4144_vm1, %v9278_v0  ;;  %v634_v3 = vrot.slane %v626_v34, %v10323_v58  ;;  %v641_v41 = vrot.slane %v627_v38, %v10323_v58  ;;  %v9279_v8 = vpack.c.bf16 %v10482_v23, %v10480_v22 }
 0x170   : > { %14018 = vst [vmem:[#allocation26_spill] sm:$0xff] %v10484_v2  ;;  %14019 = vst [vmem:[#allocation27_spill] sm:$0xff] %v10486_v6  ;;  %v9280_v52 = vpack.c.bf16 %v10486_v6, %v10484_v2  ;;  %9496 = vmatpush3.bf16.xpose.msra.mxu1 %v10362_v33  ;;  %v709_v24 = vrot.slane %v695_v57, %v10323_v58  ;;  %v1122_v25 = vcombine.low %v618_v61, %v625_v62 }
 0x171   : > { %v722_v56 = vrot.slane %v714_v63, %v10299_v43  ;;  %v731_v13 = vcombine.high %v10379_v30, %v10437_v53  ;;  %9800 = vmatprep.subr.msk.bf16.mxu1 %vm4144_vm1, %v10372_v42  ;;  %v10509_v34 = vpop.permute.xlu0 %406  ;;  %v715_v38 = vcombine.high %v10227_v27, %v10416_v4  ;;  %v782_v0 = vcombine.low %v10239_v29, %v10418_v5  ;;  %v10518_v57 = vpop.permute.xlu1 %408 }
 0x172   : > { %9491 = vmatprep.mubr.msk.bf16.mxu0 %vm4144_vm1, %v9279_v8  ;;  %v798_v33 = vcombine.low %v10381_v45, %v10439_v54  ;;  %v10521_v63 = vsel %vm4144_vm1, %v9908_v46, 0  ;;  %v8972_v18 = vcombine.high %v618_v61, %v625_v62  ;;  %v783_v42 = vcombine.high %v10239_v29, %v10418_v5  ;;  %1590 = vrot.lane.b32.xlu0 %v10509_v34, %s10099_s28 }
 0x173   : > { %9492 = vmatmul.mubr.msk.bf16.vlgmr.msra.gmra.mxu0 %vm4144_vm1, %v9280_v52  ;;  %v746_v9 = vcombine.low %v722_v56, %v738_v12  ;;  %v799_v19 = vcombine.high %v10381_v45, %v10439_v54  ;;  %v1190_v59 = vcombine.low %v686_v49, %v693_v7  ;;  %v8974_v8 = vcombine.high %v686_v49, %v693_v7 }
 0x174   : > { %v1138_v10 = vcombine.low %v634_v3, %v641_v41  ;;  %v8973_v60 = vcombine.high %v634_v3, %v641_v41  ;;  %9508 = vmatpush3.bf16.xpose.msra.mxu0 %v10395_v55  ;;  %v1206_v20 = vcombine.low %v702_v11, %v709_v24  ;;  %v745_v14 = vrot.slane %v731_v13, %v10299_v43 }
 0x175   : > { %v747_v6 = vcombine.high %v722_v56, %v738_v12  ;;  %9804 = vmatprep.subr.msk.bf16.mxu0 %vm4144_vm1, %v10377_v44  ;;  %v10533_v61 = vrot.slane %v1122_v25, %v10299_v43  ;;  %v8975_v62 = vcombine.high %v702_v11, %v709_v24  ;;  %v729_v52 = vrot.slane %v715_v38, %v10299_v43  ;;  %v10550_v11 = vpop.permute.xlu0 %430  ;;  %v9909_v24 = vld [vmem:[%s13880_s3 + $0x68] sm:$0xff]  }
 0x176   : > { %v790_v29 = vrot.slane %v782_v0, %v10299_v43  ;;  %v806_v49 = vrot.slane %v798_v33, %v10299_v43  ;;  %v797_v55 = vrot.slane %v783_v42, %v10299_v43  ;;  %v10542_v7 = vrot.slane %v746_v9, %v10323_v58  ;;  %1592 = vrot.lane.b32.xlu1 %v10518_v57, %s10099_s28 }
 0x177   : > { %v813_v44 = vrot.slane %v799_v19, %v10299_v43  ;;  %v10546_v12 = vrot.slane %v8972_v18, %v10299_v43  ;;  %v10554_v3 = vrot.slane %v1138_v10, %v10299_v43  ;;  %v10557_v41 = vrot.slane %v8973_v60, %v10299_v43  ;;  %v10565_v18 = vpop.permute.xlu1 %432  ;;  %1606 = vrot.lane.b32.xlu0 %v10550_v11, %s10099_s28 }
 0x178   : > { %9498 = vmatpush3.bf16.xpose.msra.mxu1 %v10410_v31  ;;  %v10560_v9 = vrot.slane %v1190_v59, %v10299_v43  ;;  %v10563_v19 = vrot.slane %v8974_v8, %v10299_v43  ;;  %v10571_v31 = vrot.slane %v747_v6, %v10323_v58  ;;  %v762_v10 = vcombine.low %v729_v52, %v745_v14 }
 0x179   : > { %v763_v25 = vcombine.high %v729_v52, %v745_v14  ;;  %v1154_v60 = vcombine.low %v10533_v61, %v10546_v12  ;;  %9801 = vmatprep.subr.msk.bf16.mxu1 %vm4144_vm1, %v9908_v46  ;;  %v814_v59 = vcombine.low %v790_v29, %v806_v49  ;;  %v1170_v56 = vcombine.low %v10554_v3, %v10557_v41 }
 0x17a   : > { %v10579_v13 = vrot.slane %v1206_v20, %v10299_v43  ;;  %v10582_v38 = vrot.slane %v8975_v62, %v10299_v43  ;;  %v815_v6 = vcombine.high %v790_v29, %v806_v49  ;;  %v830_v14 = vcombine.low %v797_v55, %v813_v44  ;;  %1608 = vrot.lane.b32.xlu1 %v10565_v18, %s10099_s28 }
 0x17b   : > { %v1162_v0 = vrot.slane %v1154_v60, %v10323_v58  ;;  %v1222_v46 = vcombine.low %v10560_v9, %v10563_v19  ;;  %v831_v33 = vcombine.high %v797_v55, %v813_v44  ;;  %v1178_v20 = vrot.slane %v1170_v56, %v10323_v58  ;;  %1570 = vrot.lane.b32.xlu0 %v10379_v30, %s10099_s28 }
 0x17c   : > { %9510 = vmatpush3.bf16.xpose.msra.mxu0 %v10414_v1  ;;  %v1238_v42 = vcombine.low %v10579_v13, %v10582_v38  ;;  %v4422_v8 = vsel %vm4144_vm1, %v9909_v24, 0  ;;  %v10597_v29 = vrot.slane %v762_v10, %v10323_v58  ;;  %v10600_v62 = vrot.slane %v763_v25, %v10323_v58  ;;  %v9910_v1 = vld [vmem:[%s13880_s3 + $0x40] sm:$0xff]  }
 0x17d   : > { %v850_v52 = vcombine.low %v10219_v26, %v10509_v34  ;;  %v1230_v49 = vrot.slane %v1222_v46, %v10323_v58  ;;  %9805 = vmatprep.subr.msk.bf16.mxu0 %vm4144_vm1, %v9909_v24  ;;  %v1258_v55 = vcombine.low %v10542_v7, %v10571_v31  ;;  %v10611_v44 = vcombine.low %v1162_v0, %v1178_v20 }
 0x17e   : > { %v10613_v10 = vcombine.high %v1162_v0, %v1178_v20  ;;  %v1246_v25 = vrot.slane %v1238_v42, %v10323_v58  ;;  %v8976_v60 = vcombine.high %v10542_v7, %v10571_v31  ;;  %v10621_v24 = vrot.slane %v814_v59, %v10323_v58  ;;  %1572 = vrot.lane.b32.xlu1 %v10381_v45, %s10099_s28 }
 0x17f   : > { %14020 = vst [vmem:[#allocation28_spill] sm:$0xff] %v10611_v44  ;;  %v10624_v56 = vrot.slane %v815_v6, %v10323_v58  ;;  %v10627_v46 = vrot.slane %v830_v14, %v10323_v58  ;;  %v10632_v0 = vrot.slane %v831_v33, %v10323_v58  ;;  %v1274_v31 = vcombine.low %v10597_v29, %v10600_v62  ;;  %v9911_v33 = vld [vmem:[%s13880_s3 + $0x60] sm:$0xff]  }
 0x180   : > { %14021 = vst [vmem:[#allocation29_spill] sm:$0xff] %v10613_v10  ;;  %v9281_v20 = vpack.c.bf16 %v10613_v10, %v10611_v44  ;;  %v10636_v42 = vcombine.low %v1230_v49, %v1246_v25  ;;  %v10638_v7 = vcombine.high %v1230_v49, %v1246_v25  ;;  %9500 = vmatpush3.bf16.xpose.msra.mxu1 %v10521_v63 }
 0x181   : > { %v8977_v59 = vcombine.high %v10597_v29, %v10600_v62  ;;  %v851_v6 = vcombine.high %v10219_v26, %v10509_v34  ;;  %v1155_v14 = vcombine.high %v10533_v61, %v10546_v12  ;;  %9802 = vmatprep.subr.msk.bf16.mxu1 %vm4144_vm1, %v9910_v1  ;;  %v918_v63 = vcombine.low %v10233_v28, %v10518_v57 }
 0x182   : > { %14022 = vst [vmem:[#allocation30_spill] sm:$0xff] %v10636_v42  ;;  %14023 = vst [vmem:[#allocation31_spill] sm:$0xff] %v10638_v7  ;;  %v1171_v49 = vcombine.high %v10554_v3, %v10557_v41  ;;  %9503 = vmatprep.mubr.msk.bf16.mxu1 %vm4144_vm1, %v9281_v20  ;;  %v9283_v29 = vpack.c.bf16 %v10638_v7, %v10636_v42  ;;  %v866_v61 = vcombine.low %v10457_v15, %v10550_v11 }
 0x183   : > { %v1326_v12 = vcombine.low %v10621_v24, %v10624_v56  ;;  %v8978_v62 = vcombine.high %v10621_v24, %v10624_v56  ;;  %v10667_v25 = vrot.slane %v850_v52, %v10299_v43  ;;  %v919_v3 = vcombine.high %v10233_v28, %v10518_v57  ;;  %1586 = vrot.lane.b32.xlu0 %v10416_v4, %s10099_s28 }
 0x184   : > { %v1223_v41 = vcombine.high %v10560_v9, %v10563_v19  ;;  %v1239_v20 = vcombine.high %v10579_v13, %v10582_v38  ;;  %9515 = vmatprep.mubr.msk.bf16.mxu0 %vm4144_vm1, %v9283_v29  ;;  %v867_v24 = vcombine.high %v10457_v15, %v10550_v11  ;;  %9512 = vmatpush3.bf16.xpose.msra.mxu0 %v4422_v8  ;;  %v4330_v9 = vsel %vm4144_vm1, %v9910_v1, 0  ;;  %v9912_v13 = vld [vmem:[%s13880_s3 + $0x98] sm:$0xff]  }
 0x185   : > { %v1342_v52 = vcombine.low %v10627_v46, %v10632_v0  ;;  %v8979_v56 = vcombine.high %v10627_v46, %v10632_v0  ;;  %9806 = vmatprep.subr.msk.bf16.mxu0 %vm4144_vm1, %v9911_v33  ;;  %1588 = vrot.lane.b32.xlu1 %v10418_v5, %s10099_s28  ;;  %v1169_v19 = vrot.slane %v1155_v14, %v10323_v58  ;;  %v4419_v5 = vsel %vm4144_vm1, %v9911_v33, 0 }
 0x186   : > { %v10693_v38 = vrot.slane %v851_v6, %v10299_v43  ;;  %v10696_v8 = vrot.slane %v918_v63, %v10299_v43  ;;  %v874_v46 = vrot.slane %v866_v61, %v10299_v43  ;;  %v1185_v0 = vrot.slane %v1171_v49, %v10323_v58 }
 0x187   : > { %v10701_v29 = vrot.slane %v919_v3, %v10299_v43  ;;  %v934_v1 = vcombine.low %v10459_v16, %v10565_v18  ;;  %1602 = vrot.lane.b32.xlu0 %v10437_v53, %s10099_s28  ;;  %v10708_v14 = vrot.slane %v1258_v55, %v10299_v43  ;;  %v10711_v6 = vrot.slane %v8976_v60, %v10299_v43  ;;  %v9913_v60 = vld [vmem:[%s13880_s3 + $0xb8] sm:$0xff]  }
 0x188   : > { %v881_v63 = vrot.slane %v867_v24, %v10299_v43  ;;  %v935_v49 = vcombine.high %v10459_v16, %v10565_v18  ;;  %9502 = vmatpush3.bf16.xpose.msra.mxu1 %v4330_v9  ;;  %v1237_v61 = vrot.slane %v1223_v41, %v10323_v58  ;;  %v1253_v3 = vrot.slane %v1239_v20, %v10323_v58 }
 0x189   : > { %1604 = vrot.lane.b32.xlu1 %v10439_v54, %s10099_s28  ;;  %v10721_v55 = vcombine.low %v1169_v19, %v1185_v0  ;;  %v10723_v45 = vcombine.high %v1169_v19, %v1185_v0  ;;  %9807 = vmatprep.subr.msk.bf16.mxu1 %vm4144_vm1, %v9912_v13  ;;  %v10730_v24 = vrot.slane %v1274_v31, %v10299_v43 }
 0x18a   : > { %v882_v41 = vcombine.low %v10667_v25, %v874_v46  ;;  %v883_v33 = vcombine.high %v10667_v25, %v874_v46  ;;  %v10735_v20 = vrot.slane %v8977_v59, %v10299_v43  ;;  %v1290_v9 = vcombine.low %v10708_v14, %v10711_v6 }
 0x18b   : > { %14024 = vst [vmem:[#allocation32_spill] sm:$0xff] %v10721_v55  ;;  %14025 = vst [vmem:[#allocation33_spill] sm:$0xff] %v10723_v45  ;;  %v942_v19 = vrot.slane %v934_v1, %v10299_v43  ;;  %1546 = vrot.lane.b32.xlu0 %v10189_v17, %s10099_s28  ;;  %v10743_v0 = vrot.slane %v1326_v12, %v10299_v43  ;;  %v10746_v31 = vrot.slane %v8978_v62, %v10299_v43 }
 0x18c   : > { %v10749_v54 = vrot.slane %v1342_v52, %v10299_v43  ;;  %9514 = vmatpush3.bf16.xpose.msra.mxu0 %v4419_v5  ;;  %v10751_v59 = vcombine.low %v1237_v61, %v1253_v3  ;;  %v1298_v25 = vrot.slane %v1290_v9, %v10323_v58  ;;  %v1306_v46 = vcombine.low %v10730_v24, %v10735_v20  ;;  %v9914_v52 = vld [vmem:[%s13880_s3 + $0x90] sm:$0xff]  }
 0x18d   : > { %v10757_v1 = vrot.slane %v8979_v56, %v10299_v43  ;;  %v9282_v12 = vpack.c.bf16 %v10723_v45, %v10721_v55  ;;  %v10761_v17 = vcombine.high %v1237_v61, %v1253_v3  ;;  %9811 = vmatprep.subr.msk.bf16.mxu0 %vm4144_vm1, %v9913_v60  ;;  %1548 = vrot.lane.b32.xlu1 %v10201_v21, %s10099_s28  ;;  %v4517_v5 = vsel %vm4144_vm1, %v9912_v13, 0 }
 0x18e   : > { %14026 = vst [vmem:[#allocation34_spill] sm:$0xff] %v10751_v59  ;;  %v1358_v62 = vcombine.low %v10743_v0, %v10746_v31  ;;  %v898_v56 = vcombine.low %v10693_v38, %v881_v63  ;;  %v949_v9 = vrot.slane %v935_v49, %v10299_v43  ;;  %v1314_v61 = vrot.slane %v1306_v46, %v10323_v58 }
 0x18f   : > { %14027 = vst [vmem:[#allocation35_spill] sm:$0xff] %v10761_v17  ;;  %v1374_v3 = vcombine.low %v10749_v54, %v10757_v1  ;;  %v890_v21 = vrot.slane %v882_v41, %v10323_v58  ;;  %v899_v13 = vcombine.high %v10693_v38, %v881_v63  ;;  %9504 = vmatmul.mubr.msk.bf16.vlgmr.msra.gmra.mxu1 %vm4144_vm1, %v9282_v12  ;;  %v4606_v12 = vsel %vm4144_vm1, %v9913_v60, 0 }
 0x190   : > { %v1366_v45 = vrot.slane %v1358_v62, %v10323_v58  ;;  %1562 = vrot.lane.b32.xlu0 %v10293_v36, %s10099_s28  ;;  %v897_v55 = vrot.slane %v883_v33, %v10323_v58  ;;  %9520 = vmatpush3.bf16.xpose.msra.mxu1 %v4517_v5  ;;  %v10784_v49 = vcombine.low %v1298_v25, %v1314_v61  ;;  %v9915_v33 = vld [vmem:[%s13880_s3 + $0xb0] sm:$0xff]  }
 0x191   : > { %v10786_v46 = vcombine.high %v1298_v25, %v1314_v61  ;;  %v1382_v53 = vrot.slane %v1374_v3, %v10323_v58  ;;  %v950_v41 = vcombine.low %v10696_v8, %v942_v19  ;;  %v951_v38 = vcombine.high %v10696_v8, %v942_v19  ;;  %1564 = vrot.lane.b32.xlu1 %v10297_v40, %s10099_s28 }
 0x192   : > { %14028 = vst [vmem:[#allocation36_spill] sm:$0xff] %v10784_v49  ;;  %v9284_v63 = vpack.c.bf16 %v10761_v17, %v10751_v59  ;;  %9808 = vmatprep.subr.msk.bf16.mxu1 %vm4144_vm1, %v9914_v52  ;;  %v966_v25 = vcombine.low %v10701_v29, %v949_v9  ;;  %v967_v5 = vcombine.high %v10701_v29, %v949_v9 }
 0x193   : > { %14029 = vst [vmem:[#allocation37_spill] sm:$0xff] %v10786_v46  ;;  %v9285_v8 = vpack.c.bf16 %v10786_v46, %v10784_v49  ;;  %v10804_v19 = vcombine.low %v1366_v45, %v1382_v53  ;;  %v906_v60 = vrot.slane %v898_v56, %v10323_v58  ;;  %v913_v62 = vrot.slane %v899_v13, %v10323_v58 }
 0x194   : > { %9516 = vmatmul.mubr.msk.bf16.vlgmr.msra.gmra.mxu0 %vm4144_vm1, %v9284_v63  ;;  %v10809_v61 = vcombine.high %v1366_v45, %v1382_v53  ;;  %1578 = vrot.lane.b32.xlu0 %v10291_v35, %s10099_s28  ;;  %v1394_v29 = vcombine.low %v890_v21, %v897_v55  ;;  %v4514_v56 = vsel %vm4144_vm1, %v9914_v52, 0  ;;  %v9916_v45 = vld [vmem:[%s13880_s3 + $0x88] sm:$0xff]   ;;  %v958_v53 = vrot.slane %v950_v41, %v10323_v58 }
 0x195   : > { %14030 = vst [vmem:[#allocation38_spill] sm:$0xff] %v10804_v19  ;;  %9527 = vmatprep.mubr.msk.bf16.mxu1 %vm4144_vm1, %v9285_v8  ;;  %9532 = vmatpush3.bf16.xpose.msra.mxu0 %v4606_v12  ;;  %v965_v3 = vrot.slane %v951_v38, %v10323_v58  ;;  %v974_v13 = vrot.slane %v966_v25, %v10323_v58  ;;  %v4603_v52 = vsel %vm4144_vm1, %v9915_v33, 0  ;;  %v9917_v41 = vld [vmem:[%s13880_s3 + $0xa8] sm:$0xff]  }
 0x196   : > { %14031 = vst [vmem:[#allocation39_spill] sm:$0xff] %v10809_v61  ;;  %v9287_v9 = vpack.c.bf16 %v10809_v61, %v10804_v19  ;;  %9812 = vmatprep.subr.msk.bf16.mxu0 %vm4144_vm1, %v9915_v33  ;;  %1580 = vrot.lane.b32.xlu1 %v10295_v39, %s10099_s28  ;;  %v981_v63 = vrot.slane %v967_v5, %v10323_v58 }
 0x197   : > { %v8980_v12 = vcombine.high %v890_v21, %v897_v55  ;;  %v1410_v8 = vcombine.low %v906_v60, %v913_v62  ;;  %v8981_v40 = vcombine.high %v906_v60, %v913_v62  ;;  %v1462_v21 = vcombine.low %v958_v53, %v965_v3 }
 0x198   : > { %9539 = vmatprep.mubr.msk.bf16.mxu0 %vm4144_vm1, %v9287_v9  ;;  %1594 = vrot.lane.b32.xlu0 %v10307_v48, %s10099_s28  ;;  %v8982_v55 = vcombine.high %v958_v53, %v965_v3  ;;  %v1478_v38 = vcombine.low %v974_v13, %v981_v63  ;;  %v8983_v25 = vcombine.high %v974_v13, %v981_v63  ;;  %v14050_v48 = vld [vmem:[#allocation4_spill] sm:$0xff] }
 0x199   : > { %9522 = vmatpush3.bf16.xpose.msra.mxu1 %v4514_v56  ;;  %v10840_v5 = vrot.slane %v1394_v29, %v10299_v43  ;;  %v1409_v33 = vrot.slane %v8980_v12, %v10299_v43  ;;  %v1417_v60 = vrot.slane %v1410_v8, %v10299_v43  ;;  %v1425_v62 = vrot.slane %v8981_v40, %v10299_v43  ;;  %v9918_v29 = vld [vmem:[%s13880_s3 + $0x80] sm:$0xff]  }
 0x19a   : > { %1596 = vrot.lane.b32.xlu1 %v10305_v47, %s10099_s28  ;;  %9809 = vmatprep.subr.msk.bf16.mxu1 %vm4144_vm1, %v9916_v45  ;;  %v1291_v9 = vcombine.high %v10708_v14, %v10711_v6  ;;  %v1307_v56 = vcombine.high %v10730_v24, %v10735_v20  ;;  %v10857_v40 = vrot.slane %v1462_v21, %v10299_v43  ;;  %v4600_v20 = vsel %vm4144_vm1, %v9917_v41, 0  ;;  %s10106_s28 = smov 24  }
 0x19b   : > { %v10860_v53 = vrot.slane %v8982_v55, %v10299_v43  ;;  %v10863_v14 = vrot.slane %v1478_v38, %v10299_v43  ;;  %v1493_v6 = vrot.slane %v8983_v25, %v10299_v43  ;;  %v1442_v24 = vcombine.low %v1417_v60, %v1425_v62 }
 0x19c   : > { %2760 = vrot.lane.b32.xlu0 %v10233_v28, %s10102_s6  ;;  %v4511_v28 = vsel %vm4144_vm1, %v9916_v45, 0  ;;  %v9919_v45 = vld [vmem:[%s13880_s3 + $0xa0] sm:$0xff]   ;;  %v1305_v3 = vrot.slane %v1291_v9, %v10323_v58  ;;  %v1321_v13 = vrot.slane %v1307_v56, %v10323_v58  ;;  %v1359_v8 = vcombine.high %v10743_v0, %v10746_v31 }
 0x19d   : > { %9534 = vmatpush3.bf16.xpose.msra.mxu0 %v4603_v52  ;;  %v1510_v63 = vcombine.low %v10863_v14, %v1493_v6  ;;  %v1450_v12 = vrot.slane %v1442_v24, %v10323_v58  ;;  %v1375_v52 = vcombine.high %v10749_v54, %v10757_v1  ;;  %v1427_v31 = vcombine.high %v10840_v5, %v1409_v33 }
 0x19e   : > { %9813 = vmatprep.subr.msk.bf16.mxu0 %vm4144_vm1, %v9917_v41  ;;  %2758 = vrot.lane.b32.xlu1 %v10219_v26, %s10102_s6  ;;  %v1426_v26 = vcombine.low %v10840_v5, %v1409_v33  ;;  %v4508_v41 = vsel %vm4144_vm1, %v9918_v29, 0  ;;  %v10896_v21 = vcombine.low %v1305_v3, %v1321_v13  ;;  %v10898_v55 = vcombine.high %v1305_v3, %v1321_v13  ;;  %v9922_v3 = vld [vmem:[%s13880_s3 + $0xd0] sm:$0xff]  }
 0x19f   : > { %v1518_v54 = vrot.slane %v1510_v63, %v10323_v58  ;;  %v1373_v38 = vrot.slane %v1359_v8, %v10323_v58  ;;  %v1389_v25 = vrot.slane %v1375_v52, %v10323_v58  ;;  %v9112_v9 = vpack.c.bf16 %v10784_v49, %v10445_v50  ;;  %v9923_v52 = vld [vmem:[%s13880_s3 + $0xf0] sm:$0xff]  }
 0x1a0   : > { %2790 = vrot.lane.b32.xlu0 %v10509_v34, %s10102_s6  ;;  %v1494_v34 = vcombine.low %v10857_v40, %v10860_v53  ;;  %14032 = vst [vmem:[#allocation40_spill] sm:$0xff] %v10896_v21  ;;  %14033 = vst [vmem:[#allocation41_spill] sm:$0xff] %v10898_v55  ;;  %v4597_v56 = vsel %vm4144_vm1, %v9919_v45, 0  ;;  %v1495_v5 = vcombine.high %v10857_v40, %v10860_v53 }
 0x1a1   : > { %9524 = vmatpush3.bf16.xpose.msra.mxu1 %v4511_v28  ;;  %v1511_v33 = vcombine.high %v10863_v14, %v1493_v6  ;;  %v1441_v40 = vrot.slane %v1427_v31, %v10323_v58  ;;  %v9114_v14 = vpack.c.bf16 %v10804_v19, %v10480_v22  ;;  %v9120_v6 = vpack.c.bf16 %v10896_v21, %v10463_v37 }
 0x1a2   : > { %2774 = vrot.lane.b32.xlu1 %v10457_v15, %s10102_s6  ;;  %9810 = vmatprep.subr.msk.bf16.mxu1 %vm4144_vm1, %v9918_v29  ;;  %v1434_v15 = vrot.slane %v1426_v26, %v10323_v58  ;;  %v1502_v0 = vrot.slane %v1494_v34, %v10323_v58  ;;  %v10941_v24 = vcombine.low %v1373_v38, %v1389_v25 }
 0x1a3   : > { %v1509_v13 = vrot.slane %v1495_v5, %v10323_v58  ;;  %v1525_v34 = vrot.slane %v1511_v33, %v10323_v58  ;;  %v9118_v63 = vpack.c.bf16 %v10809_v61, %v10482_v23  ;;  %v9924_v5 = vld [vmem:[%s13880_s3 + $0xc8] sm:$0xff]   ;;  %v14065_v23 = vld [vmem:[#allocation14_spill] sm:$0xff] }
 0x1a4   : > { %2806 = vrot.lane.b32.xlu0 %v10550_v11, %s10102_s6  ;;  %v9920_v11 = vld [vmem:[%s13880_s3 + $0xd8] sm:$0xff]   ;;  %v10905_v1 = vcombine.low %v1434_v15, %v1450_v12  ;;  %v10925_v28 = vcombine.high %v1434_v15, %v1450_v12  ;;  %v10933_v26 = vcombine.high %v1502_v0, %v1518_v54  ;;  %14038 = vst [vmem:[#allocation46_spill] sm:$0xff] %v10941_v24 }
 0x1a5   : > { %9536 = vmatpush3.bf16.xpose.msra.mxu0 %v4600_v20  ;;  %v10943_v20 = vcombine.high %v1373_v38, %v1389_v25  ;;  %v14043_v25 = vld [vmem:[#allocation6_spill] sm:$0xff]  ;;  %v10992_v33 = vcombine.low %v1509_v13, %v1525_v34 }
 0x1a6   : > { %9814 = vmatprep.subr.msk.bf16.mxu0 %vm4144_vm1, %v9919_v45  ;;  %2776 = vrot.lane.b32.xlu1 %v10459_v16, %s10102_s6  ;;  %v1443_v16 = vcombine.high %v1417_v60, %v1425_v62  ;;  %14034 = vst [vmem:[#allocation42_spill] sm:$0xff] %v10905_v1  ;;  %v9116_v60 = vpack.c.bf16 %v10786_v46, %v10447_v51  ;;  %14035 = vst [vmem:[#allocation43_spill] sm:$0xff] %v10925_v28  ;;  %v4695_v45 = vsel %vm4144_vm1, %v9920_v11, 0 }
 0x1a7   : > { %v9286_v62 = vpack.c.bf16 %v10898_v55, %v10896_v21  ;;  %v9113_v29 = vpack.c.bf16 %v10905_v1, %v10611_v44  ;;  %14037 = vst [vmem:[#allocation45_spill] sm:$0xff] %v10933_v26  ;;  %14039 = vst [vmem:[#allocation47_spill] sm:$0xff] %v10943_v20  ;;  %v9289_v15 = vpack.c.bf16 %v10925_v28, %v10905_v1 }
 0x1a8   : > { %2754 = vrot.lane.b32.xlu0 %v10227_v27, %s10102_s6  ;;  %v9921_v27 = vld [vmem:[%s13880_s3 + $0xf8] sm:$0xff]   ;;  %v1457_v53 = vrot.slane %v1443_v16, %v10323_v58  ;;  %v9117_v12 = vpack.c.bf16 %v10925_v28, %v10613_v10  ;;  %v9119_v8 = vpack.c.bf16 %v10933_v26, %v10638_v7  ;;  %v14042_v16 = vld [vmem:[#allocation27_spill] sm:$0xff]  ;;  %14044 = vst [vmem:[#allocation6_spill] sm:$0xff] %v10992_v33 }
 0x1a9   : > { %9526 = vmatpush3.bf16.xpose.msra.mxu1 %v4508_v41  ;;  %v4784_v31 = vsel %vm4144_vm1, %v9921_v27, 0  ;;  %v9126_v38 = vpack.c.bf16 %v10943_v20, %v14042_v16 }
 0x1aa   : > { %2792 = vrot.lane.b32.xlu1 %v10518_v57, %s10102_s6  ;;  %9815 = vmatprep.subr.msk.bf16.mxu1 %vm4144_vm1, %v9920_v11  ;;  %v10927_v57 = vcombine.low %v1502_v0, %v1518_v54  ;;  %v10972_v41 = vcombine.low %v1441_v40, %v1457_v53  ;;  %v4914_v11 = vrot.slane %v9113_v29, %v10299_v43 }
 0x1ab   : > { %v9288_v0 = vpack.c.bf16 %v10943_v20, %v10941_v24  ;;  %v9122_v54 = vpack.c.bf16 %v10941_v24, %v10484_v2  ;;  %v10997_v29 = vcombine.high %v1509_v13, %v1525_v34  ;;  %v11012_v13 = vrot.slane %v9119_v8, %v10299_v43  ;;  %v14048_v34 = vld [vmem:[#allocation33_spill] sm:$0xff]  ;;  %v14059_v2 = vld [vmem:[#allocation12_spill] sm:$0xff] }
 0x1ac   : > { %14036 = vst [vmem:[#allocation44_spill] sm:$0xff] %v10927_v57  ;;  %2770 = vrot.lane.b32.xlu0 %v10379_v30, %s10102_s6  ;;  %14040 = vst [vmem:[#allocation48_spill] sm:$0xff] %v10972_v41  ;;  %v4689_v8 = vsel %vm4144_vm1, %v9924_v5, 0  ;;  %v11088_v21 = vrot.slane %v9126_v38, %v10299_v43 }
 0x1ad   : > { %9538 = vmatpush3.bf16.xpose.msra.mxu0 %v4597_v56  ;;  %v4692_v56 = vsel %vm4144_vm1, %v9922_v3, 0  ;;  %14045 = vst [vmem:[#allocation50_spill] sm:$0xff] %v10997_v29 }
 0x1ae   : > { %9819 = vmatprep.subr.msk.bf16.mxu0 %vm4144_vm1, %v9921_v27  ;;  %2808 = vrot.lane.b32.xlu1 %v10565_v18, %s10102_s6  ;;  %v9115_v18 = vpack.c.bf16 %v10927_v57, %v10636_v42  ;;  %v4906_v27 = vrot.slane %v9112_v9, %v10299_v43 }
 0x1b0   : > { %9528 = vmatmul.mubr.msk.bf16.vlgmr.msra.gmra.mxu1 %vm4144_vm1, %v9286_v62  ;;  %2786 = vrot.lane.b32.xlu0 %v10416_v4, %s10102_s6  ;;  %v10981_v4 = vcombine.high %v1441_v40, %v1457_v53  ;;  %v9291_v62 = vpack.c.bf16 %v10933_v26, %v10927_v57  ;;  %v11000_v40 = vrot.slane %v9115_v18, %v10299_v43 }
 0x1b1   : > { %9544 = vmatpush3.bf16.xpose.msra.mxu1 %v4695_v45  ;;  %9551 = vmatprep.mubr.msk.bf16.mxu1 %vm4144_vm1, %v9289_v15  ;;  %v11003_v53 = vrot.slane %v9117_v12, %v10299_v43  ;;  %v14046_v45 = vld [vmem:[#allocation18_spill] sm:$0xff]  ;;  %v14047_v15 = vld [vmem:[#allocation32_spill] sm:$0xff]  ;;  %v11018_v18 = vrot.slane %v9114_v14, %v10299_v43  ;;  %v4916_v30 = vcombine.high %v4906_v27, %v4914_v11 }
 0x1b2   : > { %14041 = vst [vmem:[#allocation49_spill] sm:$0xff] %v10981_v4  ;;  %2756 = vrot.lane.b32.xlu1 %v14043_v25, %s10102_s6  ;;  %9816 = vmatprep.subr.msk.bf16.mxu1 %vm4144_vm1, %v9922_v3  ;;  %v4781_v3 = vsel %vm4144_vm1, %v9923_v52, 0  ;;  %v9121_v9 = vpack.c.bf16 %v10972_v41, %v14047_v15  ;;  %v4915_v25 = vcombine.low %v4906_v27, %v4914_v11  ;;  %v14058_v15 = vld [vmem:[#allocation15_spill] sm:$0xff] }
 0x1b3   : > { %v9125_v12 = vpack.c.bf16 %v10981_v4, %v14048_v34  ;;  %v9127_v14 = vpack.c.bf16 %v10997_v29, %v10761_v17  ;;  %v4930_v11 = vrot.slane %v4916_v30, %v10323_v58  ;;  %v14051_v17 = vld [vmem:[#allocation11_spill] sm:$0xff] }
 0x1b4   : > { %9540 = vmatmul.mubr.msk.bf16.vlgmr.msra.gmra.mxu0 %vm4144_vm1, %v9288_v0  ;;  %2802 = vrot.lane.b32.xlu0 %v14046_v45, %s10102_s6  ;;  %v11021_v0 = vrot.slane %v9116_v60, %v10299_v43  ;;  %v14049_v45 = vld [vmem:[#allocation2_spill] sm:$0xff]  ;;  %v11035_v60 = vrot.slane %v9120_v6, %v10299_v43  ;;  %v11044_v47 = vrot.slane %v4915_v25, %v10323_v58  ;;  %v9925_v30 = vld [vmem:[%s13880_s3 + $0xe8] sm:$0xff]  }
 0x1b5   : > { %9556 = vmatpush3.bf16.xpose.msra.mxu0 %v4784_v31  ;;  %9563 = vmatprep.mubr.msk.bf16.mxu0 %vm4144_vm1, %v9291_v62  ;;  %v9123_v31 = vpack.c.bf16 %v10992_v33, %v10751_v59  ;;  %v11030_v62 = vrot.slane %v9118_v63, %v10299_v43  ;;  %v4949_v63 = vcombine.low %v11018_v18, %v11000_v40 }
 0x1b6   : > { %9820 = vmatprep.subr.msk.bf16.mxu0 %vm4144_vm1, %v9923_v52  ;;  %2750 = vrot.lane.b32.xlu1 %v14049_v45, %s10102_s6  ;;  %v4950_v52 = vcombine.high %v11018_v18, %v11000_v40  ;;  %v4984_v45 = vcombine.high %v11021_v0, %v11003_v53  ;;  %v11054_v20 = vrot.slane %v9121_v9, %v10299_v43  ;;  %v5186_v18 = vshrl.u32 %v4930_v11, 16 }
 0x1b7   : > { %v5018_v6 = vcombine.high %v11030_v62, %v11012_v13  ;;  %v11068_v40 = vrot.slane %v9125_v12, %v10299_v43  ;;  %v5017_v34 = vcombine.low %v11030_v62, %v11012_v13  ;;  %v9926_v62 = vld [vmem:[%s13880_s3 + $0xc0] sm:$0xff]  }
 0x1b8   : > { %2752 = vrot.lane.b32.xlu0 %v14050_v48, %s10102_s6  ;;  %v4964_v48 = vrot.slane %v4950_v52, %v10323_v58  ;;  %v4998_v25 = vrot.slane %v4984_v45, %v10323_v58  ;;  %v11072_v52 = vrot.slane %v9127_v14, %v10299_v43  ;;  %v14053_v14 = vpack.c.bf16 %v10898_v55, %v10465_v32 }
 0x1b9   : > { %9546 = vmatpush3.bf16.xpose.msra.mxu1 %v4692_v56  ;;  %v11065_v56 = vrot.slane %v9123_v31, %v10299_v43  ;;  %v5032_v9 = vrot.slane %v5018_v6, %v10323_v58  ;;  %v11079_v31 = vrot.slane %v9122_v54, %v10299_v43  ;;  %v5052_v13 = vcombine.high %v11035_v60, %v11054_v20  ;;  %v14055_v54 = vld [vmem:[#allocation10_spill] sm:$0xff] }
 0x1ba   : > { %2766 = vrot.lane.b32.xlu1 %v14051_v17, %s10102_s6  ;;  %9817 = vmatprep.subr.msk.bf16.mxu1 %vm4144_vm1, %v9924_v5  ;;  %v5185_v45 = vpack.i.b16 %v4964_v48, %v4930_v11  ;;  %v5187_v17 = vshrl.u32 %v4964_v48, 16  ;;  %v5210_v27 = vshrl.u32 %v4998_v25, 16  ;;  %v14052_v5 = vld [vmem:[#allocation13_spill] sm:$0xff]  ;;  %v11085_v6 = vrot.slane %v14053_v14, %v10299_v43 }
 0x1bb   : > { %v5209_v12 = vpack.i.b16 %v5032_v9, %v4998_v25  ;;  %v5211_v24 = vshrl.u32 %v5032_v9, 16 }
 0x1bc   : > { %2782 = vrot.lane.b32.xlu0 %v14052_v5, %s10102_s6  ;;  %v11090_v59 = vpack.i.b16 %v5187_v17, %v5186_v18  ;;  %v5086_v18 = vcombine.high %v11079_v31, %v11065_v56  ;;  %v5066_v17 = vrot.slane %v5052_v13, %v10323_v58  ;;  %v5120_v14 = vcombine.high %v11085_v6, %v11068_v40 }
 0x1bd   : > { %9558 = vmatpush3.bf16.xpose.msra.mxu0 %v4781_v3  ;;  %v4778_v3 = vsel %vm4144_vm1, %v9925_v30, 0  ;;  %v11101_v5 = vcombine.low %v5185_v45, %v5209_v12  ;;  %v11103_v38 = vpack.i.b16 %v5211_v24, %v5210_v27 }
 0x1be   : > { %14054 = vst [vmem:[#allocation18_spill] sm:$0xff] %v11090_v59  ;;  %9821 = vmatprep.subr.msk.bf16.mxu0 %vm4144_vm1, %v9925_v30  ;;  %2768 = vrot.lane.b32.xlu1 %v14055_v54, %s10102_s6  ;;  %v5154_v54 = vcombine.high %v11088_v21, %v11072_v52  ;;  %v13915_v30 = vmov 0   ;;  %v5100_v27 = vrot.slane %v5086_v18, %v10323_v58  ;;  %v5234_v32 = vshrl.u32 %v5066_v17, 16 }
 0x1bf   : > { %14056 = vst [vmem:[#allocation2_spill] sm:$0xff] %v11101_v5  ;;  %14057 = vst [vmem:[#allocation4_spill] sm:$0xff] %v11103_v38  ;;  %v4932_v55 = vcombine.high %v4930_v11, %v13915_v30  ;;  %v4966_v45 = vcombine.high %v4964_v48, %v13915_v30  ;;  %v5000_v12 = vcombine.high %v4998_v25, %v13915_v30  ;;  %v11144_v5 = vpop.permute.xlu1 %1560 }
 0x1c0   : > { %2798 = vrot.lane.b32.xlu0 %v14058_v15, %s10102_s6  ;;  %v5134_v13 = vrot.slane %v5120_v14, %v10323_v58  ;;  %v5168_v16 = vrot.slane %v5154_v54, %v10323_v58  ;;  %v5034_v11 = vcombine.high %v5032_v9, %v13915_v30  ;;  %v9927_v15 = vld [vmem:[%s13880_s3 + $0xe0] sm:$0xff]   ;;  %v11130_v48 = vrot.slane %v4949_v63, %v10323_v58  ;;  %v11132_v14 = vpop.permute.xlu0 %1558 }
 0x1c1   : > { %9548 = vmatpush3.bf16.xpose.msra.mxu1 %v4689_v8  ;;  %v5233_v8 = vpack.i.b16 %v5100_v27, %v5066_v17  ;;  %v5235_v25 = vshrl.u32 %v5100_v27, 16  ;;  %v5191_v18 = vpack.i.b16 %v4966_v45, %v4932_v55  ;;  %v5192_v7 = vshrl.u32 %v4932_v55, 16  ;;  %v9928_v55 = vld [vmem:[%s13881_s4 + $0x18] sm:$0xff]  }
 0x1c2   : > { %2784 = vrot.lane.b32.xlu1 %v14059_v2, %s10102_s6  ;;  %9818 = vmatprep.subr.msk.bf16.mxu1 %vm4144_vm1, %v9926_v62  ;;  %v5257_v54 = vpack.i.b16 %v5168_v16, %v5134_v13  ;;  %v5258_v24 = vshrl.u32 %v5134_v13, 16  ;;  %v5259_v9 = vshrl.u32 %v5168_v16, 16  ;;  %v5215_v30 = vpack.i.b16 %v5034_v11, %v5000_v12  ;;  %v14060_v2 = vld [vmem:[#allocation3_spill] sm:$0xff] }
 0x1c3   : > { %v11136_v37 = vpack.i.b16 %v5235_v25, %v5234_v32  ;;  %v5193_v10 = vshrl.u32 %v4966_v45, 16  ;;  %v5216_v42 = vshrl.u32 %v5000_v12, 16  ;;  %v5217_v59 = vshrl.u32 %v5034_v11, 16 }
 0x1c4   : > { %2746 = vrot.lane.b32.xlu0 %v14060_v2, %s10102_s6  ;;  %v11138_v63 = vcombine.low %v5233_v8, %v5257_v54  ;;  %v11140_v44 = vpack.i.b16 %v5259_v9, %v5258_v24  ;;  %v11142_v38 = vcombine.low %v5191_v18, %v5215_v30  ;;  %v4686_v32 = vsel %vm4144_vm1, %v9926_v62, 0 }
 0x1c5   : > { %14061 = vst [vmem:[#allocation11_spill] sm:$0xff] %v11136_v37  ;;  %9560 = vmatpush3.bf16.xpose.msra.mxu0 %v4778_v3  ;;  %v14066_v3 = vcombine.low %v11021_v0, %v11003_v53  ;;  %v11160_v24 = vrot.slane %v5017_v34, %v10323_v58  ;;  %v11162_v45 = vpack.i.b16 %v5193_v10, %v5192_v7  ;;  %v14069_v62 = vmov 0   ;;  %v11175_v10 = vpop.permute.xlu0 %1554 }
 0x1c6   : > { %14062 = vst [vmem:[#allocation13_spill] sm:$0xff] %v11138_v63  ;;  %14063 = vst [vmem:[#allocation10_spill] sm:$0xff] %v11140_v44  ;;  %9822 = vmatprep.subr.msk.bf16.mxu0 %vm4144_vm1, %v9927_v15  ;;  %2800 = vrot.lane.b32.xlu1 %v14065_v23, %s10102_s6  ;;  %v11166_v12 = vpack.i.b16 %v5217_v59, %v5216_v42  ;;  %v5068_v11 = vcombine.high %v5066_v17, %v14069_v62  ;;  %v4775_v8 = vsel %vm4144_vm1, %v9927_v15, 0  ;;  %v14073_v23 = vld [vmem:[#allocation7_spill] sm:$0xff] }
 0x1c7   : > { %14064 = vst [vmem:[#allocation15_spill] sm:$0xff] %v11142_v38  ;;  %v11157_v30 = vrot.slane %v14066_v3, %v10323_v58  ;;  %14067 = vst [vmem:[#allocation12_spill] sm:$0xff] %v11162_v45  ;;  %v5102_v53 = vcombine.high %v5100_v27, %v14069_v62  ;;  %v5136_v0 = vcombine.high %v5134_v13, %v14069_v62  ;;  %v5174_v7 = vshrl.u32 %v11044_v47, 16 }
 0x1c8   : > { %14068 = vst [vmem:[#allocation3_spill] sm:$0xff] %v11166_v12  ;;  %2762 = vrot.lane.b32.xlu0 %v10293_v36, %s10102_s6  ;;  %v5170_v34 = vcombine.high %v5168_v16, %v14069_v62  ;;  %v5173_v42 = vpack.i.b16 %v11130_v48, %v11044_v47  ;;  %v5240_v17 = vshrl.u32 %v5068_v11, 16  ;;  %v14070_v36 = vld [vmem:[#allocation5_spill] sm:$0xff]  ;;  %v5175_v13 = vshrl.u32 %v11130_v48, 16 }
 0x1c9   : > { %9550 = vmatpush3.bf16.xpose.msra.mxu1 %v4686_v32  ;;  %v9929_v16 = vld [vmem:[%s13881_s4 + $0x38] sm:$0xff]   ;;  %v5197_v27 = vpack.i.b16 %v11160_v24, %v11157_v30  ;;  %v5239_v15 = vpack.i.b16 %v5102_v53, %v5068_v11  ;;  %v5198_v18 = vshrl.u32 %v11157_v30, 16  ;;  %v5199_v54 = vshrl.u32 %v11160_v24, 16  ;;  %v11193_v32 = vpop.permute.xlu1 %1552 }
 0x1ca   : > { %2748 = vrot.lane.b32.xlu1 %v14070_v36, %s10102_s6  ;;  %9823 = vmatprep.subr.msk.bf16.mxu1 %vm4144_vm1, %v9928_v55  ;;  %v5263_v25 = vpack.i.b16 %v5170_v34, %v5136_v0  ;;  %v5241_v9 = vshrl.u32 %v5102_v53, 16  ;;  %v5264_v2 = vshrl.u32 %v5136_v0, 16  ;;  %v5265_v36 = vshrl.u32 %v5170_v34, 16 }
 0x1cb   : > { %v9290_v11 = vpack.c.bf16 %v10981_v4, %v10972_v41  ;;  %v5309_v53 = vsel %vm4144_vm1, %v9928_v55, 0  ;;  %v9128_v0 = vcombine.low %v5173_v42, %v5197_v27  ;;  %v5176_v34 = vpack.i.b16 %v5175_v13, %v5174_v7 }
 0x1cc   : > { %2778 = vrot.lane.b32.xlu0 %v10291_v35, %s10102_s6  ;;  %v11197_v3 = vcombine.low %v5239_v15, %v5263_v25  ;;  %v11199_v59 = vpack.i.b16 %v5241_v9, %v5240_v17  ;;  %v9930_v35 = vld [vmem:[%s13881_s4 + $0x10] sm:$0xff]   ;;  %v11210_v15 = vpack.i.b16 %v5265_v36, %v5264_v2  ;;  %v5200_v17 = vpack.i.b16 %v5199_v54, %v5198_v18 }
 0x1cd   : > { %9562 = vmatpush3.bf16.xpose.msra.mxu0 %v4775_v8  ;;  %v11212_v8 = vpop.permute.xlu0 %1550  ;;  %v9292_v27 = vpack.c.bf16 %v10997_v29, %v10992_v33  ;;  %v5402_v13 = vsel %vm4144_vm1, %v9929_v16, 0  ;;  %v9931_v18 = vld [vmem:[%s13881_s4 + $0x30] sm:$0xff]   ;;  %v4999_v7 = vcombine.high %v11157_v30, %v14069_v62 }
 0x1ce   : > { %14071 = vst [vmem:[#allocation14_spill] sm:$0xff] %v11197_v3  ;;  %14072 = vst [vmem:[#allocation5_spill] sm:$0xff] %v11199_v59  ;;  %9827 = vmatprep.subr.msk.bf16.mxu0 %vm4144_vm1, %v9929_v16  ;;  %2764 = vrot.lane.b32.xlu1 %v14073_v23, %s10102_s6  ;;  %v11218_v23 = vpop.permute.xlu1 %1556  ;;  %v9136_v54 = vcombine.low %v5176_v34, %v5200_v17  ;;  %v5306_v16 = vsel %vm4144_vm1, %v9930_v35, 0  ;;  %v5399_v34 = vsel %vm4144_vm1, %v9931_v18, 0  ;;  %v14076_v17 = vld [vmem:[#allocation17_spill] sm:$0xff] }
 0x1cf   : > { %14074 = vst [vmem:[#allocation7_spill] sm:$0xff] %v11210_v15  ;;  %v5204_v46 = vshrl.u32 %v4999_v7, 16 }
 0x1d0   : > { %9552 = vmatmul.mubr.msk.bf16.vlgmr.msra.gmra.mxu1 %vm4144_vm1, %v9290_v11  ;;  %v9932_v11 = vld [vmem:[%s13881_s4 + $0x8] sm:$0xff]  }
 0x1d1   : > { %9568 = vmatpush3.bf16.xpose.msra.mxu1 %v5309_v53  ;;  %9575 = vmatprep.mubr.msk.bf16.mxu1 %vm4144_vm1, %v9128_v0  ;;  %v11237_v2 = vpop.permute.xlu0 %1566 }
 0x1d2   : > { %2780 = vrot.lane.b32.xlu1 %v10295_v39, %s10102_s6  ;;  %9824 = vmatprep.subr.msk.bf16.mxu1 %vm4144_vm1, %v9930_v35  ;;  %v11240_v36 = vpop.permute.xlu1 %1568  ;;  %v14075_v39 = vld [vmem:[#allocation16_spill] sm:$0xff]  ;;  %v5051_v35 = vcombine.low %v11035_v60, %v11054_v20 }
 0x1d4   : > { %9564 = vmatmul.mubr.msk.bf16.vlgmr.msra.gmra.mxu0 %vm4144_vm1, %v9292_v27  ;;  %v9933_v27 = vld [vmem:[%s13881_s4 + $0x28] sm:$0xff]   ;;  %v11277_v60 = vrot.slane %v5051_v35, %v10323_v58  ;;  %v4931_v35 = vcombine.high %v11044_v47, %v14069_v62 }
 0x1d5   : > { %9580 = vmatpush3.bf16.xpose.msra.mxu0 %v5402_v13  ;;  %9587 = vmatprep.mubr.msk.bf16.mxu0 %vm4144_vm1, %v9136_v54  ;;  %v11250_v53 = vpop.permute.xlu0 %1582  ;;  %v5085_v13 = vcombine.low %v11079_v31, %v11065_v56  ;;  %v5303_v54 = vsel %vm4144_vm1, %v9932_v11, 0  ;;  %v9935_v31 = vld [vmem:[%s13881_s4 + $0x20] sm:$0xff]  }
 0x1d6   : > { %9828 = vmatprep.subr.msk.bf16.mxu0 %vm4144_vm1, %v9931_v18  ;;  %2772 = vrot.lane.b32.xlu1 %v14075_v39, %s10102_s6  ;;  %v11252_v0 = vpop.permute.xlu1 %1584  ;;  %v14077_v18 = vld [vmem:[#allocation19_spill] sm:$0xff]  ;;  %v9934_v39 = vld [vmem:[%s13881_s4] sm:$0xff]   ;;  %v5222_v47 = vshrl.u32 %v11277_v60, 16  ;;  %v5393_v9 = vsel %vm4144_vm1, %v9935_v31, 0  ;;  %v5180_v4 = vshrl.u32 %v4931_v35, 16  ;;  %v1778_v49 = vcombine.low %v11212_v8, %v11250_v53 }
 0x1d7   : > { %v11280_v56 = vrot.slane %v5085_v13, %v10323_v58  ;;  %v4965_v13 = vcombine.high %v11130_v48, %v14069_v62  ;;  %v5300_v42 = vsel %vm4144_vm1, %v9934_v39, 0 }
 0x1d9   : > { %9570 = vmatpush3.bf16.xpose.msra.mxu1 %v5306_v16  ;;  %v1599_v16 = vpop.permute.xlu0 %1598  ;;  %v5223_v48 = vshrl.u32 %v11280_v56, 16  ;;  %v5181_v33 = vshrl.u32 %v4965_v13, 16  ;;  %v5221_v30 = vpack.i.b16 %v11280_v56, %v11277_v60  ;;  %v5179_v41 = vpack.i.b16 %v4965_v13, %v4931_v35 }
 0x1da   : > { %2788 = vrot.lane.b32.xlu1 %v14076_v17, %s10102_s6  ;;  %9825 = vmatprep.subr.msk.bf16.mxu1 %vm4144_vm1, %v9932_v11  ;;  %v5119_v17 = vcombine.low %v11085_v6, %v11068_v40  ;;  %v11274_v20 = vpop.permute.xlu1 %1600  ;;  %v5153_v11 = vcombine.low %v11088_v21, %v11072_v52  ;;  %v9936_v40 = vld [vmem:[%s13881_s4 + $0x58] sm:$0xff]   ;;  %v11305_v52 = vld [vmem:[%s13881_s4 + $0x50] sm:$0xff]   ;;  %v1795_v26 = vcombine.high %v11237_v2, %v1599_v16 }
 0x1db   : > { %v9937_v6 = vld [vmem:[%s13881_s4 + $0x78] sm:$0xff]   ;;  %v5495_v55 = vsel %vm4144_vm1, %v9936_v40, 0  ;;  %v1862_v19 = vcombine.low %v11240_v36, %v11274_v20  ;;  %v11351_v35 = vpack.i.b16 %v5181_v33, %v5180_v4  ;;  %v1846_v13 = vcombine.low %v11193_v32, %v11252_v0 }
 0x1dc   : > { %v5127_v21 = vrot.slane %v5119_v17, %v10323_v58  ;;  %v5033_v17 = vcombine.high %v11160_v24, %v14069_v62  ;;  %v5161_v25 = vrot.slane %v5153_v11, %v10323_v58  ;;  %v11326_v29 = vsel %vm4144_vm1, %v9937_v6, 0 }
 0x1dd   : > { %9582 = vmatpush3.bf16.xpose.msra.mxu0 %v5399_v34  ;;  %v5396_v34 = vsel %vm4144_vm1, %v9933_v27, 0 }
 0x1de   : > { %9829 = vmatprep.subr.msk.bf16.mxu0 %vm4144_vm1, %v9933_v27  ;;  %2804 = vrot.lane.b32.xlu1 %v14077_v18, %s10102_s6  ;;  %v11310_v27 = vld [vmem:[%s13881_s4 + $0x70] sm:$0xff]   ;;  %v5246_v24 = vshrl.u32 %v5127_v21, 16  ;;  %v5203_v28 = vpack.i.b16 %v5033_v17, %v4999_v7  ;;  %v5245_v57 = vpack.i.b16 %v5161_v25, %v5127_v21  ;;  %v5205_v61 = vshrl.u32 %v5033_v17, 16 }
 0x1df   : > { %v11336_v11 = vsel %vm4144_vm1, %v11310_v27, 0  ;;  %v1863_v7 = vcombine.high %v11240_v36, %v11274_v20  ;;  %v1809_v36 = vrot.slane %v1795_v26, %v10299_v43  ;;  %v11387_v26 = vld [vmem:[%s13881_s4 + $0x48] sm:$0xff]  }
 0x1e0   : > { %v11299_v18 = vpop.permute.xlu0 %1574  ;;  %v9144_v33 = vcombine.low %v5179_v41, %v5203_v28  ;;  %v9129_v28 = vcombine.low %v5221_v30, %v5245_v57  ;;  %v11403_v30 = vld [vmem:[%s13881_s4 + $0x68] sm:$0xff]  }
 0x1e1   : > { %9572 = vmatpush3.bf16.xpose.msra.mxu1 %v5303_v54  ;;  %v11312_v54 = vpop.permute.xlu1 %1576 }
 0x1e2   : > { %9826 = vmatprep.subr.msk.bf16.mxu1 %vm4144_vm1, %v9934_v39  ;;  %v11332_v39 = vsel %vm4144_vm1, %v11305_v52, 0 }
 0x1e4   : > { %v11342_v1 = vpop.permute.xlu0 %1590 }
 0x1e5   : > { %9584 = vmatpush3.bf16.xpose.msra.mxu0 %v5396_v34  ;;  %v11339_v34 = vpack.i.b16 %v5223_v48, %v5222_v47  ;;  %v5247_v47 = vshrl.u32 %v5161_v25, 16  ;;  %v1870_v48 = vrot.slane %v1862_v19, %v10299_v43  ;;  %v1854_v19 = vrot.slane %v1846_v13, %v10299_v43  ;;  %v11418_v13 = vld [vmem:[%s13881_s4 + $0x40] sm:$0xff]  }
 0x1e6   : > { %9830 = vmatprep.subr.msk.bf16.mxu0 %vm4144_vm1, %v9935_v31  ;;  %v1794_v31 = vcombine.low %v11237_v2, %v1599_v16  ;;  %v11359_v2 = vcombine.high %v11277_v60, %v14069_v62  ;;  %v11363_v16 = vcombine.high %v11280_v56, %v14069_v62  ;;  %v11377_v60 = vcombine.high %v5161_v25, %v14069_v62 }
 0x1e7   : > { %v1786_v56 = vrot.slane %v1778_v49, %v10299_v43  ;;  %v5248_v41 = vpack.i.b16 %v5247_v47, %v5246_v24  ;;  %v1879_v47 = vcombine.high %v1854_v19, %v1870_v48 }
 0x1e8   : > { %v11348_v15 = vpop.permute.xlu1 %1592  ;;  %v1802_v4 = vrot.slane %v1794_v31, %v10299_v43  ;;  %v5229_v49 = vshrl.u32 %v11363_v16, 16  ;;  %v5253_v24 = vshrl.u32 %v11377_v60, 16  ;;  %v1878_v31 = vcombine.low %v1854_v19, %v1870_v48 }
 0x1e9   : > { %9574 = vmatpush3.bf16.xpose.msra.mxu1 %v5300_v42  ;;  %v1779_v42 = vcombine.high %v11212_v8, %v11250_v53  ;;  %v1847_v8 = vcombine.high %v11193_v32, %v11252_v0  ;;  %v5206_v53 = vpack.i.b16 %v5205_v61, %v5204_v46  ;;  %v11374_v20 = vpop.permute.xlu0 %1606  ;;  %v1877_v61 = vrot.slane %v1863_v7, %v10299_v43 }
 0x1ea   : > { %9831 = vmatprep.subr.msk.bf16.mxu1 %vm4144_vm1, %v9936_v40  ;;  %v11369_v40 = vcombine.high %v5127_v21, %v14069_v62  ;;  %v5228_v62 = vshrl.u32 %v11359_v2, 16  ;;  %v1810_v57 = vcombine.low %v1786_v56, %v1802_v4  ;;  %v1811_v32 = vcombine.high %v1786_v56, %v1802_v4  ;;  %v11423_v4 = vld [vmem:[%s13881_s4 + $0x60] sm:$0xff]   ;;  %v11436_v56 = vld [vmem:[%s13881_s4 + $0xb8] sm:$0xff]  }
 0x1eb   : > { %v1793_v46 = vrot.slane %v1779_v42, %v10299_v43  ;;  %v9137_v42 = vcombine.low %v11339_v34, %v5248_v41  ;;  %v11477_v19 = vsel %vm4144_vm1, %v11423_v4, 0 }
 0x1ec   : > { %v11382_v21 = vpop.permute.xlu1 %1608  ;;  %v5252_v25 = vshrl.u32 %v11369_v40, 16  ;;  %v1818_v48 = vrot.slane %v1810_v57, %v10323_v58  ;;  %v11482_v57 = vld [vmem:[%s13881_s4 + $0x88] sm:$0xff]  }
 0x1ed   : > { %9586 = vmatpush3.bf16.xpose.msra.mxu0 %v5393_v9  ;;  %v1861_v9 = vrot.slane %v1847_v8, %v10299_v43  ;;  %v1826_v0 = vcombine.low %v1793_v46, %v1809_v36  ;;  %v11398_v17 = vpop.permute.xlu0 %1570  ;;  %v9152_v8 = vcombine.low %v11351_v35, %v5206_v53  ;;  %v5251_v35 = vpack.i.b16 %v11377_v60, %v11369_v40  ;;  %v11463_v60 = vld [vmem:[%s13881_s4 + $0xb0] sm:$0xff]  }
 0x1ee   : > { %9835 = vmatprep.subr.msk.bf16.mxu0 %vm4144_vm1, %v9937_v6  ;;  %v1827_v6 = vcombine.high %v1793_v46, %v1809_v36  ;;  %v11431_v36 = vld [vmem:[%s13881_s4 + $0x98] sm:$0xff]   ;;  %v11456_v46 = vsel %vm4144_vm1, %v11403_v30, 0  ;;  %v11458_v40 = vpack.i.b16 %v5253_v24, %v5252_v25  ;;  %v11535_v45 = vsel %vm4144_vm1, %v11482_v57, 0 }
 0x1ef   : > { %v1894_v34 = vcombine.low %v1861_v9, %v1877_v61  ;;  %v1834_v53 = vrot.slane %v1826_v0, %v10323_v58  ;;  %v11497_v0 = vsel %vm4144_vm1, %v11436_v56, 0 }
 0x1f0   : > { %9576 = vmatmul.mubr.msk.bf16.vlgmr.msra.gmra.mxu1 %vm4144_vm1, %v9129_v28  ;;  %v11407_v7 = vpop.permute.xlu1 %1572  ;;  %v1825_v28 = vrot.slane %v1811_v32, %v10323_v58  ;;  %v1841_v41 = vrot.slane %v1827_v6, %v10323_v58  ;;  %v11487_v32 = vld [vmem:[%s13881_s4 + $0xa8] sm:$0xff]   ;;  %v11502_v6 = vld [vmem:[%s13881_s4 + $0x80] sm:$0xff]  }
 0x1f1   : > { %9592 = vmatpush3.bf16.xpose.msra.mxu1 %v5495_v55  ;;  %9599 = vmatprep.mubr.msk.bf16.mxu1 %vm4144_vm1, %v9144_v33  ;;  %v11413_v55 = vsel %vm4144_vm1, %v11387_v26, 0  ;;  %v1895_v33 = vcombine.high %v1861_v9, %v1877_v61  ;;  %v1886_v61 = vrot.slane %v1878_v31, %v10323_v58  ;;  %v11493_v9 = vsel %vm4144_vm1, %v11431_v36, 0 }
 0x1f2   : > { %9832 = vmatprep.subr.msk.bf16.mxu1 %vm4144_vm1, %v11305_v52  ;;  %v5227_v52 = vpack.i.b16 %v11363_v16, %v11359_v2  ;;  %v11443_v2 = vpack.i.b16 %v5229_v49, %v5228_v62  ;;  %v11448_v16 = vld [vmem:[%s13881_s4 + $0x90] sm:$0xff]   ;;  %v1893_v62 = vrot.slane %v1879_v47, %v10323_v58  ;;  %v11473_v49 = vsel %vm4144_vm1, %v11418_v13, 0 }
 0x1f3   : > { %v1909_v25 = vrot.slane %v1895_v33, %v10323_v58  ;;  %v2322_v24 = vcombine.low %v1818_v48, %v1825_v28  ;;  %v8988_v31 = vcombine.high %v1818_v48, %v1825_v28  ;;  %v11515_v33 = vld [vmem:[%s13881_s4 + $0xa0] sm:$0xff]   ;;  %v2338_v59 = vcombine.low %v1834_v53, %v1841_v41 }
 0x1f4   : > { %9588 = vmatmul.mubr.msk.bf16.vlgmr.msra.gmra.mxu0 %vm4144_vm1, %v9137_v42  ;;  %v11506_v42 = vcombine.low %v5227_v52, %v5251_v35  ;;  %14078 = vst [vmem:[#allocation16_spill] sm:$0xff] %v11515_v33  ;;  %v8989_v48 = vcombine.high %v1834_v53, %v1841_v41  ;;  %v11527_v28 = vsel %vm4144_vm1, %v11463_v60, 0  ;;  %v2390_v35 = vcombine.low %v1886_v61, %v1893_v62  ;;  %v11544_v53 = vld [vmem:[%s13881_s4 + $0xf8] sm:$0xff]  }
 0x1f5   : > { %9604 = vmatpush3.bf16.xpose.msra.mxu0 %v11326_v29  ;;  %9611 = vmatprep.mubr.msk.bf16.mxu0 %vm4144_vm1, %v9152_v8  ;;  %v11469_v29 = vpop.permute.xlu0 %1586  ;;  %v11520_v8 = vld [vmem:[%s13881_s4 + $0xd8] sm:$0xff]   ;;  %v8990_v3 = vcombine.high %v1886_v61, %v1893_v62  ;;  %14080 = vst [vmem:[#allocation19_spill] sm:$0xff] %v11544_v53  ;;  %v2066_v62 = vcombine.low %v11299_v18, %v11374_v20  ;;  %v11562_v38 = vsel %vm4144_vm1, %v11515_v33, 0  ;;  %v11603_v33 = vsel %vm4144_vm1, %v11544_v53, 0 }
 0x1f6   : > { %9836 = vmatprep.subr.msk.bf16.mxu0 %vm4144_vm1, %v11310_v27  ;;  %v1902_v27 = vrot.slane %v1894_v34, %v10323_v58  ;;  %v11510_v34 = vsel %vm4144_vm1, %v11448_v16, 0  ;;  %14079 = vst [vmem:[#allocation17_spill] sm:$0xff] %v11520_v8  ;;  %v11553_v52 = vrot.slane %v2322_v24, %v10299_v43  ;;  %v11556_v44 = vrot.slane %v8988_v31, %v10299_v43  ;;  %v11576_v24 = vld [vmem:[%s13881_s4 + $0xf0] sm:$0xff]  }
 0x1f7   : > { %v11504_v47 = vpop.permute.xlu1 %1588  ;;  %14084 = vst [vmem:[#allocation54_spill] sm:$0xff] %v11562_v38  ;;  %14086 = vst [vmem:[#allocation56_spill] sm:$0xff] %v11576_v24  ;;  %v11579_v31 = vrot.slane %v2338_v59, %v10299_v43  ;;  %v11582_v63 = vrot.slane %v8989_v48, %v10299_v43  ;;  %v2050_v38 = vcombine.low %v11132_v14, %v11342_v1 }
 0x1f8   : > { %v2406_v41 = vcombine.low %v1902_v27, %v1909_v25  ;;  %v8991_v61 = vcombine.high %v1902_v27, %v1909_v25  ;;  %14082 = vst [vmem:[#allocation52_spill] sm:$0xff] %v11553_v52  ;;  %14083 = vst [vmem:[#allocation53_spill] sm:$0xff] %v11556_v44  ;;  %v11566_v27 = vsel %vm4144_vm1, %v11520_v8, 0  ;;  %v11571_v25 = vld [vmem:[%s13881_s4 + $0xd0] sm:$0xff]   ;;  %v11590_v8 = vrot.slane %v2390_v35, %v10299_v43 }
 0x1f9   : > { %9594 = vmatpush3.bf16.xpose.msra.mxu1 %v11332_v39  ;;  %v11529_v12 = vpop.permute.xlu0 %1602  ;;  %v11539_v39 = vsel %vm4144_vm1, %v11487_v32, 0  ;;  %14085 = vst [vmem:[#allocation55_spill] sm:$0xff] %v11566_v27  ;;  %14087 = vst [vmem:[#allocation57_spill] sm:$0xff] %v11579_v31  ;;  %v2067_v27 = vcombine.high %v11299_v18, %v11374_v20  ;;  %v2134_v59 = vcombine.low %v11312_v54, %v11382_v21  ;;  %v11608_v18 = vld [vmem:[%s13881_s4 + $0xc8] sm:$0xff]  }
 0x1fa   : > { %9833 = vmatprep.subr.msk.bf16.mxu1 %vm4144_vm1, %v11387_v26  ;;  %v11550_v26 = vsel %vm4144_vm1, %v11502_v6, 0  ;;  %14088 = vst [vmem:[#allocation58_spill] sm:$0xff] %v11582_v63  ;;  %14089 = vst [vmem:[#allocation59_spill] sm:$0xff] %v11590_v8  ;;  %v2051_v20 = vcombine.high %v11132_v14, %v11342_v1  ;;  %v2118_v35 = vcombine.low %v11144_v5, %v11348_v15  ;;  %v11636_v1 = vld [vmem:[%s13881_s4 + $0xe8] sm:$0xff]  }
 0x1fb   : > { %14081 = vst [vmem:[#allocation51_spill] sm:$0xff] %v11550_v26  ;;  %v11558_v37 = vpop.permute.xlu1 %1604  ;;  %v11593_v26 = vrot.slane %v8990_v3, %v10299_v43  ;;  %14091 = vst [vmem:[#allocation61_spill] sm:$0xff] %v11603_v33  ;;  %v11611_v3 = vrot.slane %v2406_v41, %v10299_v43  ;;  %v2135_v33 = vcombine.high %v11312_v54, %v11382_v21  ;;  %v11627_v41 = vsel %vm4144_vm1, %v11571_v25, 0 }
 0x1fc   : > { %14094 = vst [vmem:[#allocation64_spill] sm:$0xff] %v11627_v41  ;;  %v2058_v14 = vrot.slane %v2050_v38, %v10299_v43  ;;  %v2354_v54 = vcombine.low %v11553_v52, %v11556_v44  ;;  %v2370_v21 = vcombine.low %v11579_v31, %v11582_v63  ;;  %v2142_v41 = vrot.slane %v2134_v59, %v10299_v43 }
 0x1fd   : > { %9606 = vmatpush3.bf16.xpose.msra.mxu0 %v11336_v11  ;;  %14090 = vst [vmem:[#allocation60_spill] sm:$0xff] %v11593_v26  ;;  %v11599_v48 = vpop.permute.xlu0 %1546  ;;  %14092 = vst [vmem:[#allocation62_spill] sm:$0xff] %v11611_v3  ;;  %v11614_v11 = vrot.slane %v8991_v61, %v10299_v43  ;;  %v11631_v61 = vsel %vm4144_vm1, %v11576_v24, 0  ;;  %v11654_v38 = vsel %vm4144_vm1, %v11608_v18, 0  ;;  %v2149_v59 = vrot.slane %v2135_v33, %v10299_v43  ;;  %v11680_v33 = vld [vmem:[%s13881_s4 + $0xe0] sm:$0xff]  }
 0x1fe   : > { %9837 = vmatprep.subr.msk.bf16.mxu0 %vm4144_vm1, %v11403_v30  ;;  %v2074_v30 = vrot.slane %v2066_v62, %v10299_v43  ;;  %14095 = vst [vmem:[#allocation65_spill] sm:$0xff] %v11631_v61  ;;  %v2081_v62 = vrot.slane %v2067_v27, %v10299_v43  ;;  %v2119_v61 = vcombine.high %v11144_v5, %v11348_v15  ;;  %14096 = vst [vmem:[#allocation66_spill] sm:$0xff] %v11680_v33 }
 0x1ff   : > { %14093 = vst [vmem:[#allocation63_spill] sm:$0xff] %v11614_v11  ;;  %v11623_v53 = vpop.permute.xlu1 %1548  ;;  %v2065_v27 = vrot.slane %v2051_v20, %v10299_v43  ;;  %v2438_v5 = vcombine.low %v11611_v3, %v11614_v11  ;;  %v2126_v15 = vrot.slane %v2118_v35, %v10299_v43  ;;  %v11683_v35 = vrot.slane %v2354_v54, %v10323_v58 }
 0x200   : > { %v2082_v31 = vcombine.low %v2058_v14, %v2074_v30  ;;  %v2083_v63 = vcombine.high %v2058_v14, %v2074_v30  ;;  %v11686_v3 = vrot.slane %v2370_v21, %v10323_v58  ;;  %v2133_v11 = vrot.slane %v2119_v61, %v10299_v43 }
 0x201   : > { %9596 = vmatpush3.bf16.xpose.msra.mxu1 %v11413_v55  ;;  %v2422_v55 = vcombine.low %v11590_v8, %v11593_v26  ;;  %v11672_v8 = vld [vmem:[%s13881_s4 + $0xc0] sm:$0xff]   ;;  %v2098_v30 = vcombine.low %v2065_v27, %v2081_v62  ;;  %v2099_v14 = vcombine.high %v2065_v27, %v2081_v62  ;;  %v2150_v26 = vcombine.low %v2126_v15, %v2142_v41 }
 0x202   : > { %v11648_v24 = vpop.permute.xlu0 %1562  ;;  %9834 = vmatprep.subr.msk.bf16.mxu1 %vm4144_vm1, %v11418_v13  ;;  %v11667_v13 = vsel %vm4144_vm1, %v11636_v1, 0  ;;  %v2151_v44 = vcombine.high %v2126_v15, %v2142_v41  ;;  %v2090_v20 = vrot.slane %v2082_v31, %v10323_v58  ;;  %v2097_v54 = vrot.slane %v2083_v63, %v10323_v58 }
 0x203   : > { %v11663_v52 = vpop.permute.xlu1 %1564  ;;  %v11698_v50 = vrot.slane %v2422_v55, %v10323_v58  ;;  %v11701_v21 = vrot.slane %v2438_v5, %v10323_v58  ;;  %v2166_v61 = vcombine.low %v2133_v11, %v2149_v59  ;;  %v2167_v41 = vcombine.high %v2133_v11, %v2149_v59 }
 0x204   : > { %v11709_v27 = vsel %vm4144_vm1, %v11672_v8, 0  ;;  %v2106_v31 = vrot.slane %v2098_v30, %v10323_v58  ;;  %v2113_v63 = vrot.slane %v2099_v14, %v10323_v58  ;;  %v11716_v55 = vsel %vm4144_vm1, %v11680_v33, 0 }
 0x205   : > { %9608 = vmatpush3.bf16.xpose.msra.mxu0 %v11456_v46  ;;  %14098 = vst [vmem:[#allocation67_spill] sm:$0xff] %v11709_v27  ;;  %14099 = vst [vmem:[#allocation68_spill] sm:$0xff] %v11716_v55  ;;  %v2386_v11 = vcombine.low %v11683_v35, %v11686_v3  ;;  %v2158_v5 = vrot.slane %v2150_v26, %v10323_v58  ;;  %v2165_v59 = vrot.slane %v2151_v44, %v10323_v58 }
 0x206   : > { %9838 = vmatprep.subr.msk.bf16.mxu0 %vm4144_vm1, %v11423_v4  ;;  %v11691_v62 = vpop.permute.xlu0 %1578  ;;  %v1930_v4 = vcombine.low %v11398_v17, %v11529_v12  ;;  %v1914_v51 = vcombine.low %v11175_v10, %v11469_v29  ;;  %v1931_v30 = vcombine.high %v11398_v17, %v11529_v12  ;;  %v8996_v46 = vcombine.high %v2090_v20, %v2097_v54 }
 0x207   : > { %v2454_v22 = vcombine.low %v11698_v50, %v11701_v21  ;;  %v2174_v44 = vrot.slane %v2166_v61, %v10323_v58  ;;  %v2181_v55 = vrot.slane %v2167_v41, %v10323_v58  ;;  %v1915_v12 = vcombine.high %v11175_v10, %v11469_v29 }
 0x208   : > { %v11705_v15 = vpop.permute.xlu1 %1580  ;;  %v1938_v17 = vrot.slane %v1930_v4, %v10299_v43  ;;  %v8997_v33 = vcombine.high %v2106_v31, %v2113_v63  ;;  %v2662_v61 = vcombine.low %v2158_v5, %v2165_v59  ;;  %v8998_v26 = vcombine.high %v2158_v5, %v2165_v59 }
 0x209   : > { %9598 = vmatpush3.bf16.xpose.msra.mxu1 %v11473_v49  ;;  %v2594_v49 = vcombine.low %v2090_v20, %v2097_v54  ;;  %v1998_v20 = vcombine.low %v11407_v7, %v11558_v37  ;;  %v2455_v54 = vcombine.high %v11698_v50, %v11701_v21  ;;  %v1922_v41 = vrot.slane %v1914_v51, %v10299_v43 }
 0x20a   : > { %v11726_v14 = vpop.permute.xlu0 %1594  ;;  %9839 = vmatprep.subr.msk.bf16.mxu1 %vm4144_vm1, %v11431_v36  ;;  %v2610_v36 = vcombine.low %v2106_v31, %v2113_v63  ;;  %v1945_v10 = vrot.slane %v1931_v30, %v10299_v43  ;;  %v11756_v31 = vrot.slane %v8996_v46, %v10299_v43  ;;  %v1982_v50 = vcombine.low %v11218_v23, %v11504_v47 }
 0x20b   : > { %v11753_v4 = vrot.slane %v2594_v49, %v10299_v43  ;;  %v2678_v51 = vcombine.low %v2174_v44, %v2181_v55  ;;  %v1929_v21 = vrot.slane %v1915_v12, %v10299_v43  ;;  %v1946_v63 = vcombine.low %v1922_v41, %v1938_v17 }
 0x20c   : > { %v11739_v27 = vpop.permute.xlu1 %1596  ;;  %v1947_v5 = vcombine.high %v1922_v41, %v1938_v17  ;;  %v11768_v59 = vrot.slane %v2610_v36, %v10299_v43  ;;  %v8999_v46 = vcombine.high %v2174_v44, %v2181_v55  ;;  %v1983_v30 = vcombine.high %v11218_v23, %v11504_v47  ;;  %v14100_v17 = vld [vmem:[#allocation2_spill] sm:$0xff] }
 0x20d   : > { %9610 = vmatpush3.bf16.xpose.msra.mxu0 %v11477_v19  ;;  %v1999_v19 = vcombine.high %v11407_v7, %v11558_v37  ;;  %v2006_v49 = vrot.slane %v1998_v20, %v10299_v43  ;;  %v11775_v37 = vrot.slane %v8997_v33, %v10299_v43  ;;  %v11778_v7 = vrot.slane %v2662_v61, %v10299_v43 }
 0x20e   : > { %9843 = vmatprep.subr.msk.bf16.mxu0 %vm4144_vm1, %v11436_v56  ;;  %v11750_v29 = vpop.permute.xlu0 %2760  ;;  %v1962_v12 = vcombine.low %v1929_v21, %v1945_v10  ;;  %v1990_v23 = vrot.slane %v1982_v50, %v10299_v43  ;;  %v1963_v47 = vcombine.high %v1929_v21, %v1945_v10  ;;  %v11791_v33 = vpack.c.bf16 %v2454_v22, %v2386_v11 }
 0x20f   : > { %v11794_v44 = vrot.slane %v2678_v51, %v10299_v43  ;;  %v1961_v36 = vrot.slane %v1947_v5, %v10323_v58  ;;  %v14101_v20 = vcombine.low %v11443_v2, %v11458_v40  ;;  %v2626_v41 = vcombine.low %v11753_v4, %v11756_v31  ;;  %v14102_v40 = vld [vmem:[#allocation18_spill] sm:$0xff] }
 0x210   : > { %9600 = vmatmul.mubr.msk.bf16.vlgmr.msra.gmra.mxu1 %vm4144_vm1, %v11506_v42  ;;  %v11765_v56 = vpop.permute.xlu1 %2758  ;;  %v11781_v42 = vrot.slane %v8998_v26, %v10299_v43  ;;  %v1954_v26 = vrot.slane %v1946_v63, %v10323_v58  ;;  %v11807_v22 = vrot.slane %v8999_v46, %v10299_v43  ;;  %v2014_v11 = vcombine.low %v1990_v23, %v2006_v49 }
 0x211   : > { %9616 = vmatpush3.bf16.xpose.msra.mxu1 %v11493_v9  ;;  %9623 = vmatprep.mubr.msk.bf16.mxu1 %vm4144_vm1, %v14100_v17  ;;  %v2013_v9 = vrot.slane %v1999_v19, %v10299_v43  ;;  %v2015_v10 = vcombine.high %v1990_v23, %v2006_v49  ;;  %v1970_v50 = vrot.slane %v1962_v12, %v10323_v58  ;;  %v14103_v19 = vld [vmem:[#allocation4_spill] sm:$0xff] }
 0x212   : > { %v11785_v55 = vpop.permute.xlu0 %2790  ;;  %9840 = vmatprep.subr.msk.bf16.mxu1 %vm4144_vm1, %v11448_v16  ;;  %v1997_v16 = vrot.slane %v1983_v30, %v10299_v43  ;;  %v1658_v2 = vcombine.low %v11648_v24, %v11726_v14  ;;  %v14104_v51 = vcombine.low %v14102_v40, %v14103_v19  ;;  %v2642_v63 = vcombine.low %v11768_v59, %v11775_v37 }
 0x213   : > { %v2694_v5 = vcombine.low %v11778_v7, %v11781_v42  ;;  %v1659_v49 = vcombine.high %v11648_v24, %v11726_v14  ;;  %v2458_v12 = vcombine.low %v1954_v26, %v1961_v36  ;;  %v1642_v17 = vcombine.low %v11599_v48, %v11691_v62 }
 0x214   : > { %9612 = vmatmul.mubr.msk.bf16.vlgmr.msra.gmra.mxu0 %vm4144_vm1, %v14101_v20  ;;  %v11802_v61 = vpop.permute.xlu1 %2774  ;;  %v2030_v46 = vcombine.low %v1997_v16, %v2013_v9  ;;  %v2031_v30 = vcombine.high %v1997_v16, %v2013_v9  ;;  %v11834_v20 = vrot.slane %v2626_v41, %v10323_v58  ;;  %v8992_v9 = vcombine.high %v1954_v26, %v1961_v36 }
 0x215   : > { %9628 = vmatpush3.bf16.xpose.msra.mxu0 %v11497_v0  ;;  %9635 = vmatprep.mubr.msk.bf16.mxu0 %vm4144_vm1, %v14104_v51  ;;  %v1977_v0 = vrot.slane %v1963_v47, %v10323_v58  ;;  %v14105_v47 = vcombine.high %v11683_v35, %v11686_v3  ;;  %v2022_v24 = vrot.slane %v2014_v11, %v10323_v58 }
 0x216   : > { %v11818_v21 = vpop.permute.xlu0 %2806  ;;  %9844 = vmatprep.subr.msk.bf16.mxu0 %vm4144_vm1, %v11463_v60  ;;  %v2029_v14 = vrot.slane %v2015_v10, %v10323_v58  ;;  %v1643_v60 = vcombine.high %v11599_v48, %v11691_v62  ;;  %v1666_v16 = vrot.slane %v1658_v2, %v10299_v43  ;;  %v11852_v3 = vrot.slane %v2642_v63, %v10323_v58 }
 0x217   : > { %v11839_v40 = vpack.c.bf16 %v2455_v54, %v14105_v47  ;;  %v11855_v35 = vrot.slane %v2694_v5, %v10323_v58  ;;  %v2710_v54 = vcombine.low %v11794_v44, %v11807_v22  ;;  %v2474_v26 = vcombine.low %v1970_v50, %v1977_v0 }
 0x218   : > { %v11831_v23 = vpop.permute.xlu1 %2776  ;;  %v2038_v48 = vrot.slane %v2030_v46, %v10323_v58  ;;  %v1673_v62 = vrot.slane %v1659_v49, %v10299_v43  ;;  %v11863_v36 = vrot.slane %v2458_v12, %v10299_v43  ;;  %v1650_v41 = vrot.slane %v1642_v17, %v10299_v43 }
 0x219   : > { %9618 = vmatpush3.bf16.xpose.msra.mxu1 %v11510_v34  ;;  %v2045_v34 = vrot.slane %v2031_v30, %v10323_v58  ;;  %v1726_v11 = vcombine.low %v11663_v52, %v11739_v27  ;;  %v11871_v2 = vrot.slane %v8992_v9, %v10299_v43  ;;  %v2526_v51 = vcombine.low %v2022_v24, %v2029_v14 }
 0x21a   : > { %v11847_v19 = vpop.permute.xlu0 %2754  ;;  %9841 = vmatprep.subr.msk.bf16.mxu1 %vm4144_vm1, %v11482_v57  ;;  %v8993_v57 = vcombine.high %v1970_v50, %v1977_v0  ;;  %v1657_v63 = vrot.slane %v1643_v60, %v10299_v43  ;;  %v1727_v5 = vcombine.high %v11663_v52, %v11739_v27  ;;  %v8994_v46 = vcombine.high %v2022_v24, %v2029_v14 }
 0x21b   : > { %v1710_v50 = vcombine.low %v11623_v53, %v11705_v15  ;;  %v1674_v0 = vcombine.low %v1650_v41, %v1666_v16  ;;  %v1675_v30 = vcombine.high %v1650_v41, %v1666_v16  ;;  %v2542_v12 = vcombine.low %v2038_v48, %v2045_v34 }
 0x21c   : > { %v11868_v10 = vpop.permute.xlu1 %2792  ;;  %v1711_v17 = vcombine.high %v11623_v53, %v11705_v15  ;;  %v1690_v47 = vcombine.low %v1657_v63, %v1673_v62  ;;  %v1691_v9 = vcombine.high %v1657_v63, %v1673_v62  ;;  %v11886_v52 = vrot.slane %v2474_v26, %v10299_v43 }
 0x21d   : > { %9630 = vmatpush3.bf16.xpose.msra.mxu0 %v11527_v28  ;;  %v8995_v28 = vcombine.high %v2038_v48, %v2045_v34  ;;  %v1734_v27 = vrot.slane %v1726_v11, %v10299_v43  ;;  %v11892_v14 = vrot.slane %v2710_v54, %v10323_v58  ;;  %v11898_v60 = vrot.slane %v2526_v51, %v10299_v43 }
 0x21e   : > { %9845 = vmatprep.subr.msk.bf16.mxu0 %vm4144_vm1, %v11487_v32  ;;  %v11881_v49 = vpop.permute.xlu0 %2770  ;;  %14106 = vst [vmem:[#allocation2_spill] sm:$0xff] %v11886_v52  ;;  %v11895_v32 = vrot.slane %v8993_v57, %v10299_v43  ;;  %v1741_v53 = vrot.slane %v1727_v5, %v10299_v43  ;;  %v2658_v15 = vcombine.low %v11834_v20, %v11852_v3 }
 0x21f   : > { %14108 = vst [vmem:[#allocation4_spill] sm:$0xff] %v11898_v60  ;;  %v11905_v16 = vrot.slane %v8994_v46, %v10299_v43  ;;  %v1718_v26 = vrot.slane %v1710_v50, %v10299_v43  ;;  %v1682_v54 = vrot.slane %v1674_v0, %v10323_v58  ;;  %v1689_v48 = vrot.slane %v1675_v30, %v10323_v58 }
 0x220   : > { %v11889_v24 = vpop.permute.xlu1 %2808  ;;  %14107 = vst [vmem:[#allocation18_spill] sm:$0xff] %v11895_v32  ;;  %v11915_v62 = vrot.slane %v2542_v12, %v10299_v43  ;;  %v1698_v57 = vrot.slane %v1690_v47, %v10323_v58  ;;  %v1705_v41 = vrot.slane %v1691_v9, %v10323_v58  ;;  %v11921_v11 = vrot.slane %v8995_v28, %v10299_v43  ;;  %v14112_v9 = vld [vmem:[#allocation16_spill] sm:$0xff] }
 0x221   : > { %9620 = vmatpush3.bf16.xpose.msra.mxu1 %v11535_v45  ;;  %14109 = vst [vmem:[#allocation69_spill] sm:$0xff] %v11905_v16  ;;  %v1725_v45 = vrot.slane %v1711_v17, %v10299_v43  ;;  %v1742_v51 = vcombine.low %v1718_v26, %v1734_v27  ;;  %v1743_v63 = vcombine.high %v1718_v26, %v1734_v27 }
 0x222   : > { %v11910_v34 = vpop.permute.xlu0 %2786  ;;  %9842 = vmatprep.subr.msk.bf16.mxu1 %vm4144_vm1, %v11502_v6  ;;  %14110 = vst [vmem:[#allocation70_spill] sm:$0xff] %v11915_v62  ;;  %14111 = vst [vmem:[#allocation71_spill] sm:$0xff] %v11921_v11  ;;  %v2726_v46 = vcombine.low %v11855_v35, %v11892_v14  ;;  %v2490_v0 = vcombine.low %v11863_v36, %v11871_v2  ;;  %v2506_v30 = vcombine.low %v11886_v52, %v11895_v32 }
 0x223   : > { %v1758_v6 = vcombine.low %v1725_v45, %v1741_v53  ;;  %v1759_v50 = vcombine.high %v1725_v45, %v1741_v53  ;;  %v2186_v12 = vcombine.low %v1682_v54, %v1689_v48  ;;  %v3266_v17 = vcombine.low %v11802_v61, %v11818_v21 }
 0x224   : > { %v11923_v5 = vpop.permute.xlu1 %2756  ;;  %v3267_v47 = vcombine.high %v11802_v61, %v11818_v21  ;;  %v8984_v27 = vcombine.high %v1682_v54, %v1689_v48  ;;  %v2202_v53 = vcombine.low %v1698_v57, %v1705_v41  ;;  %v8985_v26 = vcombine.high %v1698_v57, %v1705_v41  ;;  %v14113_v54 = vld [vmem:[#allocation51_spill] sm:$0xff] }
 0x225   : > { %9632 = vmatpush3.bf16.xpose.msra.mxu0 %v11539_v39  ;;  %v2659_v39 = vcombine.high %v11834_v20, %v11852_v3  ;;  %v2727_v45 = vcombine.high %v11855_v35, %v11892_v14  ;;  %v1750_v52 = vrot.slane %v1742_v51, %v10323_v58  ;;  %v1757_v32 = vrot.slane %v1743_v63, %v10323_v58 }
 0x226   : > { %9846 = vmatprep.subr.msk.bf16.mxu0 %vm4144_vm1, %v14112_v9  ;;  %v11938_v28 = vpop.permute.xlu0 %2802  ;;  %v3250_v61 = vcombine.low %v11765_v56, %v11785_v55  ;;  %v3251_v21 = vcombine.high %v11765_v56, %v11785_v55  ;;  %v1766_v20 = vrot.slane %v1758_v6, %v10323_v58  ;;  %v1773_v3 = vrot.slane %v1759_v50, %v10323_v58  ;;  %v14115_v55 = vld [vmem:[#allocation17_spill] sm:$0xff] }
 0x227   : > { %v11956_v35 = vrot.slane %v2490_v0, %v10323_v58  ;;  %v11959_v14 = vrot.slane %v2506_v30, %v10323_v58  ;;  %v11962_v48 = vrot.slane %v2186_v12, %v10299_v43  ;;  %v3274_v57 = vrot.slane %v3266_v17, %v10299_v43 }
 0x228   : > { %v11950_v9 = vpop.permute.xlu1 %2750  ;;  %v3281_v56 = vrot.slane %v3267_v47, %v10299_v43  ;;  %v2558_v41 = vcombine.low %v11898_v60, %v11905_v16  ;;  %v11971_v51 = vrot.slane %v8984_v27, %v10299_v43  ;;  %v11974_v63 = vrot.slane %v2202_v53, %v10299_v43  ;;  %v14119_v53 = vld [vmem:[#allocation54_spill] sm:$0xff]  ;;  %v14138_v16 = vld [vmem:[#allocation65_spill] sm:$0xff] }
 0x229   : > { %9622 = vmatpush3.bf16.xpose.msra.mxu1 %v14113_v54  ;;  %14114 = vst [vmem:[#allocation16_spill] sm:$0xff] %v11962_v48  ;;  %v11977_v6 = vrot.slane %v8985_v26, %v10299_v43  ;;  %v2574_v50 = vcombine.low %v11915_v62, %v11921_v11  ;;  %v2254_v0 = vcombine.low %v1750_v52, %v1757_v32  ;;  %v11992_v26 = vsel %vm4144_vm1, %v11791_v33, 0  ;;  %v14120_v11 = vld [vmem:[#allocation19_spill] sm:$0xff] }
 0x22a   : > { %9847 = vmatprep.subr.msk.bf16.mxu1 %vm4144_vm1, %v14115_v55  ;;  %14116 = vst [vmem:[#allocation51_spill] sm:$0xff] %v11971_v51  ;;  %14117 = vst [vmem:[#allocation17_spill] sm:$0xff] %v11974_v63  ;;  %v8986_v30 = vcombine.high %v1750_v52, %v1757_v32  ;;  %v3258_v12 = vrot.slane %v3250_v61, %v10299_v43  ;;  %v3265_v17 = vrot.slane %v3251_v21, %v10299_v43  ;;  %v11983_v47 = vpop.permute.xlu0 %2752 }
 0x22b   : > { %14118 = vst [vmem:[#allocation72_spill] sm:$0xff] %v11977_v6  ;;  %v2270_v27 = vcombine.low %v1766_v20, %v1773_v3  ;;  %v8987_v55 = vcombine.high %v1766_v20, %v1773_v3  ;;  %v11988_v60 = vpack.c.bf16 %v2726_v46, %v2658_v15  ;;  %v11996_v21 = vpack.c.bf16 %v2727_v45, %v2659_v39 }
 0x22c   : > { %v11985_v54 = vpop.permute.xlu1 %2766  ;;  %v3282_v62 = vcombine.low %v3258_v12, %v3274_v57  ;;  %v3283_v52 = vcombine.high %v3258_v12, %v3274_v57  ;;  %v3298_v32 = vcombine.low %v3265_v17, %v3281_v56  ;;  %v3299_v61 = vcombine.high %v3265_v17, %v3281_v56  ;;  %v14123_v57 = vld [vmem:[#allocation13_spill] sm:$0xff] }
 0x22d   : > { %9634 = vmatpush3.bf16.xpose.msra.mxu0 %v14119_v53  ;;  %v2522_v20 = vcombine.low %v11956_v35, %v11959_v14  ;;  %v2566_v3 = vrot.slane %v2558_v41, %v10323_v58  ;;  %v2582_v15 = vrot.slane %v2574_v50, %v10323_v58  ;;  %v12003_v46 = vrot.slane %v2254_v0, %v10299_v43  ;;  %v14126_v50 = vld [vmem:[#allocation55_spill] sm:$0xff] }
 0x22e   : > { %9851 = vmatprep.subr.msk.bf16.mxu0 %vm4144_vm1, %v14120_v11  ;;  %v12006_v53 = vrot.slane %v8986_v30, %v10299_v43  ;;  %v2218_v11 = vcombine.low %v11962_v48, %v11971_v51  ;;  %v2234_v39 = vcombine.low %v11974_v63, %v11977_v6  ;;  %v12017_v45 = vrot.slane %v2270_v27, %v10299_v43  ;;  %v14127_v0 = vld [vmem:[#allocation15_spill] sm:$0xff] }
 0x22f   : > { %14121 = vst [vmem:[#allocation54_spill] sm:$0xff] %v12003_v46  ;;  %v12020_v41 = vrot.slane %v8987_v55, %v10299_v43  ;;  %v2523_v30 = vcombine.high %v11956_v35, %v11959_v14  ;;  %v12029_v12 = vsel %vm4144_vm1, %v11839_v40, 0  ;;  %v12032_v17 = vrot.slane %v3282_v62, %v10323_v58  ;;  %v14134_v51 = vld [vmem:[#allocation3_spill] sm:$0xff] }
 0x230   : > { %14122 = vst [vmem:[#allocation19_spill] sm:$0xff] %v12006_v53  ;;  %9624 = vmatmul.mubr.msk.bf16.vlgmr.msra.gmra.mxu1 %vm4144_vm1, %v14123_v57  ;;  %v12010_v56 = vpop.permute.xlu1 %2768  ;;  %14124 = vst [vmem:[#allocation13_spill] sm:$0xff] %v12017_v45  ;;  %v12035_v27 = vrot.slane %v3283_v52, %v10323_v58  ;;  %v12038_v55 = vrot.slane %v3298_v32, %v10323_v58  ;;  %v12041_v57 = vrot.slane %v3299_v61, %v10323_v58  ;;  %v14129_v61 = vld [vmem:[#allocation11_spill] sm:$0xff] }
 0x231   : > { %14125 = vst [vmem:[#allocation73_spill] sm:$0xff] %v12020_v41  ;;  %9640 = vmatpush3.bf16.xpose.msra.mxu1 %v14126_v50  ;;  %9647 = vmatprep.mubr.msk.bf16.mxu1 %vm4144_vm1, %v14127_v0  ;;  %14128 = vst [vmem:[#allocation55_spill] sm:$0xff] %v12029_v12  ;;  %v12043_v50 = vpop.permute.xlu0 %2782  ;;  %v3318_v35 = vcombine.low %v11750_v29, %v11868_v10  ;;  %v3319_v62 = vcombine.high %v11750_v29, %v11868_v10  ;;  %v14130_v0 = vld [vmem:[#allocation10_spill] sm:$0xff]  ;;  %v14132_v29 = vld [vmem:[#allocation61_spill] sm:$0xff] }
 0x232   : > { %9848 = vmatprep.subr.msk.bf16.mxu1 %vm4144_vm1, %v11571_v25  ;;  %v3334_v14 = vcombine.low %v11831_v23, %v11889_v24  ;;  %v2590_v52 = vcombine.low %v2566_v3, %v2582_v15  ;;  %v3335_v32 = vcombine.high %v11831_v23, %v11889_v24  ;;  %v14131_v63 = vcombine.low %v14129_v61, %v14130_v0  ;;  %v14133_v10 = vld [vmem:[#allocation12_spill] sm:$0xff] }
 0x233   : > { %v2591_v6 = vcombine.high %v2566_v3, %v2582_v15  ;;  %v12060_v25 = vrot.slane %v2218_v11, %v10323_v58  ;;  %v12063_v48 = vrot.slane %v2234_v39, %v10323_v58  ;;  %v14135_v12 = vcombine.low %v14133_v10, %v14134_v51  ;;  %v14136_v61 = vld [vmem:[#allocation56_spill] sm:$0xff] }
 0x234   : > { %9636 = vmatmul.mubr.msk.bf16.vlgmr.msra.gmra.mxu0 %vm4144_vm1, %v14131_v63  ;;  %v12070_v23 = vpop.permute.xlu1 %2784  ;;  %v12074_v24 = vsel %vm4144_vm1, %v11988_v60, 0  ;;  %v12078_v63 = vsel %vm4144_vm1, %v11996_v21, 0  ;;  %v2286_v3 = vcombine.low %v12003_v46, %v12006_v53  ;;  %v2302_v15 = vcombine.low %v12017_v45, %v12020_v41 }
 0x235   : > { %9652 = vmatpush3.bf16.xpose.msra.mxu0 %v14132_v29  ;;  %9659 = vmatprep.mubr.msk.bf16.mxu0 %vm4144_vm1, %v14135_v12  ;;  %v3326_v0 = vrot.slane %v3318_v35, %v10299_v43  ;;  %v3333_v29 = vrot.slane %v3319_v62, %v10299_v43  ;;  %v3342_v10 = vrot.slane %v3334_v14, %v10299_v43  ;;  %v2799_v39 = vpop.permute.xlu0 %2798 }
 0x236   : > { %9852 = vmatprep.subr.msk.bf16.mxu0 %vm4144_vm1, %v14136_v61  ;;  %v12097_v45 = vpack.c.bf16 %v2590_v52, %v2522_v20  ;;  %v3349_v51 = vrot.slane %v3335_v32, %v10299_v43  ;;  %v3114_v11 = vcombine.low %v11847_v19, %v11910_v34  ;;  %v12102_v41 = vpack.c.bf16 %v2591_v6, %v2523_v30  ;;  %v14137_v61 = vld [vmem:[#allocation64_spill] sm:$0xff] }
 0x237   : > { %v2250_v12 = vcombine.low %v12060_v25, %v12063_v48  ;;  %v3115_v35 = vcombine.high %v11847_v19, %v11910_v34  ;;  %v12110_v20 = vrot.slane %v2286_v3, %v10323_v58  ;;  %v12113_v14 = vrot.slane %v2302_v15, %v10323_v58 }
 0x238   : > { %v2801_v62 = vpop.permute.xlu1 %2800  ;;  %v3130_v6 = vcombine.low %v11881_v49, %v11938_v28  ;;  %v3350_v32 = vcombine.low %v3326_v0, %v3342_v10  ;;  %v3351_v3 = vcombine.high %v3326_v0, %v3342_v10  ;;  %v3131_v15 = vcombine.high %v11881_v49, %v11938_v28 }
 0x239   : > { %9642 = vmatpush3.bf16.xpose.msra.mxu1 %v14137_v61  ;;  %v2994_v61 = vcombine.low %v11985_v54, %v2799_v39  ;;  %v3366_v52 = vcombine.low %v3333_v29, %v3349_v51  ;;  %v3367_v46 = vcombine.high %v3333_v29, %v3349_v51  ;;  %v2995_v53 = vcombine.high %v11985_v54, %v2799_v39 }
 0x23a   : > { %9849 = vmatprep.subr.msk.bf16.mxu1 %vm4144_vm1, %v11608_v18  ;;  %v3122_v18 = vrot.slane %v3114_v11, %v10299_v43  ;;  %v3129_v19 = vrot.slane %v3115_v35, %v10299_v43  ;;  %v2978_v34 = vcombine.low %v11950_v9, %v12043_v50  ;;  %v3062_v0 = vcombine.low %v12010_v56, %v2801_v62 }
 0x23b   : > { %v2318_v49 = vcombine.low %v12110_v20, %v12113_v14  ;;  %v3138_v28 = vrot.slane %v3130_v6, %v10299_v43  ;;  %v2979_v51 = vcombine.high %v11950_v9, %v12043_v50  ;;  %v3063_v54 = vcombine.high %v12010_v56, %v2801_v62 }
 0x23c   : > { %v12137_v10 = vpop.permute.xlu1 %2748  ;;  %v12150_v11 = vrot.slane %v3350_v32, %v10323_v58  ;;  %v3145_v39 = vrot.slane %v3131_v15, %v10299_v43  ;;  %v3002_v29 = vrot.slane %v2994_v61, %v10299_v43  ;;  %v3046_v35 = vcombine.low %v11983_v47, %v12070_v23 }
 0x23d   : > { %9654 = vmatpush3.bf16.xpose.msra.mxu0 %v14138_v16  ;;  %14139 = vst [vmem:[#allocation15_spill] sm:$0xff] %v12137_v10  ;;  %v12157_v9 = vrot.slane %v3351_v3, %v10323_v58  ;;  %v12160_v56 = vrot.slane %v3366_v52, %v10323_v58  ;;  %v3047_v50 = vcombine.high %v11983_v47, %v12070_v23 }
 0x23e   : > { %9853 = vmatprep.subr.msk.bf16.mxu0 %vm4144_vm1, %v11636_v1  ;;  %v3009_v1 = vrot.slane %v2995_v53, %v10299_v43  ;;  %v12166_v62 = vrot.slane %v3367_v46, %v10323_v58  ;;  %v2986_v6 = vrot.slane %v2978_v34, %v10299_v43  ;;  %v3070_v32 = vrot.slane %v3062_v0, %v10299_v43 }
 0x23f   : > { %v12173_v3 = vpack.c.bf16 %v2318_v49, %v2250_v12  ;;  %v3146_v52 = vcombine.low %v3122_v18, %v3138_v28  ;;  %v3147_v61 = vcombine.high %v3122_v18, %v3138_v28  ;;  %v2993_v53 = vrot.slane %v2979_v51, %v10299_v43 }
 0x240   : > { %v12171_v15 = vpop.permute.xlu1 %2764  ;;  %v3077_v16 = vrot.slane %v3063_v54, %v10299_v43  ;;  %v3162_v47 = vcombine.low %v3129_v19, %v3145_v39  ;;  %v3163_v46 = vcombine.high %v3129_v19, %v3145_v39  ;;  %v3010_v23 = vcombine.low %v2986_v6, %v3002_v29 }
 0x241   : > { %9644 = vmatpush3.bf16.xpose.msra.mxu1 %v11654_v38  ;;  %14140 = vst [vmem:[#allocation11_spill] sm:$0xff] %v12171_v15  ;;  %v3054_v34 = vrot.slane %v3046_v35, %v10299_v43  ;;  %v3011_v0 = vcombine.high %v2986_v6, %v3002_v29  ;;  %v3026_v38 = vcombine.low %v2993_v53, %v3009_v1  ;;  %v14142_v35 = vld [vmem:[#allocation66_spill] sm:$0xff] }
 0x242   : > { %9850 = vmatprep.subr.msk.bf16.mxu1 %vm4144_vm1, %v11672_v8  ;;  %v3027_v30 = vcombine.high %v2993_v53, %v3009_v1  ;;  %v3061_v12 = vrot.slane %v3047_v50, %v10299_v43  ;;  %v3862_v18 = vcombine.low %v12150_v11, %v12157_v9  ;;  %v9014_v49 = vcombine.high %v12150_v11, %v12157_v9 }
 0x243   : > { %v3078_v28 = vcombine.low %v3054_v34, %v3070_v32  ;;  %v3079_v51 = vcombine.high %v3054_v34, %v3070_v32  ;;  %v3154_v1 = vrot.slane %v3146_v52, %v10323_v58  ;;  %v3161_v11 = vrot.slane %v3147_v61, %v10323_v58 }
 0x244   : > { %v12186_v8 = vpop.permute.xlu1 %2780  ;;  %v3094_v19 = vcombine.low %v3061_v12, %v3077_v16  ;;  %v3095_v54 = vcombine.high %v3061_v12, %v3077_v16  ;;  %v3170_v9 = vrot.slane %v3162_v47, %v10323_v58  ;;  %v3018_v50 = vrot.slane %v3010_v23, %v10323_v58 }
 0x245   : > { %9656 = vmatpush3.bf16.xpose.msra.mxu0 %v11667_v13  ;;  %14141 = vst [vmem:[#allocation10_spill] sm:$0xff] %v12186_v8  ;;  %v3177_v13 = vrot.slane %v3163_v46, %v10323_v58  ;;  %v3025_v16 = vrot.slane %v3011_v0, %v10323_v58  ;;  %v12201_v6 = vrot.slane %v3026_v38, %v10323_v58  ;;  %v14143_v46 = vld [vmem:[#allocation67_spill] sm:$0xff] }
 0x246   : > { %9854 = vmatprep.subr.msk.bf16.mxu0 %vm4144_vm1, %v14142_v35  ;;  %v12204_v32 = vrot.slane %v3027_v30, %v10323_v58  ;;  %v3878_v53 = vcombine.low %v12160_v56, %v12166_v62  ;;  %v9015_v52 = vcombine.high %v12160_v56, %v12166_v62  ;;  %v12211_v61 = vrot.slane %v3078_v28, %v10323_v58 }
 0x247   : > { %v12214_v47 = vrot.slane %v3079_v51, %v10323_v58  ;;  %v12218_v34 = vrot.slane %v3094_v19, %v10323_v58  ;;  %v12221_v30 = vrot.slane %v3095_v54, %v10323_v58  ;;  %v14144_v56 = vcombine.high %v11753_v4, %v11756_v31 }
 0x248   : > { %v2773_v23 = vpop.permute.xlu1 %2772  ;;  %v14145_v0 = vcombine.high %v11768_v59, %v11775_v37  ;;  %v3658_v12 = vcombine.low %v3154_v1, %v3161_v11  ;;  %v9008_v28 = vcombine.high %v3154_v1, %v3161_v11  ;;  %v3674_v51 = vcombine.low %v3170_v9, %v3177_v13  ;;  %v14146_v1 = vld [vmem:[#allocation68_spill] sm:$0xff] }
 0x249   : > { %9646 = vmatpush3.bf16.xpose.msra.mxu1 %v14143_v46  ;;  %v12229_v62 = vrot.slane %v14144_v56, %v10323_v58  ;;  %v2711_v19 = vcombine.high %v11794_v44, %v11807_v22  ;;  %v9009_v54 = vcombine.high %v3170_v9, %v3177_v13  ;;  %v9004_v35 = vcombine.high %v3018_v50, %v3025_v16  ;;  %v14151_v56 = vld [vmem:[#allocation14_spill] sm:$0xff] }
 0x24a   : > { %9855 = vmatprep.subr.msk.bf16.mxu1 %vm4144_vm1, %v11988_v60  ;;  %v12235_v38 = vrot.slane %v14145_v0, %v10323_v58  ;;  %v3522_v60 = vcombine.low %v3018_v50, %v3025_v16  ;;  %v3538_v4 = vcombine.low %v12201_v6, %v12204_v32  ;;  %v9005_v31 = vcombine.high %v12201_v6, %v12204_v32 }
 0x24b   : > { %v3590_v59 = vcombine.low %v12211_v61, %v12214_v47  ;;  %v9006_v37 = vcombine.high %v12211_v61, %v12214_v47  ;;  %v14147_v9 = vcombine.low %v12032_v17, %v12035_v27  ;;  %v3606_v50 = vcombine.low %v12218_v34, %v12221_v30 }
 0x24c   : > { %v2789_v11 = vpop.permute.xlu1 %2788  ;;  %v9007_v16 = vcombine.high %v12218_v34, %v12221_v30  ;;  %v14148_v6 = vcombine.high %v12032_v17, %v12035_v27  ;;  %v14149_v61 = vcombine.low %v12038_v55, %v12041_v57  ;;  %v14150_v34 = vcombine.high %v12038_v55, %v12041_v57  ;;  %v14152_v57 = vld [vmem:[#allocation24_spill] sm:$0xff] }
 0x24d   : > { %9658 = vmatpush3.bf16.xpose.msra.mxu0 %v14146_v1  ;;  %v12252_v13 = vrot.slane %v14147_v9, %v10299_v43  ;;  %v3182_v46 = vcombine.low %v11923_v5, %v2789_v11  ;;  %v12283_v17 = vrot.slane %v9014_v49, %v10299_v43  ;;  %v3183_v27 = vcombine.high %v11923_v5, %v2789_v11 }
 0x24e   : > { %9859 = vmatprep.subr.msk.bf16.mxu0 %vm4144_vm1, %v11996_v21  ;;  %v12264_v32 = vrot.slane %v14148_v6, %v10299_v43  ;;  %v12270_v47 = vrot.slane %v14149_v61, %v10299_v43  ;;  %v12277_v30 = vrot.slane %v14150_v34, %v10299_v43  ;;  %v12280_v21 = vrot.slane %v3862_v18, %v10299_v43  ;;  %v14153_v18 = vld [vmem:[#allocation20_spill] sm:$0xff] }
 0x24f   : > { %v12289_v0 = vrot.slane %v3878_v53, %v10299_v43  ;;  %v12292_v1 = vrot.slane %v9015_v52, %v10299_v43  ;;  %v12295_v55 = vrot.slane %v3658_v12, %v10299_v43  ;;  %v14154_v49 = vpack.c.bf16 %v14152_v57, %v14153_v18  ;;  %v14159_v18 = vld [vmem:[#allocation21_spill] sm:$0xff] }
 0x250   : > { %9648 = vmatmul.mubr.msk.bf16.vlgmr.msra.gmra.mxu1 %vm4144_vm1, %v14151_v56  ;;  %v2805_v5 = vpop.permute.xlu1 %2804  ;;  %v6607_v11 = vsel %vm4144_vm1, %v12097_v45, 0  ;;  %v12305_v53 = vrot.slane %v9008_v28, %v10299_v43  ;;  %v12308_v52 = vrot.slane %v3674_v51, %v10299_v43  ;;  %v12311_v12 = vrot.slane %v9009_v54, %v10299_v43  ;;  %v14156_v56 = vld [vmem:[#allocation7_spill] sm:$0xff] }
 0x251   : > { %9664 = vmatpush3.bf16.xpose.msra.mxu1 %v12074_v24  ;;  %9671 = vmatprep.mubr.msk.bf16.mxu1 %vm4144_vm1, %v14154_v49  ;;  %v3198_v24 = vcombine.low %v2773_v23, %v2805_v5  ;;  %v3199_v9 = vcombine.high %v2773_v23, %v2805_v5  ;;  %v12316_v6 = vrot.slane %v3522_v60, %v10299_v43  ;;  %v14155_v23 = vld [vmem:[#allocation5_spill] sm:$0xff] }
 0x252   : > { %9856 = vmatprep.subr.msk.bf16.mxu1 %vm4144_vm1, %v12097_v45  ;;  %v3827_v61 = vcombine.high %v12252_v13, %v12264_v32  ;;  %v3190_v28 = vrot.slane %v3182_v46, %v10299_v43  ;;  %v12322_v34 = vrot.slane %v9004_v35, %v10299_v43  ;;  %v12325_v51 = vrot.slane %v3538_v4, %v10299_v43  ;;  %v14158_v4 = vld [vmem:[#allocation25_spill] sm:$0xff] }
 0x253   : > { %v3843_v54 = vcombine.high %v12270_v47, %v12277_v30  ;;  %v3197_v45 = vrot.slane %v3183_v27, %v10299_v43  ;;  %v14157_v60 = vcombine.low %v14155_v23, %v14156_v56  ;;  %v3206_v57 = vrot.slane %v3198_v24, %v10299_v43 }
 0x254   : > { %v3213_v46 = vrot.slane %v3199_v9, %v10299_v43  ;;  %v3841_v35 = vrot.slane %v3827_v61, %v10323_v58  ;;  %v14160_v49 = vpack.c.bf16 %v14158_v4, %v14159_v18  ;;  %v6696_v27 = vsel %vm4144_vm1, %v12102_v41, 0 }
 0x255   : > { %9660 = vmatmul.mubr.msk.bf16.vlgmr.msra.gmra.mxu0 %vm4144_vm1, %v14157_v60  ;;  %v12345_v5 = vrot.slane %v9005_v31, %v10299_v43  ;;  %v3857_v23 = vrot.slane %v3843_v54, %v10323_v58  ;;  %v3895_v24 = vcombine.high %v12280_v21, %v12283_v17  ;;  %v3215_v9 = vcombine.high %v3190_v28, %v3206_v57 }
 0x256   : > { %9680 = vmatpush3.bf16.xpose.msra.mxu0 %v12078_v63  ;;  %9687 = vmatprep.mubr.msk.bf16.mxu0 %vm4144_vm1, %v14160_v49  ;;  %v3214_v63 = vcombine.low %v3190_v28, %v3206_v57  ;;  %v3230_v61 = vcombine.low %v3197_v45, %v3213_v46  ;;  %v3231_v56 = vcombine.high %v3197_v45, %v3213_v46 }
 0x257   : > { %9860 = vmatprep.subr.msk.bf16.mxu0 %vm4144_vm1, %v12102_v41  ;;  %v12353_v60 = vrot.slane %v3590_v59, %v10299_v43  ;;  %v12356_v4 = vrot.slane %v9006_v37, %v10299_v43  ;;  %v12359_v31 = vrot.slane %v3606_v50, %v10299_v43  ;;  %v3860_v54 = vcombine.low %v3841_v35, %v3857_v23 }
 0x258   : > { %v3222_v18 = vrot.slane %v3214_v63, %v10323_v58  ;;  %v3229_v49 = vrot.slane %v3215_v9, %v10323_v58  ;;  %v3238_v41 = vrot.slane %v3230_v61, %v10323_v58  ;;  %v3245_v28 = vrot.slane %v3231_v56, %v10323_v58 }
 0x259   : > { %9666 = vmatpush3.bf16.xpose.msra.mxu1 %v6607_v11  ;;  %v12366_v45 = vrot.slane %v9007_v16, %v10299_v43  ;;  %v3909_v59 = vrot.slane %v3895_v24, %v10323_v58  ;;  %v3911_v37 = vcombine.high %v12289_v0, %v12292_v1  ;;  %v3861_v50 = vcombine.high %v3841_v35, %v3857_v23 }
 0x25a   : > { %v3726_v57 = vcombine.low %v3222_v18, %v3229_v49  ;;  %v9010_v46 = vcombine.high %v3222_v18, %v3229_v49  ;;  %v3742_v29 = vcombine.low %v3238_v41, %v3245_v28  ;;  %v9011_v63 = vcombine.high %v3238_v41, %v3245_v28  ;;  %9857 = vmatprep.subr.msk.bf16.mxu1 %vm4144_vm1, %v11791_v33 }
 0x25b   : > { %v3925_v9 = vrot.slane %v3911_v37, %v10323_v58  ;;  %v3691_v11 = vcombine.high %v12295_v55, %v12305_v53  ;;  %v3707_v16 = vcombine.high %v12308_v52, %v12311_v12  ;;  %v3555_v24 = vcombine.high %v12316_v6, %v12322_v34 }
 0x25c   : > { %v12381_v35 = vrot.slane %v3726_v57, %v10299_v43  ;;  %v12384_v23 = vrot.slane %v9010_v46, %v10299_v43  ;;  %v12387_v61 = vrot.slane %v3742_v29, %v10299_v43  ;;  %v12390_v33 = vrot.slane %v9011_v63, %v10299_v43 }
 0x25d   : > { %v3928_v56 = vcombine.low %v3909_v59, %v3925_v9  ;;  %v3929_v18 = vcombine.high %v3909_v59, %v3925_v9  ;;  %v3705_v49 = vrot.slane %v3691_v11, %v10323_v58  ;;  %v3721_v41 = vrot.slane %v3707_v16, %v10323_v58 }
 0x25e   : > { %9682 = vmatpush3.bf16.xpose.msra.mxu0 %v6696_v27  ;;  %v14161_v28 = vcombine.high %v11778_v7, %v11781_v42  ;;  %v2725_v29 = vrot.slane %v2711_v19, %v10323_v58  ;;  %v3759_v27 = vcombine.high %v12381_v35, %v12384_v23  ;;  %v3775_v59 = vcombine.high %v12387_v61, %v12390_v33 }
 0x25f   : > { %9861 = vmatprep.subr.msk.bf16.mxu0 %vm4144_vm1, %v11839_v40  ;;  %v14162_v57 = vcombine.high %v12060_v25, %v12063_v48  ;;  %v14163_v40 = vcombine.high %v12110_v20, %v12113_v14  ;;  %v12414_v7 = vpack.c.bf16 %v3928_v56, %v3860_v54  ;;  %v12416_v42 = vpack.c.bf16 %v3929_v18, %v3861_v50 }
 0x260   : > { %v2709_v37 = vrot.slane %v14161_v28, %v10323_v58  ;;  %v3724_v63 = vcombine.low %v3705_v49, %v3721_v41  ;;  %v2660_v44 = vcombine.low %v12229_v62, %v12235_v38  ;;  %v3773_v22 = vrot.slane %v3759_v27, %v10323_v58 }
 0x261   : > { %v2734_v46 = vpack.c.bf16 %v14163_v40, %v14162_v57  ;;  %14164 = vst [vmem:[#allocation61_spill] sm:$0xff] %v12414_v7  ;;  %14165 = vst [vmem:[#allocation12_spill] sm:$0xff] %v12416_v42  ;;  %v3789_v19 = vrot.slane %v3775_v59, %v10323_v58  ;;  %v3569_v9 = vrot.slane %v3555_v24, %v10323_v58  ;;  %9668 = vmatpush3.bf16.xpose.msra.mxu1 %v11992_v26  ;;  %v14166_v26 = vld [vmem:[#allocation18_spill] sm:$0xff]  ;;  %v14168_v59 = vld [vmem:[#allocation69_spill] sm:$0xff] }
 0x262   : > { %v3571_v48 = vcombine.high %v12325_v51, %v12345_v5  ;;  %v3623_v25 = vcombine.high %v12353_v60, %v12356_v4  ;;  %v3639_v20 = vcombine.high %v12359_v31, %v12366_v45  ;;  %v3725_v14 = vcombine.high %v3705_v49, %v3721_v41  ;;  %9858 = vmatprep.subr.msk.bf16.mxu1 %vm4144_vm1, %v12173_v3  ;;  %v14167_v24 = vld [vmem:[#allocation2_spill] sm:$0xff]  ;;  %v14169_v49 = vld [vmem:[#allocation4_spill] sm:$0xff]  ;;  %v14170_v57 = vld [vmem:[#allocation71_spill] sm:$0xff] }
 0x263   : > { %v2728_v54 = vcombine.low %v2709_v37, %v2725_v29  ;;  %v2491_v50 = vcombine.high %v11863_v36, %v11871_v2  ;;  %v3792_v11 = vcombine.low %v3773_v22, %v3789_v19  ;;  %v3793_v16 = vcombine.high %v3773_v22, %v3789_v19  ;;  %v14171_v40 = vld [vmem:[#allocation70_spill] sm:$0xff]  ;;  %v14174_v2 = vld [vmem:[#allocation55_spill] sm:$0xff] }
 0x264   : > { %v2507_v56 = vcombine.high %v14167_v24, %v14166_v26  ;;  %v3585_v18 = vrot.slane %v3571_v48, %v10323_v58  ;;  %v3637_v28 = vrot.slane %v3623_v25, %v10323_v58  ;;  %v3653_v27 = vrot.slane %v3639_v20, %v10323_v58 }
 0x265   : > { %v2559_v41 = vcombine.high %v14169_v49, %v14168_v59  ;;  %v2575_v39 = vcombine.high %v14171_v40, %v14170_v57  ;;  %v12443_v42 = vpack.c.bf16 %v3792_v11, %v3724_v63  ;;  %v12445_v36 = vpack.c.bf16 %v3793_v16, %v3725_v14  ;;  %v14183_v49 = vld [vmem:[#allocation63_spill] sm:$0xff] }
 0x266   : > { %9684 = vmatpush3.bf16.xpose.msra.mxu0 %v14174_v2  ;;  %v3588_v22 = vcombine.low %v3569_v9, %v3585_v18  ;;  %v3656_v19 = vcombine.low %v3637_v28, %v3653_v27  ;;  %v3589_v26 = vcombine.high %v3569_v9, %v3585_v18  ;;  %v3657_v48 = vcombine.high %v3637_v28, %v3653_v27  ;;  %v14178_v28 = vld [vmem:[#allocation52_spill] sm:$0xff] }
 0x267   : > { %14172 = vst [vmem:[#allocation3_spill] sm:$0xff] %v12443_v42  ;;  %14173 = vst [vmem:[#allocation56_spill] sm:$0xff] %v12445_v36  ;;  %9862 = vmatprep.subr.msk.bf16.mxu0 %vm4144_vm1, %v2734_v46  ;;  %v6601_v25 = vsel %vm4144_vm1, %v12173_v3, 0  ;;  %v2661_v20 = vcombine.high %v12229_v62, %v12235_v38  ;;  %v2741_v24 = vpack.c.bf16 %v2728_v54, %v2660_v44  ;;  %v14177_v3 = vld [vmem:[#allocation53_spill] sm:$0xff]  ;;  %v14179_v38 = vld [vmem:[#allocation58_spill] sm:$0xff] }
 0x268   : > { %v2729_v59 = vcombine.high %v2709_v37, %v2725_v29  ;;  %v12453_v63 = vpack.c.bf16 %v3656_v19, %v3588_v22  ;;  %v12455_v14 = vpack.c.bf16 %v3657_v48, %v3589_v26  ;;  %v2505_v11 = vrot.slane %v2491_v50, %v10323_v58  ;;  %v14180_v37 = vld [vmem:[#allocation57_spill] sm:$0xff]  ;;  %v14181_v44 = vld [vmem:[#allocation60_spill] sm:$0xff]  ;;  %v14182_v54 = vld [vmem:[#allocation59_spill] sm:$0xff] }
 0x269   : > { %v2521_v16 = vrot.slane %v2507_v56, %v10323_v58  ;;  %v2573_v9 = vrot.slane %v2559_v41, %v10323_v58  ;;  %v2589_v18 = vrot.slane %v2575_v39, %v10323_v58  ;;  %9670 = vmatpush3.bf16.xpose.msra.mxu1 %v6601_v25  ;;  %v2355_v62 = vcombine.high %v14178_v28, %v14177_v3  ;;  %v14184_v50 = vld [vmem:[#allocation62_spill] sm:$0xff]  ;;  %v14185_v2 = vld [vmem:[#allocation28_spill] sm:$0xff] }
 0x26a   : > { %14175 = vst [vmem:[#allocation64_spill] sm:$0xff] %v12453_v63  ;;  %14176 = vst [vmem:[#allocation65_spill] sm:$0xff] %v12455_v14  ;;  %9863 = vmatprep.subr.msk.bf16.mxu1 %vm4144_vm1, %v2741_v24  ;;  %v2371_v29 = vcombine.high %v14180_v37, %v14179_v38  ;;  %v2423_v27 = vcombine.high %v14182_v54, %v14181_v44  ;;  %v2439_v57 = vcombine.high %v14184_v50, %v14183_v49  ;;  %v14186_v22 = vld [vmem:[#allocation30_spill] sm:$0xff]  ;;  %v14188_v37 = vld [vmem:[#allocation36_spill] sm:$0xff] }
 0x26b   : > { %v6690_v56 = vsel %vm4144_vm1, %v2734_v46, 0  ;;  %v2745_v41 = vpack.c.bf16 %v2729_v59, %v2661_v20  ;;  %v2524_v40 = vcombine.low %v2505_v11, %v2521_v16  ;;  %v2592_v39 = vcombine.low %v2573_v9, %v2589_v18  ;;  %v14187_v38 = vld [vmem:[#allocation38_spill] sm:$0xff]  ;;  %v14191_v54 = vld [vmem:[#allocation31_spill] sm:$0xff]  ;;  %v14193_v49 = vld [vmem:[#allocation16_spill] sm:$0xff] }
 0x26c   : > { %v1531_v19 = vpack.c.bf16 %v14186_v22, %v14185_v2  ;;  %v2369_v26 = vrot.slane %v2355_v62, %v10323_v58  ;;  %v2385_v48 = vrot.slane %v2371_v29, %v10323_v58  ;;  %v2437_v25 = vrot.slane %v2423_v27, %v10323_v58  ;;  %v14190_v62 = vld [vmem:[#allocation29_spill] sm:$0xff]  ;;  %v14192_v27 = vld [vmem:[#allocation51_spill] sm:$0xff] }
 0x26d   : > { %v2453_v3 = vrot.slane %v2439_v57, %v10323_v58  ;;  %v6788_v46 = vsel %vm4144_vm1, %v2741_v24, 0  ;;  %v2740_v20 = vpack.c.bf16 %v2592_v39, %v2524_v40  ;;  %v2525_v59 = vcombine.high %v2505_v11, %v2521_v16  ;;  %v14194_v57 = vld [vmem:[#allocation72_spill] sm:$0xff]  ;;  %v14196_v40 = vld [vmem:[#allocation19_spill] sm:$0xff]  ;;  %v14197_v11 = vld [vmem:[#allocation54_spill] sm:$0xff] }
 0x26e   : > { %9686 = vmatpush3.bf16.xpose.msra.mxu0 %v6690_v56  ;;  %v2593_v28 = vcombine.high %v2573_v9, %v2589_v18  ;;  %v14189_v44 = vpack.c.bf16 %v14187_v38, %v14188_v37  ;;  %v1535_v29 = vpack.c.bf16 %v14191_v54, %v14190_v62  ;;  %v2219_v50 = vcombine.high %v14193_v49, %v14192_v27  ;;  %v14195_v56 = vld [vmem:[#allocation17_spill] sm:$0xff]  ;;  %v14200_v38 = vld [vmem:[#allocation39_spill] sm:$0xff]  ;;  %v14203_v62 = vld [vmem:[#allocation22_spill] sm:$0xff] }
 0x26f   : > { %9867 = vmatprep.subr.msk.bf16.mxu0 %vm4144_vm1, %v2745_v41  ;;  %v2235_v24 = vcombine.high %v14195_v56, %v14194_v57  ;;  %v2287_v16 = vcombine.high %v14197_v11, %v14196_v40  ;;  %v14198_v9 = vld [vmem:[#allocation73_spill] sm:$0xff]  ;;  %v6877_v2 = vsel %vm4144_vm1, %v2745_v41, 0  ;;  %v14204_v54 = vld [vmem:[#allocation26_spill] sm:$0xff]  ;;  %v6785_v40 = vsel %vm4144_vm1, %v2740_v20, 0 }
 0x270   : > { %9672 = vmatmul.mubr.msk.bf16.vlgmr.msra.gmra.mxu1 %vm4144_vm1, %v1531_v19  ;;  %v14199_v18 = vld [vmem:[#allocation13_spill] sm:$0xff]  ;;  %v2744_v22 = vpack.c.bf16 %v2593_v28, %v2525_v59  ;;  %v2388_v19 = vcombine.low %v2369_v26, %v2385_v48  ;;  %v1538_v27 = vpack.c.bf16 %v14204_v54, %v14203_v62  ;;  %v2233_v49 = vrot.slane %v2219_v50, %v10323_v58  ;;  %v14205_v28 = vld [vmem:[#allocation44_spill] sm:$0xff]  ;;  %v14206_v57 = vld [vmem:[#allocation42_spill] sm:$0xff] }
 0x271   : > { %9675 = vmatprep.mubr.msk.bf16.mxu1 %vm4144_vm1, %v14189_v44  ;;  %9696 = vmatpush3.bf16.xpose.msra.mxu1 %v6788_v46  ;;  %v2303_v39 = vcombine.high %v14199_v18, %v14198_v9  ;;  %v2456_v46 = vcombine.low %v2437_v25, %v2453_v3  ;;  %v14201_v37 = vld [vmem:[#allocation37_spill] sm:$0xff]  ;;  %v2301_v41 = vrot.slane %v2287_v16, %v10323_v58  ;;  %v14208_v50 = vld [vmem:[#allocation23_spill] sm:$0xff] }
 0x272   : > { %9864 = vmatprep.subr.msk.bf16.mxu1 %vm4144_vm1, %v2740_v20  ;;  %v14202_v44 = vpack.c.bf16 %v14200_v38, %v14201_v37  ;;  %v14207_v56 = vpack.c.bf16 %v14205_v28, %v14206_v57  ;;  %v2389_v9 = vcombine.high %v2369_v26, %v2385_v48  ;;  %v2457_v18 = vcombine.high %v2437_v25, %v2453_v3  ;;  %v14210_v38 = vld [vmem:[#allocation45_spill] sm:$0xff]  ;;  %v14211_v37 = vld [vmem:[#allocation43_spill] sm:$0xff] }
 0x273   : > { %v2317_v59 = vrot.slane %v2303_v39, %v10323_v58  ;;  %v2739_v11 = vpack.c.bf16 %v2456_v46, %v2388_v19  ;;  %v6874_v20 = vsel %vm4144_vm1, %v2744_v22, 0  ;;  %v3894_v26 = vcombine.low %v12280_v21, %v12283_v17 }
 0x274   : > { %v2743_v19 = vpack.c.bf16 %v2457_v18, %v2389_v9  ;;  %v3910_v48 = vcombine.low %v12289_v0, %v12292_v1  ;;  %v3826_v25 = vcombine.low %v12252_v13, %v12264_v32  ;;  %v3842_v3 = vcombine.low %v12270_v47, %v12277_v30  ;;  %v12566_v9 = vpop.f32.mrf.mxu0 }
 0x275   : > { %9688 = vmatmul.mubr.msk.bf16.vlgmr.msra.gmra.mxu0 %vm4144_vm1, %v1535_v29  ;;  %v2249_v29 = vrot.slane %v2235_v24, %v10323_v58  ;;  %v14209_v24 = vld [vmem:[#allocation27_spill] sm:$0xff]  ;;  %v2320_v39 = vcombine.low %v2301_v41, %v2317_v59  ;;  %v2321_v54 = vcombine.high %v2301_v41, %v2317_v59  ;;  %v3902_v21 = vrot.slane %v3894_v26, %v10323_v58  ;;  %v14220_v26 = vld [vmem:[#allocation33_spill] sm:$0xff] }
 0x276   : > { %9691 = vmatprep.mubr.msk.bf16.mxu0 %vm4144_vm1, %v14202_v44  ;;  %9712 = vmatpush3.bf16.xpose.msra.mxu0 %v6877_v2  ;;  %v1542_v16 = vpack.c.bf16 %v14209_v24, %v14208_v50  ;;  %v14212_v44 = vpack.c.bf16 %v14210_v38, %v14211_v37  ;;  %v3918_v17 = vrot.slane %v3910_v48, %v10323_v58  ;;  %v6871_v13 = vsel %vm4144_vm1, %v2743_v19, 0  ;;  %v14215_v50 = vld [vmem:[#allocation32_spill] sm:$0xff]  ;;  %v14216_v24 = vld [vmem:[#allocation34_spill] sm:$0xff]  ;;  %v14221_v48 = vld [vmem:[#allocation35_spill] sm:$0xff] }
 0x277   : > { %9868 = vmatprep.subr.msk.bf16.mxu0 %vm4144_vm1, %v2744_v22  ;;  %v2252_v2 = vcombine.low %v2233_v49, %v2249_v29  ;;  %v6782_v22 = vsel %vm4144_vm1, %v2739_v11, 0  ;;  %v2253_v62 = vcombine.high %v2233_v49, %v2249_v29  ;;  %v3834_v0 = vrot.slane %v3826_v25, %v10323_v58  ;;  %14214 = vst [vmem:[#allocation67_spill] sm:$0xff] %v12566_v9 }
 0x278   : > { %9676 = vmatmul.mubr.msk.bf16.gmra.mxu1 %vm4144_vm1, %v14207_v56  ;;  %v3850_v1 = vrot.slane %v3842_v3, %v10323_v58  ;;  %v3926_v47 = vcombine.low %v3902_v21, %v3918_v17  ;;  %v3758_v30 = vcombine.low %v12381_v35, %v12384_v23  ;;  %v3690_v29 = vcombine.low %v12295_v55, %v12305_v53 }
 0x279   : > { %9698 = vmatpush3.bf16.xpose.msra.mxu1 %v6785_v40  ;;  %9703 = vmatprep.mubr.msk.bf16.mxu1 %vm4144_vm1, %v1538_v27  ;;  %v2738_v46 = vpack.c.bf16 %v2320_v39, %v2252_v2  ;;  %v2742_v32 = vpack.c.bf16 %v2321_v54, %v2253_v62  ;;  %v3774_v27 = vcombine.low %v12387_v61, %v12390_v33  ;;  %v12555_v33 = vpop.f32.mrf.mxu1 }
 0x27a   : > { %9865 = vmatprep.subr.msk.bf16.mxu1 %vm4144_vm1, %v2739_v11  ;;  %v3858_v49 = vcombine.low %v3834_v0, %v3850_v1  ;;  %v3706_v41 = vcombine.low %v12308_v52, %v12311_v12  ;;  %v3927_v57 = vcombine.high %v3902_v21, %v3918_v17  ;;  %v3766_v56 = vrot.slane %v3758_v30, %v10323_v58  ;;  %v14226_v30 = vld [vmem:[#allocation6_spill] sm:$0xff] }
 0x27b   : > { %v6779_v59 = vsel %vm4144_vm1, %v2738_v46, 0  ;;  %v3782_v35 = vrot.slane %v3774_v27, %v10323_v58  ;;  %v3622_v23 = vcombine.low %v12353_v60, %v12356_v4  ;;  %v3638_v61 = vcombine.low %v12359_v31, %v12366_v45  ;;  %14213 = vst [vmem:[#allocation66_spill] sm:$0xff] %v12555_v33  ;;  %v12568_v18 = vpop.f32.mrf.mxu1 }
 0x27c   : > { %v3933_v28 = vpack.c.bf16 %v3926_v47, %v3858_v49  ;;  %v3859_v55 = vcombine.high %v3834_v0, %v3850_v1  ;;  %v3698_v53 = vrot.slane %v3690_v29, %v10323_v58  ;;  %v3714_v52 = vrot.slane %v3706_v41, %v10323_v58  ;;  %v14225_v47 = vld [vmem:[#allocation48_spill] sm:$0xff] }
 0x27d   : > { %9692 = vmatmul.mubr.msk.bf16.gmra.mxu0 %vm4144_vm1, %v14212_v44  ;;  %v3554_v12 = vcombine.low %v12316_v6, %v12322_v34  ;;  %v3570_v40 = vcombine.low %v12325_v51, %v12345_v5  ;;  %v6868_v11 = vsel %vm4144_vm1, %v2742_v32, 0  ;;  %v3790_v4 = vcombine.low %v3766_v56, %v3782_v35  ;;  %v14218_v51 = vld [vmem:[#allocation46_spill] sm:$0xff] }
 0x27e   : > { %9714 = vmatpush3.bf16.xpose.msra.mxu0 %v6874_v20  ;;  %9719 = vmatprep.mubr.msk.bf16.mxu0 %vm4144_vm1, %v1542_v16  ;;  %v3937_v60 = vpack.c.bf16 %v3927_v57, %v3859_v55  ;;  %v3630_v31 = vrot.slane %v3622_v23, %v10323_v58  ;;  %v3646_v45 = vrot.slane %v3638_v61, %v10323_v58  ;;  %v14217_v16 = vld [vmem:[#allocation40_spill] sm:$0xff]  ;;  %v12578_v20 = vpop.f32.mrf.mxu0 }
 0x27f   : > { %9869 = vmatprep.subr.msk.bf16.mxu0 %vm4144_vm1, %v2743_v19  ;;  %v1539_v6 = vpack.c.bf16 %v14216_v24, %v14215_v50  ;;  %v3722_v34 = vcombine.low %v3698_v53, %v3714_v52  ;;  %v1540_v5 = vpack.c.bf16 %v14218_v51, %v14217_v16  ;;  %v3562_v2 = vrot.slane %v3554_v12, %v10323_v58  ;;  %v12580_v19 = vpop.f32.mrf.mxu1 }
 0x280   : > { %v3578_v39 = vrot.slane %v3570_v40, %v10323_v58  ;;  %v3791_v37 = vcombine.high %v3766_v56, %v3782_v35  ;;  %v3654_v44 = vcombine.low %v3630_v31, %v3646_v45  ;;  %14219 = vst [vmem:[#allocation68_spill] sm:$0xff] %v12580_v19  ;;  %v1543_v25 = vpack.c.bf16 %v14221_v48, %v14220_v26  ;;  %v12588_v1 = vpop.f32.mrf.mxu0 }
 0x281   : > { %9700 = vmatpush3.bf16.xpose.msra.mxu1 %v6782_v22  ;;  %v3932_v38 = vpack.c.bf16 %v3790_v4, %v3722_v34  ;;  %v3723_v3 = vcombine.high %v3698_v53, %v3714_v52  ;;  %v14222_v22 = vld [vmem:[#allocation41_spill] sm:$0xff]  ;;  %v3655_v17 = vcombine.high %v3630_v31, %v3646_v45  ;;  %14224 = vst [vmem:[#allocation14_spill] sm:$0xff] %v12588_v1 }
 0x282   : > { %9866 = vmatprep.subr.msk.bf16.mxu1 %vm4144_vm1, %v2738_v46  ;;  %v14223_v46 = vld [vmem:[#allocation47_spill] sm:$0xff]  ;;  %v3586_v54 = vcombine.low %v3562_v2, %v3578_v39  ;;  %v1541_v27 = vpack.c.bf16 %v14226_v30, %v14225_v47  ;;  %v12597_v41 = vpop.f32.mrf.mxu0 }
 0x283   : > { %v1544_v62 = vpack.c.bf16 %v14223_v46, %v14222_v22  ;;  %v3936_v21 = vpack.c.bf16 %v3791_v37, %v3723_v3 }
 0x284   : > { %v3931_v0 = vpack.c.bf16 %v3654_v44, %v3586_v54  ;;  %v12601_v56 = vpop.f32.mrf.mxu0 }
 0x285   : > { %14230 = vst [vmem:[#allocation20_spill] sm:$0xff] %v12601_v56 }
 0x286   : > { %9716 = vmatpush3.bf16.xpose.msra.mxu0 %v6871_v13  ;;  %v12590_v13 = vpop.f32.mrf.mxu1  ;;  %v12606_v23 = vpop.f32.mrf.mxu0 }
 0x287   : > { %9870 = vmatprep.subr.msk.bf16.mxu0 %vm4144_vm1, %v2742_v32  ;;  %v3587_v32 = vcombine.high %v3562_v2, %v3578_v39 }
 0x288   : > { %v12594_v49 = vpop.f32.mrf.mxu1  ;;  %v12610_v55 = vpop.f32.mrf.mxu0 }
 0x289   : > { %9702 = vmatpush3.bf16.xpose.msra.mxu1 %v6779_v59  ;;  %14227 = vst [vmem:[#allocation24_spill] sm:$0xff] %v12594_v49  ;;  %v3935_v29 = vpack.c.bf16 %v3655_v17, %v3587_v32  ;;  %v14228_v59 = vld [vmem:[#allocation49_spill] sm:$0xff]  ;;  %14232 = vst [vmem:[#allocation7_spill] sm:$0xff] %v12610_v55 }
 0x28a   : > { %9727 = vmatprep.subr.bf16.mxu1 %v3933_v28  ;;  %v12603_v35 = vpop.f32.mrf.mxu1  ;;  %v12616_v12 = vpop.f32.mrf.mxu0 }
 0x28c   : > { %v12608_v61 = vpop.f32.mrf.mxu1  ;;  %v12618_v40 = vpop.f32.mrf.mxu0 }
 0x28d   : > { %14231 = vst [vmem:[#allocation5_spill] sm:$0xff] %v12608_v61  ;;  %14234 = vst [vmem:[#allocation21_spill] sm:$0xff] %v12618_v40 }
 0x28e   : > { %9718 = vmatpush3.bf16.xpose.msra.mxu0 %v6868_v11  ;;  %v12612_v53 = vpop.f32.mrf.mxu1 }
 0x28f   : > { %9743 = vmatprep.subr.bf16.mxu0 %v3937_v60 }
 0x290   : > { %9704 = vmatmul.mubr.msk.bf16.vlgmr.msra.gmra.mxu1 %vm4144_vm1, %v1539_v6  ;;  %v12614_v52 = vpop.f32.mrf.mxu1 }
 0x291   : > { %9707 = vmatprep.mubr.msk.bf16.mxu1 %vm4144_vm1, %v1540_v5  ;;  %9728 = vmatpush3.bf16.msra.mxu1 %v3933_v28  ;;  %v14229_v28 = vld [vmem:[#allocation50_spill] sm:$0xff]  ;;  %14233 = vst [vmem:[#allocation25_spill] sm:$0xff] %v12614_v52 }
 0x292   : > { %9729 = vmatprep.subr.bf16.mxu1 %v3932_v38  ;;  %v1545_v57 = vpack.c.bf16 %v14229_v28, %v14228_v59  ;;  %v12620_v11 = vpop.f32.mrf.mxu1 }
 0x294   : > { %v12624_v4 = vpop.f32.mrf.mxu1 }
 0x295   : > { %9720 = vmatmul.mubr.msk.bf16.vlgmr.msra.gmra.mxu0 %vm4144_vm1, %v1543_v25  ;;  %9730 = vmatpush3.bf16.msra.mxu1 %v3932_v38  ;;  %14236 = vst [vmem:[#allocation2_spill] sm:$0xff] %v12624_v4 }
 0x296   : > { %9723 = vmatprep.mubr.msk.bf16.mxu0 %vm4144_vm1, %v1544_v62  ;;  %9744 = vmatpush3.bf16.msra.mxu0 %v3937_v60  ;;  %v12622_v60 = vpop.f32.mrf.mxu0  ;;  %v12628_v45 = vpop.f32.mrf.mxu1 }
 0x297   : > { %9745 = vmatprep.subr.bf16.mxu0 %v3936_v21  ;;  %9731 = vmatprep.subr.bf16.mxu1 %v3931_v0  ;;  %14235 = vst [vmem:[#allocation18_spill] sm:$0xff] %v12622_v60  ;;  %14238 = vst [vmem:[#allocation4_spill] sm:$0xff] %v12628_v45 }
 0x298   : > { %9708 = vmatmul.mubr.msk.bf16.gmra.mxu1 %vm4144_vm1, %v1541_v27  ;;  %v12626_v31 = vpop.f32.mrf.mxu0  ;;  %v12630_v50 = vpop.f32.mrf.mxu1 }
 0x299   : > { %9732 = vmatpush3.bf16.msra.mxu1 %v3931_v0  ;;  %14237 = vst [vmem:[#allocation69_spill] sm:$0xff] %v12626_v31  ;;  %14239 = vst [vmem:[#allocation71_spill] sm:$0xff] %v12630_v50 }
 0x29a   : > { %9746 = vmatpush3.bf16.msra.mxu0 %v3936_v21  ;;  %v12632_v24 = vpop.f32.mrf.mxu0  ;;  %v12636_v34 = vpop.f32.mrf.mxu1 }
 0x29b   : > { %9747 = vmatprep.subr.bf16.mxu0 %v3935_v29  ;;  %14240 = vst [vmem:[#allocation70_spill] sm:$0xff] %v12632_v24 }
 0x29c   : > { %v12634_v6 = vpop.f32.mrf.mxu0  ;;  %v12640_v51 = vpop.f32.mrf.mxu1 }
 0x29d   : > { %9724 = vmatmul.mubr.msk.bf16.gmra.mxu0 %vm4144_vm1, %v1545_v57  ;;  %14241 = vst [vmem:[#allocation55_spill] sm:$0xff] %v12634_v6  ;;  %14243 = vst [vmem:[#allocation52_spill] sm:$0xff] %v12640_v51 }
 0x29e   : > { %9748 = vmatpush3.bf16.msra.mxu0 %v3935_v29  ;;  %v12638_v16 = vpop.f32.mrf.mxu0  ;;  %v12644_v2 = vpop.f32.mrf.mxu1 }
 0x29f   : > { %14242 = vst [vmem:[#allocation53_spill] sm:$0xff] %v12638_v16 }
 0x2a0   : > { %v12642_v5 = vpop.f32.mrf.mxu0 }
 0x2a1   : > { %14244 = vst [vmem:[#allocation58_spill] sm:$0xff] %v12642_v5 }
 0x2a2   : > { %v12648_v38 = vpop.f32.mrf.mxu0 }
 0x2a3   : > { %14245 = vst [vmem:[#allocation57_spill] sm:$0xff] %v12648_v38 }
 0x2b0   : > { %v12646_v39 = vpop.f32.mrf.mxu1 }
 0x2b2   : > { %v12652_v44 = vpop.f32.mrf.mxu1 }
 0x2b4   : > { %v12650_v37 = vpop.f32.mrf.mxu0  ;;  %v12656_v48 = vpop.f32.mrf.mxu1 }
 0x2b6   : > { %v12654_v26 = vpop.f32.mrf.mxu0  ;;  %v12660_v3 = vpop.f32.mrf.mxu1 }
 0x2b8   : > { %v12658_v25 = vpop.f32.mrf.mxu0 }
 0x2b9   : > { %14246 = vst [vmem:[#allocation60_spill] sm:$0xff] %v12658_v25 }
 0x2ba   : > { %v12666_v62 = vpop.f32.mrf.mxu0 }
 0x2d0   : > { %v12662_v22 = vpop.f32.mrf.mxu1 }
 0x2d1   : > { %v6284_v46 = vcombine.high %v12646_v39, %v12662_v22 }
 0x2d2   : > { %v5531_v54 = vpop.f32.mrf.mxu1 }
 0x2d3   : > { %v12673_v0 = vrot.slane %v6284_v46, %v10299_v43 }
 0x2d4   : > { %v12668_v21 = vpop.f32.mrf.mxu0  ;;  %v12670_v17 = vpop.f32.mrf.mxu1 }
 0x2d5   : > { %14247 = vst [vmem:[#allocation59_spill] sm:$0xff] %v12673_v0  ;;  %v6300_v32 = vcombine.high %v12650_v37, %v12668_v21  ;;  %v6420_v30 = vcombine.high %v12656_v48, %v12670_v17 }
 0x2d6   : > { %v5624_v47 = vpop.f32.mrf.mxu0  ;;  %v12700_v63 = vpop.f32.mrf.mxu1 }
 0x2d7   : > { %v12680_v27 = vrot.slane %v6300_v32, %v10299_v43  ;;  %v12691_v46 = vrot.slane %v6420_v30, %v10299_v43  ;;  %v6147_v56 = vcombine.low %v12660_v3, %v12700_v63  ;;  %v6028_v60 = vcombine.high %v12654_v26, %v5624_v47 }
 0x2d8   : > { %v12682_v29 = vpop.f32.mrf.mxu0 }
 0x2d9   : > { %14248 = vst [vmem:[#allocation63_spill] sm:$0xff] %v12680_v27  ;;  %v6436_v57 = vcombine.high %v12658_v25, %v12682_v29  ;;  %14249 = vst [vmem:[#allocation62_spill] sm:$0xff] %v12691_v46  ;;  %v6027_v46 = vcombine.low %v12654_v26, %v5624_v47  ;;  %v6148_v26 = vcombine.high %v12660_v3, %v12700_v63 }
 0x2da   : > { %v12704_v28 = vpop.f32.mrf.mxu0 }
 0x2db   : > { %v12694_v14 = vrot.slane %v6436_v57, %v10299_v43  ;;  %v6035_v9 = vrot.slane %v6027_v46, %v10299_v43  ;;  %v6163_v61 = vcombine.low %v12666_v62, %v12704_v28  ;;  %v6155_v46 = vrot.slane %v6147_v56, %v10299_v43 }
 0x2dc   : > { %v6164_v56 = vcombine.high %v12666_v62, %v12704_v28  ;;  %v12762_v47 = vrot.slane %v6148_v26, %v10299_v43 }
 0x2dd   : > { %14250 = vst [vmem:[#allocation28_spill] sm:$0xff] %v12694_v14  ;;  %v6011_v14 = vcombine.low %v12652_v44, %v5531_v54  ;;  %v6171_v45 = vrot.slane %v6163_v61, %v10299_v43 }
 0x2df   : > { %v6019_v0 = vrot.slane %v6011_v14, %v10299_v43 }
 0x2e1   : > { %v6076_v14 = vcombine.high %v6019_v0, %v6035_v9 }
 0x2f0   : > { %v12702_v59 = vpop.f32.mrf.mxu1 }
 0x2f2   : > { %v5717_v7 = vpop.f32.mrf.mxu1 }
 0x2f4   : > { %v12706_v42 = vpop.f32.mrf.mxu0  ;;  %v12708_v8 = vpop.f32.mrf.mxu1 }
 0x2f6   : > { %v5810_v30 = vpop.f32.mrf.mxu0  ;;  %v12712_v10 = vpop.f32.mrf.mxu1 }
 0x2f8   : > { %v12710_v57 = vpop.f32.mrf.mxu0 }
 0x2fa   : > { %v12716_v15 = vpop.f32.mrf.mxu0 }
 0x310   : > { %v12714_v32 = vpop.f32.mrf.mxu1 }
 0x312   : > { %v5903_v5 = vpop.f32.mrf.mxu1 }
 0x313   : > { %v6043_v31 = vcombine.low %v5717_v7, %v5903_v5  ;;  %v6044_v33 = vcombine.high %v5717_v7, %v5903_v5  ;;  %v6075_v5 = vcombine.low %v6019_v0, %v6035_v9 }
 0x314   : > { %v12720_v40 = vpop.f32.mrf.mxu1 }
 0x315   : > { %v12718_v36 = vpop.f32.mrf.mxu0  ;;  %v6051_v50 = vrot.slane %v6043_v31, %v10299_v43  ;;  %v6012_v31 = vcombine.high %v12652_v44, %v5531_v54  ;;  %v6058_v25 = vrot.slane %v6044_v33, %v10299_v43  ;;  %v6042_v54 = vrot.slane %v6028_v60, %v10299_v43 }
 0x316   : > { %v5906_v52 = vpop.f32.mrf.mxu1  ;;  %v6212_v33 = vcombine.high %v6155_v46, %v6171_v45  ;;  %v6283_v60 = vcombine.low %v12646_v39, %v12662_v22 }
 0x317   : > { %v5996_v4 = vpop.f32.mrf.mxu0  ;;  %v6179_v19 = vcombine.low %v12712_v10, %v5906_v52  ;;  %v6180_v0 = vcombine.high %v12712_v10, %v5906_v52  ;;  %v12772_v10 = vrot.slane %v6164_v56, %v10299_v43 }
 0x318   : > { %v6059_v6 = vcombine.low %v5810_v30, %v5996_v4  ;;  %v6060_v49 = vcombine.high %v5810_v30, %v5996_v4  ;;  %v6026_v4 = vrot.slane %v6012_v31, %v10299_v43 }
 0x319   : > { %v12722_v51 = vpop.f32.mrf.mxu0  ;;  %v12779_v22 = vrot.slane %v6180_v0, %v10299_v43  ;;  %v6227_v26 = vcombine.low %v12762_v47, %v12772_v10 }
 0x31a   : > { %v6067_v55 = vrot.slane %v6059_v6, %v10299_v43  ;;  %v6187_v6 = vrot.slane %v6179_v19, %v10299_v43  ;;  %v6074_v7 = vrot.slane %v6060_v49, %v10299_v43  ;;  %v6090_v49 = vrot.slane %v6076_v14, %v10323_v58  ;;  %v12789_v14 = vld [vmem:[%s233_s29] ss:$0 sm:$0xff] }
 0x31b   : > { %v5999_v1 = vpop.f32.mrf.mxu0  ;;  %v6091_v62 = vcombine.low %v6026_v4, %v6042_v54 }
 0x31c   : > { %v6195_v27 = vcombine.low %v12716_v15, %v5999_v1  ;;  %v6108_v24 = vcombine.high %v6051_v50, %v6067_v55  ;;  %v6107_v16 = vcombine.low %v6051_v50, %v6067_v55  ;;  %v6211_v55 = vcombine.low %v6155_v46, %v6171_v45 }
 0x31d   : > { %v6124_v9 = vcombine.high %v6058_v25, %v6074_v7  ;;  %v6092_v45 = vcombine.high %v6026_v4, %v6042_v54  ;;  %v6123_v39 = vcombine.low %v6058_v25, %v6074_v7  ;;  %v12792_v46 = vrot.slane %v6283_v60, %v10299_v43 }
 0x31e   : > { %v6203_v38 = vrot.slane %v6195_v27, %v10299_v43  ;;  %v6122_v19 = vrot.slane %v6108_v24, %v10323_v58  ;;  %v6115_v50 = vrot.slane %v6107_v16, %v10323_v58  ;;  %v6196_v24 = vcombine.high %v12716_v15, %v5999_v1 }
 0x31f   : > { %v6226_v15 = vrot.slane %v6212_v33, %v10323_v58  ;;  %v12776_v52 = vrot.slane %v6211_v55, %v10323_v58  ;;  %v12785_v28 = vrot.slane %v6124_v9, %v10323_v58  ;;  %v12803_v54 = vrot.slane %v6091_v62, %v10323_v58 }
 0x320   : > { %v6244_v44 = vcombine.high %v6187_v6, %v6203_v38  ;;  %v6243_v61 = vcombine.low %v6187_v6, %v6203_v38  ;;  %v6141_v63 = vcombine.low %v6090_v49, %v6122_v19  ;;  %v6083_v38 = vrot.slane %v6075_v5, %v10323_v58 }
 0x321   : > { %v12782_v27 = vrot.slane %v6196_v24, %v10299_v43  ;;  %v6142_v6 = vcombine.high %v6090_v49, %v6122_v19  ;;  %v12797_v5 = vrot.slane %v6092_v45, %v10323_v58  ;;  %v12812_v33 = vrot.slane %v6123_v39, %v10323_v58 }
 0x322   : > { %v12758_v3 = vrot.slane %v6244_v44, %v10323_v58  ;;  %v12765_v16 = vrot.slane %v6243_v61, %v10323_v58  ;;  %v6139_v1 = vcombine.low %v6083_v38, %v6115_v50  ;;  %v6557_v30 = vadd.f32 %v6141_v63, %v12603_v35 }
 0x323   : > { %v6140_v4 = vcombine.high %v6083_v38, %v6115_v50  ;;  %v6299_v35 = vcombine.low %v12650_v37, %v12668_v21  ;;  %v6260_v56 = vcombine.high %v12779_v22, %v12782_v27  ;;  %v6145_v55 = vcombine.low %v12797_v5, %v12785_v28 }
 0x324   : > { %v6277_v31 = vcombine.low %v6226_v15, %v12758_v3  ;;  %v6275_v7 = vcombine.low %v12776_v52, %v12765_v16  ;;  %v6555_v19 = vadd.f32 %v6139_v1, %v12568_v18  ;;  %v6558_v18 = vadd.f32 %v6142_v6, %v12606_v23 }
 0x325   : > { %v6228_v50 = vcombine.high %v12762_v47, %v12772_v10  ;;  %v6278_v60 = vcombine.high %v6226_v15, %v12758_v3  ;;  %v6556_v63 = vadd.f32 %v6140_v4, %v12578_v20  ;;  %v6259_v45 = vcombine.low %v12779_v22, %v12782_v27 }
 0x326   : > { %v6565_v37 = vadd.f32 %v6277_v31, %v12612_v53  ;;  %v6563_v0 = vadd.f32 %v6275_v7, %v12590_v13  ;;  %v6561_v13 = vadd.f32 %v6145_v55, %v12636_v34  ;;  %v12833_v3 = vrot.slane %v6260_v56, %v10323_v58 }
 0x327   : > { %v6143_v20 = vcombine.low %v12803_v54, %v12812_v33  ;;  %v6315_v22 = vcombine.low %v12702_v59, %v12714_v32  ;;  %v6276_v34 = vcombine.high %v12776_v52, %v12765_v16  ;;  %v12847_v6 = vrot.slane %v6228_v50, %v10323_v58 }
 0x328   : > { %v6566_v7 = vadd.f32 %v6278_v60, %v12616_v12  ;;  %v6419_v16 = vcombine.low %v12656_v48, %v12670_v17  ;;  %v6331_v52 = vcombine.low %v12706_v42, %v12718_v36  ;;  %v12865_v12 = vrot.slane %v6259_v45, %v10323_v58 }
 0x329   : > { %v6307_v17 = vrot.slane %v6299_v35, %v10299_v43  ;;  %v12875_v50 = vrot.slane %v6315_v22, %v10299_v43 }
 0x32a   : > { %v6339_v35 = vrot.slane %v6331_v52, %v10299_v43 }
 0x330   : > { %v9673_v25 = vpop.f32.mrf.mxu1 }
 0x331   : > { %v6655_v44 = vadd.f32 %v9673_v25, %v6557_v30 }
 0x332   : > { %v6646_v61 = vpop.f32.mrf.mxu1 }
 0x333   : > { %v6647_v21 = vadd.f32 %v6646_v61, %v6555_v19  ;;  %v12817_v49 = vadd.f32 %v12789_v14, %v6655_v44  ;;  %v6281_v61 = vcombine.low %v12847_v6, %v12833_v3 }
 0x334   : > { %v9674_v24 = vpop.f32.mrf.mxu1 }
 0x335   : > { %v9689_v9 = vpop.f32.mrf.mxu0  ;;  %v6658_v62 = vadd.f32 %v9674_v24, %v6558_v18  ;;  %v6989_v53 = vsel %vm6982_vm2, %v12817_v49, -inf  ;;  %v12827_v23 = vadd.f32 %v12789_v14, %v6647_v21  ;;  %v6559_v21 = vadd.f32 %v6143_v20, %v12620_v11 }
 0x336   : > { %v6744_v38 = vadd.f32 %v9689_v9, %v6565_v37  ;;  %v6649_v10 = vpop.f32.mrf.mxu1  ;;  %6990 = vmax.xlane.f32.xlu1 %v6989_v53  ;;  %v6564_v9 = vadd.f32 %v6276_v34, %v12597_v41  ;;  %v6146_v11 = vcombine.high %v12797_v5, %v12785_v28  ;;  %v6467_v41 = vcombine.low %v12710_v57, %v12722_v51 }
 0x337   : > { %v6735_v47 = vpop.f32.mrf.mxu0  ;;  %v6650_v1 = vadd.f32 %v6649_v10, %v6556_v63  ;;  %v6983_v39 = vsel %vm6982_vm2, %v12827_v23, -inf  ;;  %v12850_v25 = vadd.f32 %v12789_v14, %v6658_v62  ;;  %v14251_v10 = vld [vmem:[#allocation60_spill] sm:$0xff]  ;;  %v6347_v34 = vcombine.low %v12792_v46, %v6307_v17 }
 0x338   : > { %v6736_v15 = vadd.f32 %v6735_v47, %v6563_v0  ;;  %v12840_v30 = vadd.f32 %v12789_v14, %v6744_v38  ;;  %v9677_v31 = vpop.f32.mrf.mxu1  ;;  %6984 = vmax.xlane.f32.xlu0 %v6983_v39  ;;  %v12879_v0 = vrot.slane %v6227_v26, %v10323_v58  ;;  %v6451_v38 = vcombine.low %v12708_v8, %v12720_v40  ;;  %v14252_v39 = vld [vmem:[#allocation53_spill] sm:$0xff] }
 0x339   : > { %v9690_v27 = vpop.f32.mrf.mxu0  ;;  %v6671_v4 = vadd.f32 %v9677_v31, %v6561_v13  ;;  %v12856_v19 = vadd.f32 %v12789_v14, %v6650_v1  ;;  %v6992_v18 = vsel %vm6982_vm2, %v12850_v25, -inf  ;;  %v6569_v26 = vadd.f32 %v6281_v61, %v12644_v2 }
 0x33a   : > { %v7013_v44 = vsel %vm6982_vm2, %v12840_v30, -inf  ;;  %v6662_v55 = vpop.f32.mrf.mxu1  ;;  %v6747_v37 = vadd.f32 %v9690_v27, %v6566_v7  ;;  %v12871_v48 = vadd.f32 %v12789_v14, %v6736_v15  ;;  %v6279_v28 = vcombine.low %v12879_v0, %v12865_v12 }
 0x33b   : > { %v6738_v56 = vpop.f32.mrf.mxu0  ;;  %7014 = vmax.xlane.f32.xlu1 %v7013_v44  ;;  %v6663_v24 = vadd.f32 %v6662_v55, %v6559_v21  ;;  %v6986_v60 = vsel %vm6982_vm2, %v12856_v19, -inf  ;;  %v12886_v63 = vadd.f32 %v12789_v14, %v6671_v4  ;;  %v12902_v47 = vrot.slane %v6419_v16, %v10299_v43 }
 0x33c   : > { %6993 = vmax.xlane.f32.xlu0 %v6992_v18  ;;  %v6739_v53 = vadd.f32 %v6738_v56, %v6564_v9  ;;  %v7007_v5 = vsel %vm6982_vm2, %v12871_v48, -inf  ;;  %v12899_v45 = vadd.f32 %v12789_v14, %v6747_v37  ;;  %v6435_v13 = vcombine.low %v14251_v10, %v12682_v29  ;;  %v9678_v20 = vpop.f32.mrf.mxu1 }
 0x33d   : > { %v9693_v62 = vpop.f32.mrf.mxu0  ;;  %v6144_v2 = vcombine.high %v12803_v54, %v12812_v33  ;;  %v12909_v1 = vadd.f32 %v12789_v14, %v6663_v24  ;;  %v6562_v22 = vadd.f32 %v6146_v11, %v14252_v39  ;;  %v7001_v27 = vsel %vm6982_vm2, %v12886_v63, -inf  ;;  %v14253_v54 = vld [vmem:[#allocation4_spill] sm:$0xff]  ;;  %v14254_v24 = vld [vmem:[#allocation18_spill] sm:$0xff] }
 0x33e   : > { %v6760_v15 = vadd.f32 %v9693_v62, %v6569_v26  ;;  %v6380_v31 = vcombine.high %v12875_v50, %v6339_v35  ;;  %v6459_v29 = vrot.slane %v6451_v38, %v10299_v43  ;;  %v6475_v7 = vrot.slane %v6467_v41, %v10299_v43  ;;  %v6665_v21 = vpop.f32.mrf.mxu1  ;;  %v14255_v62 = vld [vmem:[#allocation57_spill] sm:$0xff] }
 0x33f   : > { %6987 = vmax.xlane.f32.xlu1 %v6986_v60  ;;  %v6751_v4 = vpop.f32.mrf.mxu0  ;;  %v6567_v33 = vadd.f32 %v6279_v28, %v14253_v54  ;;  %v6674_v44 = vadd.f32 %v9678_v20, %v6562_v22  ;;  %v7016_v16 = vsel %vm6982_vm2, %v12899_v45, -inf  ;;  %v12922_v52 = vadd.f32 %v12789_v14, %v6739_v53 }
 0x340   : > { %7008 = vmax.xlane.f32.xlu0 %v7007_v5  ;;  %v6348_v56 = vcombine.high %v12792_v46, %v6307_v17  ;;  %v6443_v61 = vrot.slane %v6435_v13, %v10299_v43  ;;  %v6379_v55 = vcombine.low %v12875_v50, %v6339_v35  ;;  %v6282_v37 = vcombine.high %v12847_v6, %v12833_v3 }
 0x341   : > { %v12930_v18 = vadd.f32 %v12789_v14, %v6760_v15  ;;  %v6752_v9 = vadd.f32 %v6751_v4, %v6567_v33  ;;  %v6560_v11 = vadd.f32 %v6144_v2, %v14254_v24  ;;  %v6995_v60 = vsel %vm6982_vm2, %v12909_v1, -inf  ;;  %v9694_v26 = vpop.f32.mrf.mxu0 }
 0x342   : > { %v6316_v46 = vcombine.high %v12702_v59, %v12714_v32  ;;  %v6332_v17 = vcombine.high %v12706_v42, %v12718_v36  ;;  %v6516_v50 = vcombine.high %v6459_v29, %v6475_v7  ;;  %v7010_v6 = vsel %vm6982_vm2, %v12922_v52, -inf }
 0x343   : > { %7002 = vmax.xlane.f32.xlu1 %v7001_v27  ;;  %v6666_v3 = vadd.f32 %v6665_v21, %v6560_v11  ;;  %v12942_v35 = vadd.f32 %v12789_v14, %v6674_v44  ;;  %v6394_v38 = vrot.slane %v6380_v31, %v10323_v58  ;;  %v6484_v41 = vcombine.high %v12902_v47, %v6443_v61  ;;  %v6754_v31 = vpop.f32.mrf.mxu0 }
 0x344   : > { %7017 = vmax.xlane.f32.xlu0 %v7016_v16  ;;  %v6280_v59 = vcombine.high %v12879_v0, %v12865_v12  ;;  %v6362_v42 = vrot.slane %v6348_v56, %v10323_v58  ;;  %v6355_v36 = vrot.slane %v6347_v34, %v10323_v58  ;;  %v12951_v32 = vadd.f32 %v12789_v14, %v6752_v9 }
 0x345   : > { %v6570_v53 = vadd.f32 %v6282_v37, %v14255_v62  ;;  %v7025_v28 = vsel %vm6982_vm2, %v12930_v18, -inf  ;;  %v6387_v5 = vrot.slane %v6379_v55, %v10323_v58  ;;  %v12958_v10 = vrot.slane %v6316_v46, %v10299_v43  ;;  %v14258_v46 = vld [vmem:[#allocation66_spill] sm:$0xff] }
 0x346   : > { %v12961_v12 = vrot.slane %v6332_v17, %v10299_v43  ;;  %v6515_v0 = vcombine.low %v6459_v29, %v6475_v7  ;;  %v12964_v13 = vrot.slane %v6516_v50, %v10323_v58  ;;  %v7004_v2 = vsel %vm6982_vm2, %v12942_v35, -inf  ;;  %v14256_v7 = vld [vmem:[#allocation70_spill] sm:$0xff]  ;;  %v14259_v50 = vld [vmem:[#allocation5_spill] sm:$0xff] }
 0x347   : > { %6996 = vmax.xlane.f32.xlu1 %v6995_v60  ;;  %v6763_v20 = vadd.f32 %v9694_v26, %v6570_v53  ;;  %v6413_v15 = vcombine.low %v6362_v42, %v6394_v38  ;;  %v12969_v39 = vadd.f32 %v12789_v14, %v6666_v3  ;;  %v6483_v22 = vcombine.low %v12902_v47, %v6443_v61 }
 0x348   : > { %7011 = vmax.xlane.f32.xlu0 %v7010_v6  ;;  %v6452_v27 = vcombine.high %v12708_v8, %v12720_v40  ;;  %v6468_v34 = vcombine.high %v12710_v57, %v12722_v51  ;;  %v6498_v29 = vrot.slane %v6484_v41, %v10323_v58  ;;  %v6568_v4 = vadd.f32 %v6280_v59, %v14256_v7  ;;  %v14257_v57 = vld [vmem:[#allocation24_spill] sm:$0xff] }
 0x349   : > { %v7019_v54 = vsel %vm6982_vm2, %v12951_v32, -inf  ;;  %v6411_v33 = vcombine.low %v6355_v36, %v6387_v5  ;;  %v6396_v44 = vcombine.high %v12958_v10, %v12961_v12  ;;  %v12984_v8 = vrot.slane %v6515_v0, %v10323_v58  ;;  %v14260_v41 = vld [vmem:[#allocation20_spill] sm:$0xff]  ;;  %v14261_v0 = vld [vmem:[#allocation67_spill] sm:$0xff] }
 0x34a   : > { %v6549_v47 = vcombine.low %v6498_v29, %v12964_v13  ;;  %v6414_v40 = vcombine.high %v6362_v42, %v6394_v38  ;;  %v6755_v51 = vadd.f32 %v6754_v31, %v6568_v4  ;;  %v6573_v16 = vadd.f32 %v14257_v57, %v6413_v15  ;;  %v14263_v15 = vld [vmem:[#allocation63_spill] sm:$0xff] }
 0x34b   : > { %7026 = vmax.xlane.f32.xlu1 %v7025_v28  ;;  %v6998_v56 = vsel %vm6982_vm2, %v12969_v39, -inf  ;;  %v12990_v61 = vadd.f32 %v12789_v14, %v6763_v20  ;;  %v6466_v55 = vrot.slane %v6452_v27, %v10299_v43  ;;  %v6482_v37 = vrot.slane %v6468_v34, %v10299_v43 }
 0x34c   : > { %7005 = vmax.xlane.f32.xlu0 %v7004_v2  ;;  %v6491_v9 = vrot.slane %v6483_v22, %v10323_v58  ;;  %v6412_v24 = vcombine.high %v6355_v36, %v6387_v5  ;;  %v6395_v11 = vcombine.low %v12958_v10, %v12961_v12  ;;  %v6571_v17 = vadd.f32 %v14258_v46, %v6411_v33  ;;  %v14262_v2 = vld [vmem:[#allocation59_spill] sm:$0xff]  ;;  %v14265_v33 = vld [vmem:[#allocation68_spill] sm:$0xff] }
 0x34d   : > { %v6581_v3 = vadd.f32 %v14259_v50, %v6549_v47  ;;  %v6574_v26 = vadd.f32 %v14260_v41, %v6414_v40  ;;  %v13002_v59 = vrot.slane %v6396_v44, %v10323_v58  ;;  %v13005_v42 = vadd.f32 %v12789_v14, %v6755_v51 }
 0x34e   : > { %v6547_v38 = vcombine.low %v6491_v9, %v12984_v8  ;;  %v7028_v53 = vsel %vm6982_vm2, %v12990_v61, -inf  ;;  %v6531_v28 = vcombine.low %v6466_v55, %v6482_v37  ;;  %v6550_v12 = vcombine.high %v6498_v29, %v12964_v13 }
 0x34f   : > { %7020 = vmax.xlane.f32.xlu1 %v7019_v54  ;;  %v6572_v20 = vadd.f32 %v14261_v0, %v6412_v24  ;;  %v14264_v22 = vcombine.high %v14262_v2, %v14263_v15  ;;  %v6532_v54 = vcombine.high %v6466_v55, %v6482_v37  ;;  %v7022_v57 = vsel %vm6982_vm2, %v13005_v42, -inf  ;;  %v14272_v0 = vld [vmem:[#allocation14_spill] sm:$0xff] }
 0x350   : > { %v9705_v21 = vpop.f32.mrf.mxu1  ;;  %6999 = vmax.xlane.f32.xlu0 %v6998_v56  ;;  %v6579_v44 = vadd.f32 %v14265_v33, %v6547_v38  ;;  %v14266_v56 = vld [vmem:[#allocation7_spill] sm:$0xff]  ;;  %v6548_v55 = vcombine.high %v6491_v9, %v12984_v8  ;;  %v14269_v9 = vld [vmem:[#allocation62_spill] sm:$0xff] }
 0x351   : > { %v6833_v60 = vadd.f32 %v9705_v21, %v6573_v16  ;;  %v6378_v27 = vrot.slane %v14264_v22, %v10323_v58  ;;  %v6403_v16 = vrot.slane %v6395_v11, %v10323_v58  ;;  %v6582_v21 = vadd.f32 %v14266_v56, %v6550_v12  ;;  %v14268_v38 = vld [vmem:[#allocation71_spill] sm:$0xff] }
 0x352   : > { %v6824_v6 = vpop.f32.mrf.mxu1  ;;  %v6546_v8 = vrot.slane %v6532_v54, %v10323_v58 }
 0x353   : > { %v13008_v36 = vadd.f32 %v12789_v14, %v6833_v60  ;;  %v6825_v62 = vadd.f32 %v6824_v6, %v6571_v17  ;;  %v6417_v47 = vcombine.low %v6378_v27, %v13002_v59  ;;  %v14267_v60 = vcombine.low %v14262_v2, %v14263_v15 }
 0x354   : > { %v9706_v10 = vpop.f32.mrf.mxu1  ;;  %7029 = vmax.xlane.f32.xlu0 %v7028_v53 }
 0x355   : > { %v9721_v5 = vpop.f32.mrf.mxu0  ;;  %v13019_v31 = vadd.f32 %v12789_v14, %v6825_v62  ;;  %v6836_v7 = vadd.f32 %v9706_v10, %v6574_v26  ;;  %v7037_v4 = vsel %vm6982_vm2, %v13008_v36, -inf  ;;  %v6371_v46 = vrot.slane %v14267_v60, %v10323_v58  ;;  %v14270_v26 = vld [vmem:[#allocation28_spill] sm:$0xff] }
 0x356   : > { %v6922_v34 = vadd.f32 %v9721_v5, %v6581_v3  ;;  %v6827_v29 = vpop.f32.mrf.mxu1  ;;  %7038 = vmax.xlane.f32.xlu1 %v7037_v4  ;;  %v6539_v3 = vrot.slane %v6531_v28, %v10323_v58  ;;  %v6577_v41 = vadd.f32 %v14268_v38, %v6417_v47  ;;  %v14271_v62 = vcombine.low %v14269_v9, %v14270_v26 }
 0x357   : > { %v6913_v13 = vpop.f32.mrf.mxu0  ;;  %v13026_v40 = vadd.f32 %v12789_v14, %v6836_v7  ;;  %v6828_v51 = vadd.f32 %v6827_v29, %v6572_v20  ;;  %v7031_v11 = vsel %vm6982_vm2, %v13019_v31, -inf  ;;  %v6415_v12 = vcombine.low %v6371_v46, %v6403_v16 }
 0x358   : > { %v9709_v37 = vpop.f32.mrf.mxu1  ;;  %7023 = vmax.xlane.f32.xlu0 %v7022_v57  ;;  %v13038_v17 = vadd.f32 %v12789_v14, %v6922_v34  ;;  %v6914_v50 = vadd.f32 %v6913_v13, %v6579_v44  ;;  %v6507_v53 = vrot.slane %v14271_v62, %v10323_v58  ;;  %v6580_v20 = vadd.f32 %v14272_v0, %v6548_v55  ;;  %v14274_v57 = vld [vmem:[#allocation25_spill] sm:$0xff] }
 0x359   : > { %v9722_v24 = vpop.f32.mrf.mxu0  ;;  %v13050_v10 = vadd.f32 %v12789_v14, %v6828_v51  ;;  %v7040_v28 = vsel %vm6982_vm2, %v13026_v40, -inf  ;;  %v14273_v2 = vcombine.high %v14269_v9, %v14270_v26  ;;  %v6418_v7 = vcombine.high %v6378_v27, %v13002_v59  ;;  %v14275_v27 = vld [vmem:[#allocation55_spill] sm:$0xff]  ;;  %v14278_v0 = vld [vmem:[#allocation21_spill] sm:$0xff] }
 0x35a   : > { %7032 = vmax.xlane.f32.xlu1 %v7031_v11  ;;  %v6925_v5 = vadd.f32 %v9722_v24, %v6582_v21  ;;  %v6840_v34 = vpop.f32.mrf.mxu1  ;;  %v13061_v4 = vadd.f32 %v12789_v14, %v6914_v50  ;;  %v6849_v54 = vadd.f32 %v9709_v37, %v6577_v41  ;;  %v6552_v33 = vcombine.high %v6507_v53, %v6539_v3  ;;  %v14276_v11 = vld [vmem:[#allocation69_spill] sm:$0xff]  ;;  %v14277_v41 = vld [vmem:[#allocation52_spill] sm:$0xff] }
 0x35b   : > { %v6916_v6 = vpop.f32.mrf.mxu0  ;;  %v6514_v15 = vrot.slane %v14273_v2, %v10323_v58  ;;  %v7061_v44 = vsel %vm6982_vm2, %v13038_v17, -inf  ;;  %v6575_v56 = vadd.f32 %v14274_v57, %v6415_v12  ;;  %v7034_v59 = vsel %vm6982_vm2, %v13050_v10, -inf }
 0x35c   : > { %7041 = vmax.xlane.f32.xlu0 %v7040_v28  ;;  %v13066_v47 = vadd.f32 %v12789_v14, %v6925_v5  ;;  %v6917_v51 = vadd.f32 %v6916_v6, %v6580_v20  ;;  %v6578_v21 = vadd.f32 %v14275_v27, %v6418_v7  ;;  %v9710_v24 = vpop.f32.mrf.mxu1  ;;  %v6416_v37 = vcombine.high %v6371_v46, %v6403_v16 }
 0x35d   : > { %v9725_v22 = vpop.f32.mrf.mxu0  ;;  %v6553_v13 = vcombine.low %v6514_v15, %v6546_v8  ;;  %v13073_v60 = vadd.f32 %v12789_v14, %v6849_v54  ;;  %v6841_v50 = vadd.f32 %v6840_v34, %v6575_v56  ;;  %v6584_v38 = vadd.f32 %v14276_v11, %v6552_v33  ;;  %v14279_v54 = vld [vmem:[#allocation2_spill] sm:$0xff] }
 0x35e   : > { %7062 = vmax.xlane.f32.xlu1 %v7061_v44  ;;  %v7055_v6 = vsel %vm6982_vm2, %v13061_v4, -inf  ;;  %v6551_v26 = vcombine.low %v6507_v53, %v6539_v3  ;;  %v13080_v5 = vadd.f32 %v12789_v14, %v6917_v51  ;;  %v6852_v12 = vadd.f32 %v9710_v24, %v6578_v21  ;;  %v6843_v2 = vpop.f32.mrf.mxu1  ;;  %v14280_v51 = vld [vmem:[#allocation58_spill] sm:$0xff] }
 0x35f   : > { %v6929_v29 = vpop.f32.mrf.mxu0  ;;  %v6585_v9 = vadd.f32 %v14277_v41, %v6553_v13  ;;  %v7064_v46 = vsel %vm6982_vm2, %v13066_v47, -inf  ;;  %v6554_v28 = vcombine.high %v6514_v15, %v6546_v8  ;;  %v6576_v20 = vadd.f32 %v14278_v0, %v6416_v37  ;;  %v13130_v41 = vpop.permute.xlu0 %2746 }
 0x360   : > { %7035 = vmax.xlane.f32.xlu0 %v7034_v59  ;;  %v13086_v7 = vadd.f32 %v12789_v14, %v6841_v50  ;;  %v7049_v53 = vsel %vm6982_vm2, %v13073_v60, -inf  ;;  %v6583_v33 = vadd.f32 %v14279_v54, %v6551_v26  ;;  %v13095_v44 = vadd.f32 %v12789_v14, %v6852_v12 }
 0x361   : > { %v9726_v55 = vpop.f32.mrf.mxu0  ;;  %v6938_v34 = vadd.f32 %v9725_v22, %v6585_v9  ;;  %v6844_v8 = vadd.f32 %v6843_v2, %v6576_v20  ;;  %v7058_v15 = vsel %vm6982_vm2, %v13080_v5, -inf  ;;  %v6586_v57 = vadd.f32 %v14280_v51, %v6554_v28 }
 0x362   : > { %7056 = vmax.xlane.f32.xlu1 %v7055_v6  ;;  %v6930_v13 = vadd.f32 %v6929_v29, %v6583_v33  ;;  %v7043_v56 = vsel %vm6982_vm2, %v13086_v7, -inf  ;;  %v7052_v21 = vsel %vm6982_vm2, %v13095_v44, -inf  ;;  %v14281_v6 = vld [vmem:[#allocation8_spill] sm:$0xff] }
 0x363   : > { %v6932_v62 = vpop.f32.mrf.mxu0  ;;  %v13100_v22 = vadd.f32 %v12789_v14, %v6938_v34  ;;  %v6941_v59 = vadd.f32 %v9726_v55, %v6586_v57  ;;  %v13106_v27 = vadd.f32 %v12789_v14, %v6844_v8  ;;  %v13132_v9 = vpop.permute.xlu0 %2762 }
 0x364   : > { %v6933_v16 = vadd.f32 %v6932_v62, %v6584_v38  ;;  %7065 = vmax.xlane.f32.xlu0 %v7064_v46  ;;  %v13111_v24 = vadd.f32 %v12789_v14, %v6930_v13 }
 0x365   : > { %v7073_v29 = vsel %vm6982_vm2, %v13100_v22, -inf  ;;  %v13116_v37 = vadd.f32 %v12789_v14, %v6941_v59  ;;  %v7046_v55 = vsel %vm6982_vm2, %v13106_v27, -inf }
 0x366   : > { %v13089_v3 = vadd.f32 %v12789_v14, %v6933_v16  ;;  %7050 = vmax.xlane.f32.xlu1 %v7049_v53  ;;  %v7067_v50 = vsel %vm6982_vm2, %v13111_v24, -inf  ;;  %v14282_v14 = vld [vmem:[#allocation9_spill] sm:$0xff] }
 0x367   : > { %v7076_v11 = vsel %vm6982_vm2, %v13116_v37, -inf  ;;  %v13134_v26 = vpop.permute.xlu0 %2778 }
 0x368   : > { %7059 = vmax.xlane.f32.xlu0 %v7058_v15  ;;  %v7070_v38 = vsel %vm6982_vm2, %v13089_v3, -inf }
 0x36a   : > { %7044 = vmax.xlane.f32.xlu1 %v7043_v56 }
 0x36c   : > { %7053 = vmax.xlane.f32.xlu0 %v7052_v21 }
 0x36e   : > { %7074 = vmax.xlane.f32.xlu1 %v7073_v29 }
 0x370   : > { %7047 = vmax.xlane.f32.xlu0 %v7046_v55 }
 0x372   : > { %7068 = vmax.xlane.f32.xlu1 %v7067_v50 }
 0x374   : > { %7077 = vmax.xlane.f32.xlu0 %v7076_v11 }
 0x378   : > { %7071 = vmax.xlane.f32.xlu0 %v7070_v38 }
 0x383   : > { %2796 = vrot.lane.b32.xlu1 %v14281_v6, %s10102_s6 }
 0x38e   : > { %2794 = vrot.lane.b32.xlu0 %v14282_v14, %s10102_s6  ;;  %s10104_s6 = smov 16  }
 0x3bf   : > { %v6991_v62 = vpop.xlane.xlu1 %6990 }
 0x3c0   : > { %v7081_v12 = vsub.f32 %v12817_v49, %v6991_v62 }
 0x3c1   : > { %v6985_v16 = vpop.xlane.xlu0 %6984 }
 0x3c2   : > { %v7115_v46 = vmul.f32 1.442695, %v7081_v12  ;;  %v7079_v28 = vsub.f32 %v12827_v23, %v6985_v16 }
 0x3c4   : > { %v7015_v0 = vpop.xlane.xlu1 %7014  ;;  %9960 = vpow2.f32 %v7115_v46  ;;  %v7111_v20 = vmul.f32 1.442695, %v7079_v28 }
 0x3c5   : > { %v7089_v2 = vsub.f32 %v12840_v30, %v7015_v0  ;;  %v6994_v34 = vpop.xlane.xlu0 %6993 }
 0x3c6   : > { %9962 = vpow2.f32 %v7111_v20  ;;  %v7082_v54 = vsub.f32 %v12850_v25, %v6994_v34 }
 0x3c7   : > { %v7131_v53 = vmul.f32 1.442695, %v7089_v2 }
 0x3c8   : > { %v6988_v33 = vpop.xlane.xlu1 %6987  ;;  %v7117_v8 = vmul.f32 1.442695, %v7082_v54 }
 0x3c9   : > { %9964 = vpow2.f32 %v7131_v53  ;;  %v7080_v15 = vsub.f32 %v12856_v19, %v6988_v33  ;;  %v7009_v49 = vpop.xlane.xlu0 %7008 }
 0x3ca   : > { %9966 = vpow2.f32 %v7117_v8  ;;  %v7087_v23 = vsub.f32 %v12871_v48, %v7009_v49 }
 0x3cb   : > { %v7113_v13 = vmul.f32 1.442695, %v7080_v15 }
 0x3cc   : > { %v7003_v51 = vpop.xlane.xlu1 %7002  ;;  %v7127_v57 = vmul.f32 1.442695, %v7087_v23 }
 0x3cd   : > { %9968 = vpow2.f32 %v7113_v13  ;;  %v7085_v30 = vsub.f32 %v12886_v63, %v7003_v51  ;;  %v7018_v56 = vpop.xlane.xlu0 %7017 }
 0x3ce   : > { %9970 = vpow2.f32 %v7127_v57  ;;  %v7090_v25 = vsub.f32 %v12899_v45, %v7018_v56 }
 0x3cf   : > { %v7123_v59 = vmul.f32 1.442695, %v7085_v30 }
 0x3d0   : > { %v6997_v21 = vpop.xlane.xlu1 %6996  ;;  %v7133_v29 = vmul.f32 1.442695, %v7090_v25 }
 0x3d1   : > { %9972 = vpow2.f32 %v7123_v59  ;;  %v7083_v19 = vsub.f32 %v12909_v1, %v6997_v21  ;;  %v13145_v55 = vpop.eup %9960  ;;  %v7012_v50 = vpop.xlane.xlu0 %7011 }
 0x3d2   : > { %9974 = vpow2.f32 %v7133_v29  ;;  %v7088_v48 = vsub.f32 %v12922_v52, %v7012_v50  ;;  %v7181_v11 = vsel %vm6982_vm2, %v13145_v55, 0.0 }
 0x3d3   : > { %v13150_v63 = vpop.eup %9962  ;;  %v7119_v38 = vmul.f32 1.442695, %v7083_v19  ;;  %7182 = vadd.xlane.f32.xlu1 %v7181_v11 }
 0x3d4   : > { %v7027_v6 = vpop.xlane.xlu1 %7026  ;;  %v7129_v45 = vmul.f32 1.442695, %v7088_v48  ;;  %v7175_v1 = vsel %vm6982_vm2, %v13150_v63, 0.0 }
 0x3d5   : > { %v7093_v14 = vsub.f32 %v12930_v18, %v7027_v6  ;;  %7176 = vadd.xlane.f32.xlu0 %v7175_v1  ;;  %v7006_v12 = vpop.xlane.xlu0 %7005 }
 0x3d6   : > { %v13155_v62 = vpop.eup %9964  ;;  %9976 = vpow2.f32 %v7129_v45  ;;  %v7086_v16 = vsub.f32 %v12942_v35, %v7006_v12 }
 0x3d7   : > { %v7139_v52 = vmul.f32 1.442695, %v7093_v14  ;;  %v7205_v46 = vsel %vm6982_vm2, %v13155_v62, 0.0  ;;  %v13160_v28 = vpop.eup %9966  ;;  %9978 = vpow2.f32 %v7119_v38 }
 0x3d8   : > { %7206 = vadd.xlane.f32.xlu1 %v7205_v46  ;;  %v7021_v0 = vpop.xlane.xlu1 %7020  ;;  %v7125_v18 = vmul.f32 1.442695, %v7086_v16  ;;  %v7184_v2 = vsel %vm6982_vm2, %v13160_v28, 0.0 }
 0x3d9   : > { %9980 = vpow2.f32 %v7139_v52  ;;  %v7091_v20 = vsub.f32 %v12951_v32, %v7021_v0  ;;  %7185 = vadd.xlane.f32.xlu0 %v7184_v2  ;;  %v7000_v53 = vpop.xlane.xlu0 %6999 }
 0x3da   : > { %v13165_v34 = vpop.eup %9968  ;;  %v7084_v35 = vsub.f32 %v12969_v39, %v7000_v53  ;;  %9982 = vpow2.f32 %v7125_v18 }
 0x3db   : > { %v7178_v54 = vsel %vm6982_vm2, %v13165_v34, 0.0  ;;  %v13170_v33 = vpop.eup %9970  ;;  %v7135_v8 = vmul.f32 1.442695, %v7091_v20 }
 0x3dc   : > { %7179 = vadd.xlane.f32.xlu1 %v7178_v54  ;;  %v7121_v15 = vmul.f32 1.442695, %v7084_v35  ;;  %v7199_v32 = vsel %vm6982_vm2, %v13170_v33, 0.0 }
 0x3dd   : > { %7200 = vadd.xlane.f32.xlu0 %v7199_v32  ;;  %v7030_v13 = vpop.xlane.xlu0 %7029 }
 0x3de   : > { %v13174_v49 = vpop.eup %9972  ;;  %9984 = vpow2.f32 %v7121_v15  ;;  %v7094_v23 = vsub.f32 %v12990_v61, %v7030_v13 }
 0x3df   : > { %v7193_v39 = vsel %vm6982_vm2, %v13174_v49, 0.0  ;;  %v13179_v51 = vpop.eup %9974  ;;  %v7039_v57 = vpop.xlane.xlu1 %7038  ;;  %9986 = vpow2.f32 %v7135_v8 }
 0x3e0   : > { %7194 = vadd.xlane.f32.xlu1 %v7193_v39  ;;  %v7141_v30 = vmul.f32 1.442695, %v7094_v23  ;;  %v7097_v56 = vsub.f32 %v13008_v36, %v7039_v57  ;;  %v7208_v59 = vsel %vm6982_vm2, %v13179_v51, 0.0 }
 0x3e1   : > { %7209 = vadd.xlane.f32.xlu0 %v7208_v59  ;;  %v7024_v25 = vpop.xlane.xlu0 %7023 }
 0x3e2   : > { %v7147_v21 = vmul.f32 1.442695, %v7097_v56  ;;  %v7092_v29 = vsub.f32 %v13005_v42, %v7024_v25  ;;  %9988 = vpow2.f32 %v7141_v30 }
 0x3e3   : > { %v13185_v61 = vpop.eup %9976  ;;  %v7033_v19 = vpop.xlane.xlu1 %7032 }
 0x3e4   : > { %v13187_v50 = vpop.eup %9978  ;;  %9990 = vpow2.f32 %v7147_v21  ;;  %v7137_v48 = vmul.f32 1.442695, %v7092_v29  ;;  %v7095_v11 = vsub.f32 %v13019_v31, %v7033_v19  ;;  %v7202_v36 = vsel %vm6982_vm2, %v13185_v61, 0.0 }
 0x3e5   : > { %7203 = vadd.xlane.f32.xlu0 %v7202_v36  ;;  %v7042_v6 = vpop.xlane.xlu0 %7041  ;;  %v7187_v16 = vsel %vm6982_vm2, %v13187_v50, 0.0 }
 0x3e6   : > { %v13192_v38 = vpop.eup %9980  ;;  %v7143_v45 = vmul.f32 1.442695, %v7095_v11  ;;  %v7098_v42 = vsub.f32 %v13026_v40, %v7042_v6  ;;  %9992 = vpow2.f32 %v7137_v48 }
 0x3e7   : > { %v7217_v14 = vsel %vm6982_vm2, %v13192_v38, 0.0  ;;  %v7063_v1 = vpop.xlane.xlu1 %7062  ;;  %v13197_v12 = vpop.eup %9982 }
 0x3e8   : > { %7218 = vadd.xlane.f32.xlu1 %v7217_v14  ;;  %9994 = vpow2.f32 %v7143_v45  ;;  %v7149_v31 = vmul.f32 1.442695, %v7098_v42  ;;  %v7105_v52 = vsub.f32 %v13038_v17, %v7063_v1  ;;  %v7196_v2 = vsel %vm6982_vm2, %v13197_v12, 0.0 }
 0x3e9   : > { %7188 = vadd.xlane.f32.xlu0 %v7187_v16  ;;  %v7036_v46 = vpop.xlane.xlu0 %7035 }
 0x3ea   : > { %v7163_v0 = vmul.f32 1.442695, %v7105_v52  ;;  %v7096_v40 = vsub.f32 %v13050_v10, %v7036_v46  ;;  %9996 = vpow2.f32 %v7149_v31 }
 0x3eb   : > { %v13203_v18 = vpop.eup %9984  ;;  %v7057_v20 = vpop.xlane.xlu1 %7056 }
 0x3ec   : > { %9998 = vpow2.f32 %v7163_v0  ;;  %v7145_v53 = vmul.f32 1.442695, %v7096_v40  ;;  %v7103_v35 = vsub.f32 %v13061_v4, %v7057_v20  ;;  %v7190_v17 = vsel %vm6982_vm2, %v13203_v18, 0.0  ;;  %v13210_v54 = vpop.eup %9986 }
 0x3ed   : > { %7197 = vadd.xlane.f32.xlu0 %v7196_v2  ;;  %7191 = vadd.xlane.f32.xlu1 %v7190_v17  ;;  %v7066_v8 = vpop.xlane.xlu0 %7065  ;;  %v7211_v4 = vsel %vm6982_vm2, %v13210_v54, 0.0 }
 0x3ee   : > { %v7159_v10 = vmul.f32 1.442695, %v7103_v35  ;;  %v7106_v15 = vsub.f32 %v13066_v47, %v7066_v8  ;;  %10000 = vpow2.f32 %v7145_v53 }
 0x3ef   : > { %v7051_v32 = vpop.xlane.xlu1 %7050  ;;  %v13213_v13 = vpop.eup %9988 }
 0x3f0   : > { %10002 = vpow2.f32 %v7159_v10  ;;  %v7165_v23 = vmul.f32 1.442695, %v7106_v15  ;;  %v7101_v39 = vsub.f32 %v13073_v60, %v7051_v32  ;;  %v7220_v19 = vsel %vm6982_vm2, %v13213_v13, 0.0  ;;  %v14283_v15 = vld [vmem:[#allocation11_spill] sm:$0xff] }
 0x3f1   : > { %v13218_v57 = vpop.eup %9990  ;;  %7212 = vadd.xlane.f32.xlu0 %v7211_v4  ;;  %v7060_v30 = vpop.xlane.xlu0 %7059  ;;  %v2842_v4 = vcombine.low %v13130_v41, %v13134_v26 }
 0x3f2   : > { %v7155_v56 = vmul.f32 1.442695, %v7101_v39  ;;  %v7104_v59 = vsub.f32 %v13080_v5, %v7060_v30  ;;  %v7229_v47 = vsel %vm6982_vm2, %v13218_v57, 0.0  ;;  %10004 = vpow2.f32 %v7165_v23  ;;  %v14284_v30 = vld [vmem:[#allocation15_spill] sm:$0xff] }
 0x3f3   : > { %v7045_v25 = vpop.xlane.xlu1 %7044  ;;  %7230 = vadd.xlane.f32.xlu1 %v7229_v47  ;;  %v13223_v21 = vpop.eup %9992 }
 0x3f4   : > { %10006 = vpow2.f32 %v7155_v56  ;;  %v7161_v60 = vmul.f32 1.442695, %v7104_v59  ;;  %v7099_v29 = vsub.f32 %v13086_v7, %v7045_v25  ;;  %v7214_v14 = vsel %vm6982_vm2, %v13223_v21, 0.0  ;;  %v14285_v56 = vld [vmem:[#allocation10_spill] sm:$0xff] }
 0x3f5   : > { %v13228_v48 = vpop.eup %9994  ;;  %7221 = vadd.xlane.f32.xlu0 %v7220_v19  ;;  %v7054_v11 = vpop.xlane.xlu0 %7053  ;;  %v14286_v59 = vcombine.low %v14284_v30, %v14285_v56  ;;  %v14287_v25 = vcombine.high %v14284_v30, %v14285_v56 }
 0x3f6   : > { %10008 = vpow2.f32 %v7161_v60  ;;  %v7151_v5 = vmul.f32 1.442695, %v7099_v29  ;;  %v7102_v36 = vsub.f32 %v13095_v44, %v7054_v11  ;;  %v7223_v6 = vsel %vm6982_vm2, %v13228_v48, 0.0 }
 0x3f7   : > { %v7075_v45 = vpop.xlane.xlu1 %7074  ;;  %7224 = vadd.xlane.f32.xlu1 %v7223_v6  ;;  %v13233_v42 = vpop.eup %9996  ;;  %v2918_v47 = vrot.slane %v14286_v59, %v10299_v43  ;;  %v2925_v60 = vrot.slane %v14287_v25, %v10299_v43 }
 0x3f8   : > { %10010 = vpow2.f32 %v7151_v5  ;;  %v7157_v7 = vmul.f32 1.442695, %v7102_v36  ;;  %v7109_v52 = vsub.f32 %v13100_v22, %v7075_v45  ;;  %v7232_v2 = vsel %vm6982_vm2, %v13233_v42, 0.0 }
 0x3f9   : > { %v13237_v1 = vpop.eup %9998  ;;  %7215 = vadd.xlane.f32.xlu0 %v7214_v14  ;;  %v7048_v31 = vpop.xlane.xlu0 %7047  ;;  %v2843_v45 = vcombine.high %v13130_v41, %v13134_v26 }
 0x3fa   : > { %v7100_v44 = vsub.f32 %v13106_v27, %v7048_v31  ;;  %v7253_v16 = vsel %vm6982_vm2, %v13237_v1, 0.0  ;;  %10012 = vpow2.f32 %v7157_v7  ;;  %v7171_v35 = vmul.f32 1.442695, %v7109_v52 }
 0x3fb   : > { %v7069_v46 = vpop.xlane.xlu1 %7068  ;;  %7254 = vadd.xlane.f32.xlu1 %v7253_v16  ;;  %v13243_v0 = vpop.eup %10000  ;;  %v2857_v30 = vrot.slane %v2843_v45, %v10299_v43 }
 0x3fc   : > { %v7153_v40 = vmul.f32 1.442695, %v7100_v44  ;;  %v7107_v20 = vsub.f32 %v13111_v24, %v7069_v46  ;;  %v7226_v23 = vsel %vm6982_vm2, %v13243_v0, 0.0 }
 0x3fd   : > { %v13248_v53 = vpop.eup %10002  ;;  %7233 = vadd.xlane.f32.xlu0 %v7232_v2  ;;  %v7078_v22 = vpop.xlane.xlu0 %7077 }
 0x3fe   : > { %v7167_v27 = vmul.f32 1.442695, %v7107_v20  ;;  %v7247_v17 = vsel %vm6982_vm2, %v13248_v53, 0.0  ;;  %10014 = vpow2.f32 %v7153_v40  ;;  %v7110_v29 = vsub.f32 %v13116_v37, %v7078_v22 }
 0x3ff   : > { %v2797_v8 = vpop.permute.xlu1 %2796  ;;  %7248 = vadd.xlane.f32.xlu1 %v7247_v17  ;;  %v13252_v10 = vpop.eup %10004 }
 0x400   : > { %10016 = vpow2.f32 %v7167_v27  ;;  %v2926_v24 = vcombine.low %v14283_v15, %v2797_v8  ;;  %v2927_v32 = vcombine.high %v14283_v15, %v2797_v8  ;;  %v7256_v37 = vsel %vm6982_vm2, %v13252_v10, 0.0 }
 0x401   : > { %v13258_v39 = vpop.eup %10006  ;;  %7227 = vadd.xlane.f32.xlu0 %v7226_v23  ;;  %v7072_v19 = vpop.xlane.xlu0 %7071  ;;  %10018 = vpow2.f32 %v7171_v35  ;;  %v7173_v46 = vmul.f32 1.442695, %v7110_v29 }
 0x402   : > { %v2934_v11 = vrot.slane %v2926_v24, %v10299_v43  ;;  %v2941_v5 = vrot.slane %v2927_v32, %v10299_v43  ;;  %v7108_v36 = vsub.f32 %v13089_v3, %v7072_v19  ;;  %v7241_v7 = vsel %vm6982_vm2, %v13258_v39, 0.0 }
 0x403   : > { %v13274_v6 = vpop.eup %10008  ;;  %7242 = vadd.xlane.f32.xlu1 %v7241_v7  ;;  %v2850_v3 = vrot.slane %v2842_v4, %v10299_v43 }
 0x404   : > { %v2942_v14 = vcombine.low %v2918_v47, %v2934_v11  ;;  %v2943_v31 = vcombine.high %v2918_v47, %v2934_v11  ;;  %v2958_v52 = vcombine.low %v2925_v60, %v2941_v5  ;;  %v2959_v44 = vcombine.high %v2925_v60, %v2941_v5 }
 0x405   : > { %v13282_v16 = vpop.eup %10010  ;;  %v7169_v40 = vmul.f32 1.442695, %v7108_v36  ;;  %7257 = vadd.xlane.f32.xlu0 %v7256_v37  ;;  %v2795_v20 = vpop.permute.xlu0 %2794  ;;  %v7250_v41 = vsel %vm6982_vm2, %v13274_v6, 0.0 }
 0x406   : > { %v2950_v26 = vrot.slane %v2942_v14, %v10323_v58  ;;  %v2957_v2 = vrot.slane %v2943_v31, %v10323_v58  ;;  %v2966_v22 = vrot.slane %v2958_v52, %v10323_v58  ;;  %v2973_v35 = vrot.slane %v2959_v44, %v10323_v58 }
 0x407   : > { %10020 = vpow2.f32 %v7169_v40  ;;  %v2858_v27 = vcombine.low %v13132_v9, %v2795_v20  ;;  %v2859_v17 = vcombine.high %v13132_v9, %v2795_v20  ;;  %v7235_v8 = vsel %vm6982_vm2, %v13282_v16, 0.0  ;;  %v13295_v4 = vpop.eup %10012 }
 0x408   : > { %v3454_v15 = vcombine.low %v2950_v26, %v2957_v2  ;;  %v9002_v24 = vcombine.high %v2950_v26, %v2957_v2  ;;  %v3470_v32 = vcombine.low %v2966_v22, %v2973_v35  ;;  %v9003_v23 = vcombine.high %v2966_v22, %v2973_v35  ;;  %7236 = vadd.xlane.f32.xlu1 %v7235_v8 }
 0x409   : > { %10022 = vpow2.f32 %v7173_v46  ;;  %v2866_v56 = vrot.slane %v2858_v27, %v10299_v43  ;;  %v2873_v59 = vrot.slane %v2859_v17, %v10299_v43  ;;  %7251 = vadd.xlane.f32.xlu0 %v7250_v41  ;;  %v7244_v45 = vsel %vm6982_vm2, %v13295_v4, 0.0 }
 0x40a   : > { %v3461_v9 = vrot.slane %v3454_v15, %v10299_v43  ;;  %v3469_v47 = vrot.slane %v9002_v24, %v10299_v43  ;;  %v3477_v25 = vrot.slane %v3470_v32, %v10299_v43  ;;  %v3485_v60 = vrot.slane %v9003_v23, %v10299_v43 }
 0x40b   : > { %v2874_v29 = vcombine.low %v2850_v3, %v2866_v56  ;;  %v2875_v19 = vcombine.high %v2850_v3, %v2866_v56  ;;  %v2890_v11 = vcombine.low %v2857_v30, %v2873_v59  ;;  %v2891_v5 = vcombine.high %v2857_v30, %v2873_v59  ;;  %v13304_v36 = vpop.eup %10014 }
 0x40c   : > { %v3486_v7 = vcombine.low %v3461_v9, %v3469_v47  ;;  %v3502_v37 = vcombine.low %v3477_v25, %v3485_v60  ;;  %v3487_v41 = vcombine.high %v3461_v9, %v3469_v47  ;;  %v7238_v17 = vsel %vm6982_vm2, %v13304_v36, 0.0 }
 0x40d   : > { %v13308_v14 = vpop.eup %10016  ;;  %v2882_v31 = vrot.slane %v2874_v29, %v10323_v58  ;;  %v2889_v52 = vrot.slane %v2875_v19, %v10323_v58  ;;  %v2898_v44 = vrot.slane %v2890_v11, %v10323_v58  ;;  %v2905_v46 = vrot.slane %v2891_v5, %v10323_v58  ;;  %7245 = vadd.xlane.f32.xlu0 %v7244_v45 }
 0x40e   : > { %v7259_v3 = vsel %vm6982_vm2, %v13308_v14, 0.0  ;;  %v3494_v40 = vrot.slane %v3486_v7, %v10323_v58  ;;  %v3510_v20 = vrot.slane %v3502_v37, %v10323_v58  ;;  %v13318_v26 = vpop.eup %10018  ;;  %v3501_v59 = vrot.slane %v3487_v41, %v10323_v58 }
 0x40f   : > { %v3386_v2 = vcombine.low %v2882_v31, %v2889_v52  ;;  %v9000_v22 = vcombine.high %v2882_v31, %v2889_v52  ;;  %v3402_v35 = vcombine.low %v2898_v44, %v2905_v46  ;;  %v9001_v27 = vcombine.high %v2898_v44, %v2905_v46  ;;  %7260 = vadd.xlane.f32.xlu1 %v7259_v3 }
 0x410   : > { %v3518_v8 = vcombine.low %v3494_v40, %v3510_v20  ;;  %v3519_v15 = vcombine.high %v3494_v40, %v3510_v20  ;;  %v7265_v56 = vsel %vm6982_vm2, %v13318_v26, 0.0  ;;  %v3503_v9 = vcombine.high %v3477_v25, %v3485_v60 }
 0x411   : > { %v3393_v24 = vrot.slane %v3386_v2, %v10299_v43  ;;  %v3401_v32 = vrot.slane %v9000_v22, %v10299_v43  ;;  %v3409_v23 = vrot.slane %v3402_v35, %v10299_v43  ;;  %v3417_v30 = vrot.slane %v9001_v27, %v10299_v43  ;;  %7239 = vadd.xlane.f32.xlu0 %v7238_v17 }
 0x412   : > { %v3517_v45 = vrot.slane %v3503_v9, %v10323_v58 }
 0x413   : > { %7266 = vadd.xlane.f32.xlu1 %v7265_v56  ;;  %v3418_v47 = vcombine.low %v3393_v24, %v3401_v32  ;;  %v3434_v29 = vcombine.low %v3409_v23, %v3417_v30  ;;  %v3419_v19 = vcombine.high %v3393_v24, %v3401_v32  ;;  %v3435_v11 = vcombine.high %v3409_v23, %v3417_v30  ;;  %v14288_v24 = vld [vmem:[#allocation61_spill] sm:$0xff]  ;;  %v14289_v32 = vld [vmem:[#allocation12_spill] sm:$0xff] }
 0x414   : > { %v13329_v5 = vpop.eup %10020  ;;  %v3520_v60 = vcombine.low %v3501_v59, %v3517_v45  ;;  %v3521_v46 = vcombine.high %v3501_v59, %v3517_v45 }
 0x415   : > { %v7262_v7 = vsel %vm6982_vm2, %v13329_v5, 0.0  ;;  %v3426_v37 = vrot.slane %v3418_v47, %v10323_v58  ;;  %v3442_v31 = vrot.slane %v3434_v29, %v10323_v58  ;;  %v3433_v52 = vrot.slane %v3419_v19, %v10323_v58 }
 0x416   : > { %v13337_v44 = vpop.eup %10022  ;;  %7263 = vadd.xlane.f32.xlu0 %v7262_v7  ;;  %v3449_v25 = vrot.slane %v3435_v11, %v10323_v58 }
 0x417   : > { %v3450_v3 = vcombine.low %v3426_v37, %v3442_v31  ;;  %v3451_v40 = vcombine.high %v3426_v37, %v3442_v31  ;;  %v7268_v2 = vsel %vm6982_vm2, %v13337_v44, 0.0 }
 0x418   : > { %v3452_v20 = vcombine.low %v3433_v52, %v3449_v25  ;;  %v3453_v41 = vcombine.high %v3433_v52, %v3449_v25 }
 0x419   : > { %v3930_v22 = vpack.c.bf16 %v3518_v8, %v3450_v3  ;;  %v3934_v35 = vpack.c.bf16 %v3519_v15, %v3451_v40 }
 0x41a   : > { %7269 = vadd.xlane.f32.xlu0 %v7268_v2  ;;  %v13342_v27 = vpack.c.bf16 %v3520_v60, %v3452_v20  ;;  %v13344_v17 = vpack.c.bf16 %v3521_v46, %v3453_v41  ;;  %v14290_v2 = vld [vmem:[#allocation3_spill] sm:$0xff] }
 0x41b   : > { %9733 = vmatprep.subr.bf16.mxu1 %v3930_v22  ;;  %9749 = vmatprep.subr.bf16.mxu0 %v3934_v35 }
 0x41c   : > { %9734 = vmatpush3.bf16.msra.mxu1 %v3930_v22  ;;  %9750 = vmatpush3.bf16.msra.mxu0 %v3934_v35 }
 0x41d   : > { %9759 = vmatprep.subr.bf16.mxu1 %v14288_v24  ;;  %9775 = vmatprep.subr.bf16.mxu0 %v14289_v32 }
 0x45c   : > { %v7183_v23 = vpop.xlane.xlu1 %7182 }
 0x45e   : > { %v7177_v30 = vpop.xlane.xlu0 %7176 }
 0x45f   : > { %10024 = vrcp.f32 %v7177_v30 }
 0x461   : > { %v7207_v56 = vpop.xlane.xlu1 %7206 }
 0x462   : > { %v7186_v59 = vpop.xlane.xlu0 %7185 }
 0x463   : > { %10026 = vrcp.f32 %v7186_v59 }
 0x464   : > { %10028 = vrcp.f32 %v7183_v23 }
 0x465   : > { %v7180_v8 = vpop.xlane.xlu1 %7179 }
 0x466   : > { %10030 = vrcp.f32 %v7180_v8  ;;  %v7201_v15 = vpop.xlane.xlu0 %7200  ;;  %v14291_v8 = vld [vmem:[#allocation64_spill] sm:$0xff] }
 0x469   : > { %v7195_v47 = vpop.xlane.xlu1 %7194 }
 0x46a   : > { %v7210_v9 = vpop.xlane.xlu0 %7209 }
 0x46b   : > { %10032 = vrcp.f32 %v7210_v9 }
 0x46c   : > { %10034 = vrcp.f32 %v7201_v15  ;;  %v10025_v19 = vpop.eup %10024 }
 0x46d   : > { %10036 = vrcp.f32 %v7207_v56  ;;  %v7303_v25 = vmul.f32 %v10025_v19, %v13150_v63 }
 0x46e   : > { %v7204_v29 = vpop.xlane.xlu0 %7203 }
 0x46f   : > { %10038 = vrcp.f32 %v7204_v29  ;;  %v14292_v29 = vld [vmem:[#allocation56_spill] sm:$0xff] }
 0x470   : > { %v10027_v11 = vpop.eup %10026 }
 0x471   : > { %v10029_v45 = vpop.eup %10028  ;;  %v7306_v37 = vmul.f32 %v10027_v11, %v13160_v28  ;;  %v7219_v31 = vpop.xlane.xlu1 %7218 }
 0x472   : > { %v7189_v52 = vpop.xlane.xlu0 %7188  ;;  %v7305_v46 = vmul.f32 %v10029_v45, %v13145_v55 }
 0x473   : > { %v10031_v7 = vpop.eup %10030  ;;  %10040 = vrcp.f32 %v7189_v52 }
 0x474   : > { %v7304_v60 = vmul.f32 %v10031_v7, %v13165_v34  ;;  %v7336_v40 = vpack.c.bf16 %v7306_v37, %v7305_v46  ;;  %10042 = vrcp.f32 %v7195_v47 }
 0x476   : > { %v7335_v3 = vpack.c.bf16 %v7304_v60, %v7303_v25  ;;  %v7192_v20 = vpop.xlane.xlu1 %7191  ;;  %v7198_v41 = vpop.xlane.xlu0 %7197  ;;  %v14293_v25 = vld [vmem:[#allocation65_spill] sm:$0xff] }
 0x477   : > { %10044 = vrcp.f32 %v7192_v20 }
 0x478   : > { %9735 = vmatprep.mubr.msk.bf16.mxu1 %vm6982_vm2, %v7335_v3  ;;  %10046 = vrcp.f32 %v7198_v41  ;;  %v10033_v28 = vpop.eup %10032 }
 0x479   : > { %9736 = vmatmul.mubr.msk.bf16.vlgmr.msra.gmra.mxu1 %vm6982_vm2, %v7336_v40  ;;  %v10035_v63 = vpop.eup %10034  ;;  %v7314_v35 = vmul.f32 %v10033_v28, %v13179_v51 }
 0x47a   : > { %9760 = vmatpush3.bf16.msra.mxu1 %v14288_v24  ;;  %v7213_v34 = vpop.xlane.xlu0 %7212  ;;  %v10037_v55 = vpop.eup %10036  ;;  %v7311_v30 = vmul.f32 %v10035_v63, %v13170_v33 }
 0x47b   : > { %9761 = vmatprep.subr.bf16.mxu1 %v14290_v2  ;;  %v7313_v59 = vmul.f32 %v10037_v55, %v13155_v62 }
 0x47c   : > { %v10039_v22 = vpop.eup %10038  ;;  %v7231_v23 = vpop.xlane.xlu1 %7230 }
 0x47d   : > { %v7312_v56 = vmul.f32 %v10039_v22, %v13185_v61  ;;  %v7340_v9 = vpack.c.bf16 %v7314_v35, %v7313_v59 }
 0x47e   : > { %9762 = vmatpush3.bf16.msra.mxu1 %v14290_v2  ;;  %v7222_v24 = vpop.xlane.xlu0 %7221 }
 0x47f   : > { %9763 = vmatprep.subr.bf16.mxu1 %v14291_v8  ;;  %v7339_v15 = vpack.c.bf16 %v7312_v56, %v7311_v30  ;;  %10048 = vrcp.f32 %v7222_v24 }
 0x480   : > { %v7225_v47 = vpop.xlane.xlu1 %7224  ;;  %10050 = vrcp.f32 %v7213_v34  ;;  %v10041_v51 = vpop.eup %10040 }
 0x481   : > { %9751 = vmatprep.mubr.msk.bf16.mxu0 %vm6982_vm2, %v7339_v15  ;;  %10052 = vrcp.f32 %v7219_v31  ;;  %v10043_v62 = vpop.eup %10042  ;;  %v7307_v45 = vmul.f32 %v10041_v51, %v13187_v50 }
 0x482   : > { %9764 = vmatpush3.bf16.msra.mxu1 %v14291_v8  ;;  %9752 = vmatmul.mubr.msk.bf16.vlgmr.msra.gmra.mxu0 %vm6982_vm2, %v7340_v9  ;;  %v7216_v33 = vpop.xlane.xlu0 %7215  ;;  %v7309_v31 = vmul.f32 %v10043_v62, %v13174_v49 }
 0x483   : > { %9765 = vmatprep.subr.bf16.mxu1 %v13342_v27  ;;  %9776 = vmatpush3.bf16.msra.mxu0 %v14289_v32  ;;  %10054 = vrcp.f32 %v7216_v33 }
 0x484   : > { %v10045_v61 = vpop.eup %10044  ;;  %9777 = vmatprep.subr.bf16.mxu0 %v14292_v29  ;;  %v7255_v19 = vpop.xlane.xlu1 %7254 }
 0x485   : > { %v10047_v11 = vpop.eup %10046  ;;  %v7308_v7 = vmul.f32 %v10045_v61, %v13203_v18 }
 0x486   : > { %9766 = vmatpush3.bf16.msra.mxu1 %v13342_v27  ;;  %v7234_v37 = vpop.xlane.xlu0 %7233  ;;  %v7310_v52 = vmul.f32 %v10047_v11, %v13197_v12 }
 0x487   : > { %9778 = vmatpush3.bf16.msra.mxu0 %v14292_v29  ;;  %v7337_v32 = vpack.c.bf16 %v7308_v7, %v7307_v45  ;;  %10056 = vrcp.f32 %v7234_v37 }
 0x488   : > { %9779 = vmatprep.subr.bf16.mxu0 %v14293_v25  ;;  %v7338_v60 = vpack.c.bf16 %v7310_v52, %v7309_v31  ;;  %10058 = vrcp.f32 %v7225_v47  ;;  %v7249_v46 = vpop.xlane.xlu1 %7248 }
 0x489   : > { %9739 = vmatprep.mubr.msk.bf16.mxu1 %vm6982_vm2, %v7337_v32  ;;  %10060 = vrcp.f32 %v7231_v23 }
 0x48a   : > { %9740 = vmatmul.mubr.msk.bf16.gmra.mxu1 %vm6982_vm2, %v7338_v60  ;;  %v7228_v50 = vpop.xlane.xlu0 %7227 }
 0x48b   : > { %9780 = vmatpush3.bf16.msra.mxu0 %v14293_v25  ;;  %10062 = vrcp.f32 %v7228_v50 }
 0x48c   : > { %9781 = vmatprep.subr.bf16.mxu0 %v13344_v17  ;;  %v10049_v49 = vpop.eup %10048  ;;  %v7243_v3 = vpop.xlane.xlu1 %7242 }
 0x48d   : > { %v10051_v12 = vpop.eup %10050  ;;  %v7318_v20 = vmul.f32 %v10049_v49, %v13213_v13 }
 0x48e   : > { %v7258_v18 = vpop.xlane.xlu0 %7257  ;;  %v10053_v27 = vpop.eup %10052  ;;  %v7315_v41 = vmul.f32 %v10051_v12, %v13210_v54 }
 0x48f   : > { %9782 = vmatpush3.bf16.msra.mxu0 %v13344_v17  ;;  %10064 = vrcp.f32 %v7258_v18  ;;  %v7317_v2 = vmul.f32 %v10053_v27, %v13192_v38 }
 0x490   : > { %v10055_v40 = vpop.eup %10054  ;;  %10066 = vrcp.f32 %v7249_v46 }
 0x491   : > { %v7316_v28 = vmul.f32 %v10055_v40, %v13223_v21  ;;  %10068 = vrcp.f32 %v7255_v19  ;;  %v7342_v55 = vpack.c.bf16 %v7318_v20, %v7317_v2  ;;  %v7237_v35 = vpop.xlane.xlu1 %7236 }
 0x492   : > { %v7252_v63 = vpop.xlane.xlu0 %7251 }
 0x493   : > { %10070 = vrcp.f32 %v7252_v63  ;;  %v7341_v34 = vpack.c.bf16 %v7316_v28, %v7315_v41 }
 0x494   : > { %v10057_v22 = vpop.eup %10056 }
 0x495   : > { %9755 = vmatprep.mubr.msk.bf16.mxu0 %vm6982_vm2, %v7341_v34  ;;  %v10059_v17 = vpop.eup %10058  ;;  %v7322_v54 = vmul.f32 %v10057_v22, %v13233_v42 }
 0x496   : > { %9756 = vmatmul.mubr.msk.bf16.gmra.mxu0 %vm6982_vm2, %v7342_v55  ;;  %v7246_v13 = vpop.xlane.xlu0 %7245  ;;  %v10061_v23 = vpop.eup %10060  ;;  %v7319_v38 = vmul.f32 %v10059_v17, %v13228_v48 }
 0x497   : > { %10072 = vrcp.f32 %v7246_v13  ;;  %v7321_v59 = vmul.f32 %v10061_v23, %v13218_v57 }
 0x498   : > { %v10063_v30 = vpop.eup %10062  ;;  %10074 = vrcp.f32 %v7237_v35  ;;  %v7261_v21 = vpop.xlane.xlu1 %7260 }
 0x499   : > { %v7320_v56 = vmul.f32 %v10063_v30, %v13243_v0  ;;  %10076 = vrcp.f32 %v7243_v3  ;;  %v7344_v15 = vpack.c.bf16 %v7322_v54, %v7321_v59 }
 0x49a   : > { %v7240_v8 = vpop.xlane.xlu0 %7239 }
 0x49b   : > { %10078 = vrcp.f32 %v7240_v8  ;;  %v7343_v24 = vpack.c.bf16 %v7320_v56, %v7319_v38 }
 0x49c   : > { %v10065_v9 = vpop.eup %10064  ;;  %10080 = vrcp.f32 %v7261_v21  ;;  %v7267_v51 = vpop.xlane.xlu1 %7266 }
 0x49d   : > { %9767 = vmatprep.mubr.msk.bf16.mxu1 %vm6982_vm2, %v7343_v24  ;;  %v10067_v47 = vpop.eup %10066  ;;  %v7330_v0 = vmul.f32 %v10065_v9, %v13252_v10 }
 0x49e   : > { %9768 = vmatmul.mubr.msk.bf16.vlgmr.msra.gmra.mxu1 %vm6982_vm2, %v7344_v15  ;;  %v10069_v42 = vpop.eup %10068  ;;  %v7327_v57 = vmul.f32 %v10067_v47, %v13248_v53 }
 0x49f   : > { %v7264_v33 = vpop.xlane.xlu0 %7263  ;;  %v7329_v61 = vmul.f32 %v10069_v42, %v13237_v1 }
 0x4a0   : > { %v10071_v48 = vpop.eup %10070  ;;  %10082 = vrcp.f32 %v7264_v33 }
 0x4a1   : > { %v7328_v62 = vmul.f32 %v10071_v48, %v13274_v6  ;;  %10084 = vrcp.f32 %v7267_v51  ;;  %v7348_v11 = vpack.c.bf16 %v7330_v0, %v7329_v61 }
 0x4a3   : > { %v7270_v29 = vpop.xlane.xlu0 %7269  ;;  %v7347_v19 = vpack.c.bf16 %v7328_v62, %v7327_v57 }
 0x4a4   : > { %10086 = vrcp.f32 %v7270_v29  ;;  %v10073_v45 = vpop.eup %10072 }
 0x4a5   : > { %9783 = vmatprep.mubr.msk.bf16.mxu0 %vm6982_vm2, %v7347_v19  ;;  %v10075_v7 = vpop.eup %10074  ;;  %v7326_v31 = vmul.f32 %v10073_v45, %v13295_v4 }
 0x4a6   : > { %9784 = vmatmul.mubr.msk.bf16.vlgmr.msra.gmra.mxu0 %vm6982_vm2, %v7348_v11  ;;  %v10077_v37 = vpop.eup %10076  ;;  %v7323_v53 = vmul.f32 %v10075_v7, %v13282_v16 }
 0x4a7   : > { %v7325_v1 = vmul.f32 %v10077_v37, %v13258_v39 }
 0x4a8   : > { %v10079_v10 = vpop.eup %10078 }
 0x4a9   : > { %v7324_v6 = vmul.f32 %v10079_v10, %v13304_v36  ;;  %v10081_v52 = vpop.eup %10080  ;;  %v7346_v25 = vpack.c.bf16 %v7326_v31, %v7325_v1 }
 0x4aa   : > { %v7331_v46 = vmul.f32 %v10081_v52, %v13308_v14 }
 0x4ab   : > { %v7345_v32 = vpack.c.bf16 %v7324_v6, %v7323_v53 }
 0x4ad   : > { %v10083_v60 = vpop.eup %10082  ;;  %9771 = vmatprep.mubr.msk.bf16.mxu1 %vm6982_vm2, %v7345_v32 }
 0x4ae   : > { %9772 = vmatmul.mubr.msk.bf16.gmra.mxu1 %vm6982_vm2, %v7346_v25  ;;  %v7332_v50 = vmul.f32 %v10083_v60, %v13329_v5  ;;  %v10085_v49 = vpop.eup %10084 }
 0x4af   : > { %v7333_v16 = vmul.f32 %v10085_v49, %v13318_v26 }
 0x4b0   : > { %v7349_v4 = vpack.c.bf16 %v7332_v50, %v7331_v46 }
 0x4b1   : > { %v10087_v12 = vpop.eup %10086 }
 0x4b2   : > { %9787 = vmatprep.mubr.msk.bf16.mxu0 %vm6982_vm2, %v7349_v4  ;;  %v7334_v39 = vmul.f32 %v10087_v12, %v13337_v44 }
 0x4b4   : > { %v7350_v36 = vpack.c.bf16 %v7334_v39, %v7333_v16 }
 0x4b6   : > { %9788 = vmatmul.mubr.msk.bf16.gmra.mxu0 %vm6982_vm2, %v7350_v36 }
 0x539   : > { %v9737_v18 = vpop.f32.mrf.mxu1 }
 0x53b   : > { %v7397_v27 = vpop.f32.mrf.mxu1 }
 0x53d   : > { %v9738_v3 = vpop.f32.mrf.mxu1 }
 0x53f   : > { %v7400_v20 = vpop.f32.mrf.mxu1 }
 0x542   : > { %v9753_v40 = vpop.f32.mrf.mxu0 }
 0x544   : > { %v7474_v14 = vpop.f32.mrf.mxu0 }
 0x546   : > { %v9754_v5 = vpop.f32.mrf.mxu0 }
 0x548   : > { %v13414_v63 = vpop.f32.mrf.mxu0 }
 0x54a   : > { %v13410_v41 = vpop.f32.mrf.mxu1 }
 0x54c   : > { %v13412_v28 = vpop.f32.mrf.mxu1 }
 0x54e   : > { %v13416_v2 = vpop.f32.mrf.mxu1 }
 0x550   : > { %v13420_v44 = vpop.f32.mrf.mxu1 }
 0x556   : > { %v13418_v26 = vpop.f32.mrf.mxu0 }
 0x558   : > { %v13422_v34 = vpop.f32.mrf.mxu0 }
 0x55a   : > { %v13424_v22 = vpop.f32.mrf.mxu0 }
 0x55c   : > { %v13426_v17 = vpop.f32.mrf.mxu0 }
 0x55e   : > { %v9769_v55 = vpop.f32.mrf.mxu1 }
 0x55f   : > { %v7795_v30 = vcombine.low %v9737_v18, %v9769_v55  ;;  %v7796_v54 = vcombine.high %v9737_v18, %v9769_v55 }
 0x560   : > { %v7551_v35 = vpop.f32.mrf.mxu1 }
 0x561   : > { %v7659_v56 = vcombine.low %v7397_v27, %v7551_v35  ;;  %v7660_v59 = vcombine.high %v7397_v27, %v7551_v35  ;;  %v7803_v51 = vrot.slane %v7795_v30, %v10299_v43  ;;  %v7810_v33 = vrot.slane %v7796_v54, %v10299_v43 }
 0x562   : > { %v9770_v13 = vpop.f32.mrf.mxu1 }
 0x563   : > { %v7667_v48 = vrot.slane %v7659_v56, %v10299_v43  ;;  %v7674_v0 = vrot.slane %v7660_v59, %v10299_v43  ;;  %v7863_v29 = vcombine.low %v9738_v3, %v9770_v13  ;;  %v7864_v19 = vcombine.high %v9738_v3, %v9770_v13 }
 0x564   : > { %v7554_v9 = vpop.f32.mrf.mxu1 }
 0x565   : > { %v7727_v11 = vcombine.low %v7400_v20, %v7554_v9  ;;  %v7728_v45 = vcombine.high %v7400_v20, %v7554_v9  ;;  %v7871_v46 = vrot.slane %v7863_v29, %v10299_v43  ;;  %v7878_v50 = vrot.slane %v7864_v19, %v10299_v43 }
 0x566   : > { %v9785_v23 = vpop.f32.mrf.mxu0 }
 0x567   : > { %v7811_v21 = vcombine.low %v9753_v40, %v9785_v23  ;;  %v7812_v38 = vcombine.high %v9753_v40, %v9785_v23  ;;  %v7735_v49 = vrot.slane %v7727_v11, %v10299_v43  ;;  %v7742_v4 = vrot.slane %v7728_v45, %v10299_v43 }
 0x568   : > { %v7628_v8 = vpop.f32.mrf.mxu0 }
 0x569   : > { %v7675_v24 = vcombine.low %v7474_v14, %v7628_v8  ;;  %v7676_v15 = vcombine.high %v7474_v14, %v7628_v8  ;;  %v7819_v47 = vrot.slane %v7811_v21, %v10299_v43  ;;  %v7826_v42 = vrot.slane %v7812_v38, %v10299_v43 }
 0x56a   : > { %v9786_v61 = vpop.f32.mrf.mxu0 }
 0x56b   : > { %v7683_v57 = vrot.slane %v7675_v24, %v10299_v43  ;;  %v7690_v62 = vrot.slane %v7676_v15, %v10299_v43  ;;  %v7827_v7 = vcombine.low %v7803_v51, %v7819_v47  ;;  %v7828_v37 = vcombine.high %v7803_v51, %v7819_v47 }
 0x56c   : > { %v7843_v10 = vcombine.low %v7810_v33, %v7826_v42  ;;  %v7844_v31 = vcombine.high %v7810_v33, %v7826_v42  ;;  %v7879_v53 = vcombine.low %v9754_v5, %v9786_v61  ;;  %v7880_v6 = vcombine.high %v9754_v5, %v9786_v61  ;;  %v7631_v60 = vpop.f32.mrf.mxu0 }
 0x56d   : > { %v7691_v1 = vcombine.low %v7667_v48, %v7683_v57  ;;  %v7692_v52 = vcombine.high %v7667_v48, %v7683_v57  ;;  %v7707_v32 = vcombine.low %v7674_v0, %v7690_v62  ;;  %v7708_v25 = vcombine.high %v7674_v0, %v7690_v62 }
 0x56e   : > { %v7835_v12 = vrot.slane %v7827_v7, %v10323_v58  ;;  %v7842_v16 = vrot.slane %v7828_v37, %v10323_v58  ;;  %v7851_v39 = vrot.slane %v7843_v10, %v10323_v58  ;;  %v7858_v36 = vrot.slane %v7844_v31, %v10323_v58  ;;  %v9773_v59 = vpop.f32.mrf.mxu1 }
 0x56f   : > { %v7887_v18 = vrot.slane %v7879_v53, %v10299_v43  ;;  %v7894_v27 = vrot.slane %v7880_v6, %v10299_v43  ;;  %v7743_v3 = vcombine.low %v13414_v63, %v7631_v60  ;;  %v7744_v40 = vcombine.high %v13414_v63, %v7631_v60 }
 0x570   : > { %v7699_v20 = vrot.slane %v7691_v1, %v10323_v58  ;;  %v7706_v14 = vrot.slane %v7692_v52, %v10323_v58  ;;  %v7715_v5 = vrot.slane %v7707_v32, %v10323_v58  ;;  %v7722_v55 = vrot.slane %v7708_v25, %v10323_v58  ;;  %v7567_v11 = vpop.f32.mrf.mxu1 }
 0x571   : > { %v7895_v35 = vcombine.low %v7871_v46, %v7887_v18  ;;  %v7896_v13 = vcombine.high %v7871_v46, %v7887_v18  ;;  %v7911_v23 = vcombine.low %v7878_v50, %v7894_v27  ;;  %v7912_v30 = vcombine.high %v7878_v50, %v7894_v27 }
 0x572   : > { %v8339_v54 = vcombine.low %v7835_v12, %v7842_v16  ;;  %v9229_v21 = vcombine.high %v7835_v12, %v7842_v16  ;;  %v7751_v38 = vrot.slane %v7743_v3, %v10299_v43  ;;  %v7758_v56 = vrot.slane %v7744_v40, %v10299_v43  ;;  %v9774_v16 = vpop.f32.mrf.mxu1 }
 0x573   : > { %v8355_v63 = vcombine.low %v7851_v39, %v7858_v36  ;;  %v9230_v8 = vcombine.high %v7851_v39, %v7858_v36  ;;  %v7903_v24 = vrot.slane %v7895_v35, %v10323_v58  ;;  %v7910_v15 = vrot.slane %v7896_v13, %v10323_v58 }
 0x574   : > { %v8203_v9 = vcombine.low %v7699_v20, %v7706_v14  ;;  %v9225_v47 = vcombine.high %v7699_v20, %v7706_v14  ;;  %v7759_v42 = vcombine.low %v7735_v49, %v7751_v38  ;;  %v7760_v51 = vcombine.high %v7735_v49, %v7751_v38 }
 0x575   : > { %v8219_v33 = vcombine.low %v7715_v5, %v7722_v55  ;;  %v9226_v48 = vcombine.high %v7715_v5, %v7722_v55  ;;  %v7919_v0 = vrot.slane %v7911_v23, %v10323_v58  ;;  %v7926_v57 = vrot.slane %v7912_v30, %v10323_v58 }
 0x576   : > { %v13459_v62 = vrot.slane %v8339_v54, %v10299_v43  ;;  %v13462_v61 = vrot.slane %v9229_v21, %v10299_v43  ;;  %v7775_v29 = vcombine.low %v7742_v4, %v7758_v56  ;;  %v7776_v19 = vcombine.high %v7742_v4, %v7758_v56  ;;  %v9789_v45 = vpop.f32.mrf.mxu0  ;;  %v7570_v54 = vpop.f32.mrf.mxu1 }
 0x577   : > { %v8407_v7 = vcombine.low %v7903_v24, %v7910_v15  ;;  %v9231_v37 = vcombine.high %v7903_v24, %v7910_v15  ;;  %v7767_v10 = vrot.slane %v7759_v42, %v10323_v58  ;;  %v7774_v31 = vrot.slane %v7760_v51, %v10323_v58 }
 0x578   : > { %v13467_v53 = vrot.slane %v8355_v63, %v10299_v43  ;;  %v13470_v6 = vrot.slane %v9230_v8, %v10299_v43  ;;  %v13473_v1 = vrot.slane %v8203_v9, %v10299_v43  ;;  %v13476_v52 = vrot.slane %v9225_v47, %v10299_v43  ;;  %v7644_v39 = vpop.f32.mrf.mxu0 }
 0x579   : > { %v13479_v32 = vrot.slane %v8219_v33, %v10299_v43  ;;  %v13482_v25 = vrot.slane %v9226_v48, %v10299_v43  ;;  %v8423_v60 = vcombine.low %v7919_v0, %v7926_v57  ;;  %v9232_v46 = vcombine.high %v7919_v0, %v7926_v57 }
 0x57a   : > { %v7783_v50 = vrot.slane %v7775_v29, %v10323_v58  ;;  %v7790_v49 = vrot.slane %v7776_v19, %v10323_v58  ;;  %v8067_v4 = vcombine.low %v13410_v41, %v9773_v59  ;;  %v8068_v12 = vcombine.high %v13410_v41, %v9773_v59  ;;  %v9790_v57 = vpop.f32.mrf.mxu0 }
 0x57b   : > { %v13489_v36 = vrot.slane %v8407_v7, %v10299_v43  ;;  %v13492_v18 = vrot.slane %v9231_v37, %v10299_v43  ;;  %v8271_v27 = vcombine.low %v7767_v10, %v7774_v31  ;;  %v9227_v3 = vcombine.high %v7767_v10, %v7774_v31 }
 0x57c   : > { %v7931_v40 = vcombine.low %v13412_v28, %v7567_v11  ;;  %v7932_v20 = vcombine.high %v13412_v28, %v7567_v11  ;;  %v8083_v14 = vcombine.low %v13418_v26, %v9789_v45  ;;  %v8084_v5 = vcombine.high %v13418_v26, %v9789_v45 }
 0x57d   : > { %v13499_v41 = vrot.slane %v8423_v60, %v10299_v43  ;;  %v13502_v55 = vrot.slane %v9232_v46, %v10299_v43  ;;  %v7947_v35 = vcombine.low %v13422_v34, %v7644_v39  ;;  %v7948_v13 = vcombine.high %v13422_v34, %v7644_v39 }
 0x57e   : > { %v8287_v23 = vcombine.low %v7783_v50, %v7790_v49  ;;  %v9228_v30 = vcombine.high %v7783_v50, %v7790_v49  ;;  %v8091_v21 = vrot.slane %v8083_v14, %v10299_v43  ;;  %v8098_v28 = vrot.slane %v8084_v5, %v10299_v43 }
 0x57f   : > { %v8075_v38 = vrot.slane %v8067_v4, %v10299_v43  ;;  %v8082_v26 = vrot.slane %v8068_v12, %v10299_v43  ;;  %v7955_v56 = vrot.slane %v7947_v35, %v10299_v43  ;;  %v7962_v59 = vrot.slane %v7948_v13, %v10299_v43 }
 0x580   : > { %v13513_v63 = vrot.slane %v8271_v27, %v10299_v43  ;;  %v13516_v34 = vrot.slane %v9227_v3, %v10299_v43  ;;  %v7939_v8 = vrot.slane %v7931_v40, %v10299_v43  ;;  %v7946_v24 = vrot.slane %v7932_v20, %v10299_v43 }
 0x581   : > { %v8135_v15 = vcombine.low %v13416_v2, %v9774_v16  ;;  %v8136_v9 = vcombine.high %v13416_v2, %v9774_v16  ;;  %v7999_v47 = vcombine.low %v13420_v44, %v7570_v54  ;;  %v8000_v42 = vcombine.high %v13420_v44, %v7570_v54  ;;  %v7647_v16 = vpop.f32.mrf.mxu0 }
 0x582   : > { %v8099_v51 = vcombine.low %v8075_v38, %v8091_v21  ;;  %v8100_v33 = vcombine.high %v8075_v38, %v8091_v21  ;;  %v8115_v48 = vcombine.low %v8082_v26, %v8098_v28  ;;  %v8116_v0 = vcombine.high %v8082_v26, %v8098_v28 }
 0x583   : > { %v7963_v29 = vcombine.low %v7939_v8, %v7955_v56  ;;  %v7964_v19 = vcombine.high %v7939_v8, %v7955_v56  ;;  %v7979_v11 = vcombine.low %v7946_v24, %v7962_v59  ;;  %v7980_v45 = vcombine.high %v7946_v24, %v7962_v59 }
 0x584   : > { %v13525_v7 = vrot.slane %v8287_v23, %v10299_v43  ;;  %v13528_v37 = vrot.slane %v9228_v30, %v10299_v43  ;;  %v8372_v2 = vcombine.high %v13459_v62, %v13462_v61  ;;  %v8388_v44 = vcombine.high %v13467_v53, %v13470_v6 }
 0x585   : > { %v8143_v10 = vrot.slane %v8135_v15, %v10299_v43  ;;  %v13536_v31 = vrot.slane %v8136_v9, %v10299_v43  ;;  %v13539_v60 = vrot.slane %v7999_v47, %v10299_v43  ;;  %v13542_v46 = vrot.slane %v8000_v42, %v10299_v43 }
 0x586   : > { %v8107_v50 = vrot.slane %v8099_v51, %v10323_v58  ;;  %v8114_v49 = vrot.slane %v8100_v33, %v10323_v58  ;;  %v8123_v4 = vrot.slane %v8115_v48, %v10323_v58  ;;  %v8130_v12 = vrot.slane %v8116_v0, %v10323_v58 }
 0x587   : > { %v7971_v39 = vrot.slane %v7963_v29, %v10323_v58  ;;  %v7978_v27 = vrot.slane %v7964_v19, %v10323_v58  ;;  %v13551_v3 = vrot.slane %v7979_v11, %v10323_v58  ;;  %v13554_v40 = vrot.slane %v7980_v45, %v10323_v58 }
 0x588   : > { %v8386_v20 = vrot.slane %v8372_v2, %v10323_v58  ;;  %v8402_v14 = vrot.slane %v8388_v44, %v10323_v58  ;;  %v8371_v5 = vcombine.low %v13459_v62, %v13462_v61  ;;  %v8387_v35 = vcombine.low %v13467_v53, %v13470_v6 }
 0x589   : > { %v8151_v13 = vcombine.low %v13424_v22, %v9790_v57  ;;  %v8152_v23 = vcombine.high %v13424_v22, %v9790_v57  ;;  %v8015_v30 = vcombine.low %v13426_v17, %v7647_v16  ;;  %v8016_v54 = vcombine.high %v13426_v17, %v7647_v16 }
 0x58a   : > { %v8611_v21 = vcombine.low %v8107_v50, %v8114_v49  ;;  %v8405_v28 = vcombine.low %v8386_v20, %v8402_v14  ;;  %v13567_v38 = vrot.slane %v8371_v5, %v10323_v58  ;;  %v13570_v26 = vrot.slane %v8387_v35, %v10323_v58 }
 0x58b   : > { %v9237_v62 = vcombine.high %v8107_v50, %v8114_v49  ;;  %v8159_v61 = vrot.slane %v8151_v13, %v10299_v43  ;;  %v8166_v53 = vrot.slane %v8152_v23, %v10299_v43  ;;  %v8023_v6 = vrot.slane %v8015_v30, %v10299_v43 }
 0x58c   : > { %v8627_v22 = vcombine.low %v8123_v4, %v8130_v12  ;;  %v9238_v56 = vcombine.high %v8123_v4, %v8130_v12  ;;  %8791 = vrot.lane.b32.xlu0 %v8405_v28, %s10104_s6  ;;  %v8404_v17 = vcombine.high %v13567_v38, %v13570_v26  ;;  %v8030_v59 = vrot.slane %v8016_v54, %v10299_v43 }
 0x58d   : > { %v8475_v8 = vcombine.low %v7971_v39, %v7978_v27  ;;  %v9233_v24 = vcombine.high %v7971_v39, %v7978_v27  ;;  %v8167_v15 = vcombine.low %v8143_v10, %v8159_v61  ;;  %v8168_v9 = vcombine.high %v8143_v10, %v8159_v61 }
 0x58e   : > { %v13580_v47 = vrot.slane %v8611_v21, %v10299_v43  ;;  %v8491_v42 = vcombine.low %v13551_v3, %v13554_v40  ;;  %v9234_v51 = vcombine.high %v13551_v3, %v13554_v40  ;;  %8759 = vrot.lane.b32.xlu1 %v8404_v17, %s10105_s30  ;;  %v8406_v33 = vcombine.high %v8386_v20, %v8402_v14 }
 0x58f   : > { %v8183_v48 = vcombine.low %v13536_v31, %v8166_v53  ;;  %v8184_v0 = vcombine.high %v13536_v31, %v8166_v53  ;;  %v8031_v57 = vcombine.low %v13539_v60, %v8023_v6  ;;  %v8032_v29 = vcombine.high %v13539_v60, %v8023_v6 }
 0x590   : > { %v8175_v19 = vrot.slane %v8167_v15, %v10323_v58  ;;  %v8182_v11 = vrot.slane %v8168_v9, %v10323_v58  ;;  %v8047_v45 = vcombine.low %v13542_v46, %v8030_v59  ;;  %v8048_v2 = vcombine.high %v13542_v46, %v8030_v59  ;;  %8823 = vrot.lane.b32.xlu0 %v8406_v33, %s10106_s28 }
 0x591   : > { %v13597_v44 = vrot.slane %v9237_v62, %v10299_v43  ;;  %v8235_v10 = vcombine.low %v13473_v1, %v13476_v52  ;;  %v8251_v31 = vcombine.low %v13479_v32, %v13482_v25  ;;  %v8236_v60 = vcombine.high %v13473_v1, %v13476_v52 }
 0x592   : > { %v13606_v50 = vrot.slane %v8627_v22, %v10299_v43  ;;  %v13609_v46 = vrot.slane %v9238_v56, %v10299_v43  ;;  %v13612_v49 = vrot.slane %v8475_v8, %v10299_v43  ;;  %v13615_v4 = vrot.slane %v9233_v24, %v10299_v43 }
 0x593   : > { %v13618_v12 = vrot.slane %v8491_v42, %v10299_v43  ;;  %v8191_v16 = vrot.slane %v8183_v48, %v10323_v58  ;;  %v8198_v39 = vrot.slane %v8184_v0, %v10323_v58  ;;  %v8039_v1 = vrot.slane %v8031_v57, %v10323_v58 }
 0x594   : > { %v8679_v52 = vcombine.low %v8175_v19, %v8182_v11  ;;  %v8046_v27 = vrot.slane %v8032_v29, %v10323_v58  ;;  %v8055_v3 = vrot.slane %v8047_v45, %v10323_v58  ;;  %v8062_v40 = vrot.slane %v8048_v2, %v10323_v58 }
 0x595   : > { %v13627_v20 = vrot.slane %v8235_v10, %v10323_v58  ;;  %v13630_v14 = vrot.slane %v8251_v31, %v10323_v58  ;;  %v8250_v5 = vrot.slane %v8236_v60, %v10323_v58  ;;  %v8252_v35 = vcombine.high %v13479_v32, %v13482_v25 }
 0x596   : > { %v8439_v13 = vcombine.low %v13489_v36, %v13492_v18  ;;  %v8455_v23 = vcombine.low %v13499_v41, %v13502_v55  ;;  %v8440_v30 = vcombine.high %v13489_v36, %v13492_v18  ;;  %v8456_v54 = vcombine.high %v13499_v41, %v13502_v55 }
 0x597   : > { %v9239_v21 = vcombine.high %v8175_v19, %v8182_v11  ;;  %v8695_v28 = vcombine.low %v8191_v16, %v8198_v39  ;;  %v8268_v62 = vcombine.high %v13627_v20, %v13630_v14  ;;  %v8266_v61 = vrot.slane %v8252_v35, %v10323_v58 }
 0x598   : > { %v9240_v32 = vcombine.high %v8191_v16, %v8198_v39  ;;  %v8543_v25 = vcombine.low %v8039_v1, %v8046_v27  ;;  %v13647_v53 = vrot.slane %v8439_v13, %v10323_v58  ;;  %v13650_v6 = vrot.slane %v8455_v23, %v10323_v58 }
 0x599   : > { %v9235_v22 = vcombine.high %v8039_v1, %v8046_v27  ;;  %8755 = vrot.lane.b32.xlu1 %v8268_v62, %s10105_s30  ;;  %v8269_v36 = vcombine.low %v8250_v5, %v8266_v61  ;;  %v8303_v18 = vcombine.low %v13513_v63, %v13516_v34  ;;  %v8319_v41 = vcombine.low %v13525_v7, %v13528_v37 }
 0x59a   : > { %v8559_v55 = vcombine.low %v8055_v3, %v8062_v40  ;;  %v9236_v56 = vcombine.high %v8055_v3, %v8062_v40  ;;  %v8454_v17 = vrot.slane %v8440_v30, %v10323_v58  ;;  %v8470_v59 = vrot.slane %v8456_v54, %v10323_v58 }
 0x59b   : > { %v13660_v8 = vrot.slane %v9234_v51, %v10299_v43  ;;  %v13663_v24 = vrot.slane %v8679_v52, %v10299_v43  ;;  %v13666_v15 = vrot.slane %v9239_v21, %v10299_v43  ;;  %8787 = vrot.lane.b32.xlu0 %v8269_v36, %s10104_s6  ;;  %v8472_v9 = vcombine.high %v13647_v53, %v13650_v6 }
 0x59c   : > { %v13672_v42 = vrot.slane %v8695_v28, %v10299_v43  ;;  %v13675_v33 = vrot.slane %v9240_v32, %v10299_v43  ;;  %v13678_v51 = vrot.slane %v8543_v25, %v10299_v43  ;;  %v8270_v48 = vcombine.high %v8250_v5, %v8266_v61 }
 0x59d   : > { %8761 = vrot.lane.b32.xlu1 %v8472_v9, %s10105_s30  ;;  %v13682_v0 = vrot.slane %v8303_v18, %v10323_v58  ;;  %v13685_v57 = vrot.slane %v8319_v41, %v10323_v58  ;;  %v8643_v29 = vcombine.low %v13580_v47, %v13597_v44  ;;  %v8659_v19 = vcombine.low %v13606_v50, %v13609_v46 }
 0x59e   : > { %v13692_v11 = vrot.slane %v9235_v22, %v10299_v43  ;;  %v13695_v45 = vrot.slane %v8559_v55, %v10299_v43  ;;  %v13698_v2 = vrot.slane %v9236_v56, %v10299_v43  ;;  %v8473_v10 = vcombine.low %v8454_v17, %v8470_v59 }
 0x59f   : > { %8819 = vrot.lane.b32.xlu0 %v8270_v48, %s10106_s28  ;;  %v8304_v31 = vcombine.high %v13513_v63, %v13516_v34  ;;  %v8320_v60 = vcombine.high %v13525_v7, %v13528_v37  ;;  %v8644_v16 = vcombine.high %v13580_v47, %v13597_v44  ;;  %v8660_v39 = vcombine.high %v13606_v50, %v13609_v46 }
 0x5a0   : > { %v8507_v1 = vcombine.low %v13612_v49, %v13615_v4  ;;  %v8711_v43 = vcombine.low %v13663_v24, %v13666_v15  ;;  %v8727_v52 = vcombine.low %v13672_v42, %v13675_v33  ;;  %v8336_v63 = vcombine.high %v13682_v0, %v13685_v57 }
 0x5a1   : > { %8793 = vrot.lane.b32.xlu1 %v8473_v10, %s10104_s6  ;;  %v13719_v34 = vrot.slane %v8643_v29, %v10323_v58  ;;  %v13722_v7 = vrot.slane %v8659_v19, %v10323_v58  ;;  %v8523_v37 = vcombine.low %v13618_v12, %v13660_v8  ;;  %v8474_v47 = vcombine.high %v8454_v17, %v8470_v59 }
 0x5a2   : > { %v8575_v44 = vcombine.low %v13678_v51, %v13692_v11  ;;  %v8591_v50 = vcombine.low %v13695_v45, %v13698_v2  ;;  %v8318_v46 = vrot.slane %v8304_v31, %v10323_v58  ;;  %v8334_v27 = vrot.slane %v8320_v60, %v10323_v58 }
 0x5a3   : > { %8757 = vrot.lane.b32.xlu0 %v8336_v63, %s10105_s30  ;;  %v8658_v3 = vrot.slane %v8644_v16, %v10323_v58  ;;  %v8674_v40 = vrot.slane %v8660_v39, %v10323_v58  ;;  %v13736_v5 = vrot.slane %v8507_v1, %v10323_v58  ;;  %v13739_v35 = vrot.slane %v8711_v43, %v10323_v58 }
 0x5a4   : > { %v13742_v13 = vrot.slane %v8727_v52, %v10323_v58  ;;  %v8676_v23 = vcombine.high %v13719_v34, %v13722_v7  ;;  %v13748_v30 = vrot.slane %v8523_v37, %v10323_v58  ;;  %v13751_v54 = vrot.slane %v8575_v44, %v10323_v58 }
 0x5a5   : > { %8825 = vrot.lane.b32.xlu1 %v8474_v47, %s10106_s28  ;;  %v13754_v21 = vrot.slane %v8591_v50, %v10323_v58  ;;  %v8403_v28 = vcombine.low %v13567_v38, %v13570_v26  ;;  %v8337_v62 = vcombine.low %v8318_v46, %v8334_v27  ;;  %v8677_v61 = vcombine.low %v8658_v3, %v8674_v40 }
 0x5a6   : > { %v8267_v32 = vcombine.low %v13627_v20, %v13630_v14  ;;  %v8471_v25 = vcombine.low %v13647_v53, %v13650_v6  ;;  %v8335_v22 = vcombine.low %v13682_v0, %v13685_v57  ;;  %v8675_v36 = vcombine.low %v13719_v34, %v13722_v7 }
 0x5a7   : > { %8767 = vrot.lane.b32.xlu0 %v8676_v23, %s10105_s30  ;;  %v8743_v18 = vcombine.low %v13739_v35, %v13742_v13  ;;  %v8508_v38 = vcombine.high %v13612_v49, %v13615_v4  ;;  %v8524_v26 = vcombine.high %v13618_v12, %v13660_v8  ;;  %v8539_v20 = vcombine.low %v13736_v5, %v13748_v30 }
 0x5a8   : > { %v8607_v14 = vcombine.low %v13751_v54, %v13754_v21  ;;  %v8338_v41 = vcombine.high %v8318_v46, %v8334_v27  ;;  %v8712_v55 = vcombine.high %v13663_v24, %v13666_v15  ;;  %v8728_v56 = vcombine.high %v13672_v42, %v13675_v33 }
 0x5a9   : > { %8789 = vrot.lane.b32.xlu1 %v8337_v62, %s10104_s6  ;;  %v8540_v49 = vcombine.high %v13736_v5, %v13748_v30  ;;  %v8522_v4 = vrot.slane %v8508_v38, %v10323_v58  ;;  %v8538_v12 = vrot.slane %v8524_v26, %v10323_v58  ;;  %v8744_v17 = vcombine.high %v13739_v35, %v13742_v13 }
 0x5aa   : > { %v8726_v59 = vrot.slane %v8712_v55, %v10323_v58  ;;  %v8742_v8 = vrot.slane %v8728_v56, %v10323_v58  ;;  %v8576_v9 = vcombine.high %v13678_v51, %v13692_v11  ;;  %v8592_v42 = vcombine.high %v13695_v45, %v13698_v2 }
 0x5ab   : > { %8799 = vrot.lane.b32.xlu0 %v8677_v61, %s10104_s6  ;;  %v8541_v24 = vcombine.low %v8522_v4, %v8538_v12  ;;  %v8542_v33 = vcombine.high %v8522_v4, %v8538_v12  ;;  %v8608_v48 = vcombine.high %v13751_v54, %v13754_v21  ;;  %v8678_v10 = vcombine.high %v8658_v3, %v8674_v40 }
 0x5ac   : > { %v8745_v15 = vcombine.low %v8726_v59, %v8742_v8  ;;  %v8590_v29 = vrot.slane %v8576_v9, %v10323_v58  ;;  %v8606_v19 = vrot.slane %v8592_v42, %v10323_v58  ;;  %v8746_v45 = vcombine.high %v8726_v59, %v8742_v8 }
 0x5ad   : > { %8821 = vrot.lane.b32.xlu1 %v8338_v41, %s10106_s28 }
 0x5ae   : > { %v8609_v51 = vcombine.low %v8590_v29, %v8606_v19  ;;  %v8610_v11 = vcombine.high %v8590_v29, %v8606_v19 }
 0x5af   : > { %8763 = vrot.lane.b32.xlu0 %v8540_v49, %s10105_s30 }
 0x5b1   : > { %8769 = vrot.lane.b32.xlu1 %v8744_v17, %s10105_s30 }
 0x5b3   : > { %8795 = vrot.lane.b32.xlu0 %v8541_v24, %s10104_s6 }
 0x5b5   : > { %8801 = vrot.lane.b32.xlu1 %v8745_v15, %s10104_s6 }
 0x5b7   : > { %8827 = vrot.lane.b32.xlu0 %v8542_v33, %s10106_s28 }
 0x5b9   : > { %8765 = vrot.lane.b32.xlu1 %v8608_v48, %s10105_s30 }
 0x5bb   : > { %8831 = vrot.lane.b32.xlu0 %v8678_v10, %s10106_s28 }
 0x5bd   : > { %8797 = vrot.lane.b32.xlu1 %v8609_v51, %s10104_s6 }
 0x5c1   : > { %8829 = vrot.lane.b32.xlu1 %v8610_v11, %s10106_s28 }
 0x5c5   : > { %8833 = vrot.lane.b32.xlu1 %v8746_v45, %s10106_s28 }
 0x5fe   : > { %v8792_v2 = vpop.permute.xlu0 %8791 }
 0x600   : > { %v8760_v31 = vpop.permute.xlu1 %8759 }
 0x601   : > { %v8845_v58 = vsel %vm4144_vm1, %v8403_v28, %v8760_v31 }
 0x602   : > { %v8854_v60 = vsel %vm8851_vm3, %v8845_v58, %v8792_v2  ;;  %v8824_v16 = vpop.permute.xlu0 %8823 }
 0x603   : > { %v8863_v39 = vsel %vm8860_vm4, %v8854_v60, %v8824_v16 }
 0x604   : > { %v8871_v1 = vsel %vm284_vm0, %v8863_v39, 0.0 }
 0x605   : > { %8879 = vst [vmem:[%s13816_s10 + $0x10] sm:$0xff] %v8871_v1 }
 0x60b   : > { %v8756_v43 = vpop.permute.xlu1 %8755 }
 0x60c   : > { %v8843_v37 = vsel %vm4144_vm1, %v8267_v32, %v8756_v43 }
 0x60d   : > { %v8788_v52 = vpop.permute.xlu0 %8787 }
 0x60e   : > { %v8852_v47 = vsel %vm8851_vm3, %v8843_v37, %v8788_v52 }
 0x60f   : > { %v8762_v63 = vpop.permute.xlu1 %8761 }
 0x610   : > { %v8846_v40 = vsel %vm4144_vm1, %v8471_v25, %v8762_v63 }
 0x611   : > { %v8820_v44 = vpop.permute.xlu0 %8819 }
 0x612   : > { %v8861_v50 = vsel %vm8860_vm4, %v8852_v47, %v8820_v44 }
 0x613   : > { %v8794_v46 = vpop.permute.xlu1 %8793  ;;  %v8869_v27 = vsel %vm284_vm0, %v8861_v50, 0.0 }
 0x614   : > { %8877 = vst [vmem:[%s13816_s10] sm:$0xff] %v8869_v27  ;;  %v8855_v23 = vsel %vm8851_vm3, %v8846_v40, %v8794_v46 }
 0x615   : > { %v8758_v3 = vpop.permute.xlu0 %8757 }
 0x616   : > { %v8844_v41 = vsel %vm4144_vm1, %v8335_v22, %v8758_v3 }
 0x617   : > { %v8826_v28 = vpop.permute.xlu1 %8825 }
 0x618   : > { %v8864_v62 = vsel %vm8860_vm4, %v8855_v23, %v8826_v28 }
 0x619   : > { %v8872_v61 = vsel %vm284_vm0, %v8864_v62, 0.0  ;;  %v8768_v32 = vpop.permute.xlu0 %8767 }
 0x61a   : > { %8880 = vst [vmem:[%s13816_s10 + $0x18] sm:$0xff] %v8872_v61  ;;  %v8849_v24 = vsel %vm4144_vm1, %v8675_v36, %v8768_v32 }
 0x61b   : > { %v8790_v38 = vpop.permute.xlu1 %8789 }
 0x61c   : > { %v8853_v53 = vsel %vm8851_vm3, %v8844_v41, %v8790_v38 }
 0x61d   : > { %v8800_v26 = vpop.permute.xlu0 %8799 }
 0x61e   : > { %v8858_v15 = vsel %vm8851_vm3, %v8849_v24, %v8800_v26 }
 0x61f   : > { %v8822_v6 = vpop.permute.xlu1 %8821 }
 0x620   : > { %v8862_v25 = vsel %vm8860_vm4, %v8853_v53, %v8822_v6 }
 0x621   : > { %v8870_v55 = vsel %vm284_vm0, %v8862_v25, 0.0  ;;  %v8764_v56 = vpop.permute.xlu0 %8763 }
 0x622   : > { %8878 = vst [vmem:[%s13816_s10 + $0x8] sm:$0xff] %v8870_v55  ;;  %v8847_v0 = vsel %vm4144_vm1, %v8539_v20, %v8764_v56 }
 0x623   : > { %v8770_v49 = vpop.permute.xlu1 %8769 }
 0x624   : > { %v8850_v48 = vsel %vm4144_vm1, %v8743_v18, %v8770_v49 }
 0x625   : > { %v8796_v4 = vpop.permute.xlu0 %8795 }
 0x626   : > { %v8856_v57 = vsel %vm8851_vm3, %v8847_v0, %v8796_v4 }
 0x627   : > { %v8802_v12 = vpop.permute.xlu1 %8801 }
 0x628   : > { %v8859_v29 = vsel %vm8851_vm3, %v8850_v48, %v8802_v12 }
 0x629   : > { %v8828_v22 = vpop.permute.xlu0 %8827 }
 0x62a   : > { %v8865_v17 = vsel %vm8860_vm4, %v8856_v57, %v8828_v22 }
 0x62b   : > { %v8766_v59 = vpop.permute.xlu1 %8765  ;;  %v8873_v8 = vsel %vm284_vm0, %v8865_v17, 0.0 }
 0x62c   : > { %8881 = vst [vmem:[%s13816_s10 + $0x20] sm:$0xff] %v8873_v8  ;;  %v8848_v42 = vsel %vm4144_vm1, %v8607_v14, %v8766_v59 }
 0x62d   : > { %v8832_v5 = vpop.permute.xlu0 %8831 }
 0x62e   : > { %v8867_v30 = vsel %vm8860_vm4, %v8858_v15, %v8832_v5 }
 0x62f   : > { %v8798_v20 = vpop.permute.xlu1 %8797  ;;  %v8875_v9 = vsel %vm284_vm0, %v8867_v30, 0.0 }
 0x630   : > { %8883 = vst [vmem:[%s13816_s10 + $0x30] sm:$0xff] %v8875_v9  ;;  %v8857_v34 = vsel %vm8851_vm3, %v8848_v42, %v8798_v20 }
 0x633   : > { %v8830_v7 = vpop.permute.xlu1 %8829 }
 0x634   : > { %v8866_v36 = vsel %vm8860_vm4, %v8857_v34, %v8830_v7 }
 0x635   : > { %v8874_v33 = vsel %vm284_vm0, %v8866_v36, 0.0 }
 0x636   : > { %8882 = vst [vmem:[%s13816_s10 + $0x28] sm:$0xff] %v8874_v33 }
 0x637   : > { %v8834_v19 = vpop.permute.xlu1 %8833 }
 0x638   : > { %v8868_v54 = vsel %vm8860_vm4, %v8859_v29, %v8834_v19 }
 0x639   : > { %v8876_v21 = vsel %vm284_vm0, %v8868_v54, 0.0 }
 0x63a   : > { %8884 = vst [vmem:[%s13816_s10 + $0x38] sm:$0xff] %v8876_v21 }
 0x63b PF: > { %s15_s18 = sadd.s32 1, %s10094_s18  }
 0x63c   : > { %p12_p4 = scmp.ge.s32.totalorder %s15_s18, 4  }
 0x63e   :  { %14 = sbr.rel (!%p12_p4) target bundleno = 1 (0x1), region = 73 }

</bundles_post_ra>
